<compile_context>
chip_gen: v7x
topology: tpu7x:2x2x1
jax: 0.10.0
libtpu: 0.0.40
codegen_flags: <defaults>
</compile_context>

<pallas_src>
import functools

import jax
import jax.numpy as jnp
from jax.experimental import pallas as pl
from jax.experimental.pallas import tpu as pltpu


# ----------------------------- Pallas kernel -------------------------------- #

def _gat_forward_kernel(bias_ref, x_ref, w1_ref, a1_ref, b1_ref,
                        w2_ref, a2_ref, b2_ref,
                        pool_ref, lw_ref, lb_ref, out_ref, *, heads, f1):
    """Fused GAT forward.  All refs are whole-array VMEM blocks, all math f32."""
    slope = 0.2                                   # GATConv default negative_slope
    bias = bias_ref[...]                          # [N, N]: 0 on edges/self-loops, -1e9 else
    n = bias.shape[0]

    # ---------------- GATConv 1: heads=8, concat=True ----------------
    xw1 = jnp.dot(x_ref[...], w1_ref[...],
                  preferred_element_type=jnp.float32)               # [N, H*F1]
    scores1 = jnp.dot(xw1, a1_ref[...],
                      preferred_element_type=jnp.float32)           # [N, 2H] (src | dst)
    src1 = scores1[:, :heads]                                       # [N, H]
    dst1 = scores1[:, heads:]                                       # [N, H]

    # logits[i, h, j] = a_dst.x_i + a_src.x_j   (edge j -> i)
    logits = dst1[:, :, None] + jnp.transpose(src1)[None, :, :]     # [N, H, N]
    z = jnp.maximum(logits, slope * logits) + bias[:, None, :]      # LeakyReLU + mask
    m = jnp.max(z, axis=-1, keepdims=True)                          # [N, H, 1]
    p = jnp.exp(z - m)                                              # unnormalized weights
    denom = jnp.sum(p, axis=-1, keepdims=True)                      # [N, H, 1]

    # Block-diagonal RHS -> single full-width MXU matmul over all heads at once.
    xw1_r = xw1.reshape(n, heads, f1)                               # [N, H, F1]
    row = jax.lax.broadcasted_iota(jnp.int32, (heads, heads), 0)
    col = jax.lax.broadcasted_iota(jnp.int32, (heads, heads), 1)
    eye = (row == col).astype(jnp.float32)                          # [H, H]
    bd = (eye[:, None, :, None] * xw1_r[None, :, :, :]).reshape(heads * n, heads * f1)
    p_wide = p.reshape(n, heads * n)                                # [N, H*N]
    agg = jnp.dot(p_wide, bd, preferred_element_type=jnp.float32)   # [N, H*F1]

    # Deferred softmax normalization (divide the [N,H*F1] result, not [N,H,N]).
    inv = 1.0 / denom                                               # [N, H, 1]
    scale = jnp.broadcast_to(inv, (n, heads, f1)).reshape(n, heads * f1)
    h1 = agg * scale + b1_ref[...]                                  # [N, H*F1]
    h1 = jnp.where(h1 > 0, h1, jnp.exp(jnp.minimum(h1, 0.0)) - 1.0)  # F.elu

    # ---------------- GATConv 2: heads=1, concat=False ----------------
    xw2 = jnp.dot(h1, w2_ref[...], preferred_element_type=jnp.float32)      # [N, F2]
    scores2 = jnp.dot(xw2, a2_ref[...], preferred_element_type=jnp.float32)  # [N, 2]
    src2 = scores2[:, 0:1]                                          # [N, 1]
    dst2 = scores2[:, 1:2]                                          # [N, 1]
    l2 = dst2 + jnp.transpose(src2)                                 # [N, N]
    z2 = jnp.maximum(l2, slope * l2) + bias
    m2 = jnp.max(z2, axis=-1, keepdims=True)
    p2 = jnp.exp(z2 - m2)                                           # unnormalized
    denom2 = jnp.sum(p2, axis=-1, keepdims=True)                    # [N, 1]
    agg2 = jnp.dot(p2, xw2, preferred_element_type=jnp.float32)     # [N, F2]
    h2 = agg2 * (1.0 / denom2) + b2_ref[...]                        # [N, F2]

    # ---------------- global_mean_pool + Linear(32, 2) ----------------
    pooled = jnp.dot(pool_ref[...], h2, preferred_element_type=jnp.float32)  # [G, F2]
    out = jnp.dot(pooled, lw_ref[...], preferred_element_type=jnp.float32) + lb_ref[...]
    out_ref[...] = out.astype(out_ref.dtype)


# --------------------------- plain-JAX glue code ----------------------------- #

def _head_score_matrix(att):
    """att: [H, F] per-head attention vector -> block matrix [H*F, H] so that
    (X @ W) @ M yields the per-head score (x'_h . a_h) in column h."""
    heads, f = att.shape
    m = jnp.zeros((heads * f, heads), jnp.float32)
    for h in range(heads):
        m = m.at[h * f:(h + 1) * f, h].set(att[h])
    return m


def build_attention_bias(edge_index, num_nodes):
    """Additive mask bias [N, N]: 0 where edge j->i exists or i == j, -1e9 elsewhere.
    Matches PyG GATConv(add_self_loops=True)."""
    # TODO(synk): duplicate edges collapse to a single logit here; PyG's softmax
    # counts edge multiplicity, so multigraphs would differ slightly.
    src, dst = edge_index[0], edge_index[1]
    m = jnp.zeros((num_nodes, num_nodes), jnp.float32).at[dst, src].set(1.0)
    m = jnp.maximum(m, jnp.eye(num_nodes, dtype=jnp.float32))
    return (m - 1.0) * 1e9


def build_pool_matrix(batch, num_graphs):
    """[G, N] matrix with P[g, n] = 1/|graph g| if batch[n] == g else 0 (f32)."""
    onehot = (batch[None, :] == jnp.arange(num_graphs)[:, None]).astype(jnp.float32)
    counts = onehot.sum(axis=1, keepdims=True)
    return onehot / jnp.maximum(counts, 1.0)


def gat_forward(params, x, edge_index, batch, num_graphs):
    n = x.shape[0]
    heads, f1 = params["att1_src"].shape          # (8, 8)

    bias = build_attention_bias(edge_index, n)    # reused by both layers
    pool = build_pool_matrix(batch, num_graphs)

    # Fuse src/dst score projections into one matmul per layer.
    a1 = jnp.concatenate([_head_score_matrix(params["att1_src"]),
                          _head_score_matrix(params["att1_dst"])], axis=1)   # [H*F1, 2H]
    a2 = jnp.concatenate([_head_score_matrix(params["att2_src"]),
                          _head_score_matrix(params["att2_dst"])], axis=1)   # [F2, 2]

    args = (bias, x, params["w1"], a1, params["b1"].reshape(1, -1),
            params["w2"], a2, params["b2"].reshape(1, -1),
            pool, params["lin_w"], params["lin_b"].reshape(1, -1))

    vmem = pl.BlockSpec(memory_space=pltpu.MemorySpace.VMEM)
    return pl.pallas_call(
        functools.partial(_gat_forward_kernel, heads=heads, f1=f1),
        out_shape=jax.ShapeDtypeStruct((num_graphs, params["lin_w"].shape[1]),
                                       jnp.float32),
        in_specs=[vmem] * len(args),              # built from args -> always matches
        out_specs=vmem,
    )(*args)


def init_params(hidden_channels, key):
    """Shapes match the PyTorch module (GATConv lin weight, att_src/att_dst, bias)."""
    hid, in_head, out_ch = 8, 8, 32
    keys = jax.random.split(key, 7)

    def glorot(k, shape):
        s = jnp.sqrt(6.0 / (shape[0] + shape[-1]))
        return jax.random.uniform(k, shape, jnp.float32, -s, s)

    return {
        "w1": glorot(keys[0], (hidden_channels, hid * in_head)),
        "att1_src": glorot(keys[1], (in_head, hid)),
        "att1_dst": glorot(keys[2], (in_head, hid)),
        "b1": jnp.zeros((hid * in_head,), jnp.float32),
        "w2": glorot(keys[3], (hid * in_head, out_ch)),
        "att2_src": glorot(keys[4], (1, out_ch)),
        "att2_dst": glorot(keys[5], (1, out_ch)),
        "b2": jnp.zeros((out_ch,), jnp.float32),
        "lin_w": glorot(keys[6], (out_ch, 2)),
        "lin_b": jnp.zeros((2,), jnp.float32),
    }


# ---------------------------------- main ------------------------------------- #

if __name__ == "__main__":
    hidden_channels = 32
    num_nodes = 16
    num_edges = 40
    num_graphs = 2

    key = jax.random.PRNGKey(0)
    k_x, k_src, k_dst, k_params = jax.random.split(key, 4)

    x = jax.random.normal(k_x, (num_nodes, hidden_channels), jnp.float32)
    src = jax.random.randint(k_src, (num_edges,), 0, num_nodes, jnp.int32)
    dst = jax.random.randint(k_dst, (num_edges,), 0, num_nodes, jnp.int32)
    edge_index = jnp.stack([src, dst], axis=0)                 # [2, E]
    batch = jnp.concatenate([jnp.zeros((num_nodes // 2,), jnp.int32),
                             jnp.ones((num_nodes - num_nodes // 2,), jnp.int32)])

    params = init_params(hidden_channels, k_params)

    out = gat_forward(params, x, edge_index, batch, num_graphs)
    out = jax.block_until_ready(out)
    assert out.shape == (num_graphs, 2), out.shape
    assert bool(jnp.all(jnp.isfinite(out)))
    print("KERNEL_OK")
</pallas_src>

<mosaic_0001>
module attributes {stable_mosaic.version = 11 : i64} {
  func.func @_gat_forward_kernel(%arg0: memref<16x16xf32, #tpu.memory_space<vmem>>, %arg1: memref<16x32xf32, #tpu.memory_space<vmem>>, %arg2: memref<32x64xf32, #tpu.memory_space<vmem>>, %arg3: memref<64x16xf32, #tpu.memory_space<vmem>>, %arg4: memref<1x64xf32, #tpu.memory_space<vmem>>, %arg5: memref<64x32xf32, #tpu.memory_space<vmem>>, %arg6: memref<32x2xf32, #tpu.memory_space<vmem>>, %arg7: memref<1x32xf32, #tpu.memory_space<vmem>>, %arg8: memref<2x16xf32, #tpu.memory_space<vmem>>, %arg9: memref<32x2xf32, #tpu.memory_space<vmem>>, %arg10: memref<1x2xf32, #tpu.memory_space<vmem>>, %arg11: memref<2x2xf32, #tpu.memory_space<vmem>>) attributes {dimension_semantics = [], scalar_prefetch = 0 : i64, scratch_operands = 0 : i64, tpu.core_type = #tpu.core_type<tc>} {
    %c0 = arith.constant 0 : index
    %c0_0 = arith.constant 0 : index
    %0 = vector.load %arg0[%c0, %c0_0] : memref<16x16xf32, #tpu.memory_space<vmem>>, vector<16x16xf32>
    %c0_1 = arith.constant 0 : index
    %c0_2 = arith.constant 0 : index
    %1 = vector.load %arg1[%c0_1, %c0_2] : memref<16x32xf32, #tpu.memory_space<vmem>>, vector<16x32xf32>
    %c0_3 = arith.constant 0 : index
    %c0_4 = arith.constant 0 : index
    %2 = vector.load %arg2[%c0_3, %c0_4] : memref<32x64xf32, #tpu.memory_space<vmem>>, vector<32x64xf32>
    %cst = arith.constant dense<0.000000e+00> : vector<16x64xf32>
    %3 = tpu.matmul %1, %2, %cst {dimension_numbers = #tpu.dot_dimension_numbers<[1], [0], [0], [1], [0, 0, 1, 1], [], []>} : vector<16x32xf32>, vector<32x64xf32>, vector<16x64xf32> -> vector<16x64xf32>
    %c0_5 = arith.constant 0 : index
    %c0_6 = arith.constant 0 : index
    %4 = vector.load %arg3[%c0_5, %c0_6] : memref<64x16xf32, #tpu.memory_space<vmem>>, vector<64x16xf32>
    %cst_7 = arith.constant dense<0.000000e+00> : vector<16x16xf32>
    %5 = tpu.matmul %3, %4, %cst_7 {dimension_numbers = #tpu.dot_dimension_numbers<[1], [0], [0], [1], [0, 0, 1, 1], [], []>} : vector<16x64xf32>, vector<64x16xf32>, vector<16x16xf32> -> vector<16x16xf32>
    %6 = vector.extract_strided_slice %5 {offsets = [0, 0], sizes = [16, 8], strides = [1, 1]} : vector<16x16xf32> to vector<16x8xf32>
    %7 = vector.extract_strided_slice %5 {offsets = [0, 8], sizes = [16, 8], strides = [1, 1]} : vector<16x16xf32> to vector<16x8xf32>
    %8 = vector.shape_cast %7 : vector<16x8xf32> to vector<16x8x1xf32>
    %9 = tpu.transpose %6, [1, 0] : vector<16x8xf32> -> vector<8x16xf32>
    %10 = vector.shape_cast %9 : vector<8x16xf32> to vector<1x8x16xf32>
    %11 = vector.broadcast %8 : vector<16x8x1xf32> to vector<16x8x16xf32>
    %12 = vector.broadcast %10 : vector<1x8x16xf32> to vector<16x8x16xf32>
    %13 = arith.addf %11, %12 : vector<16x8x16xf32>
    %cst_8 = arith.constant 2.000000e-01 : f32
    %14 = vector.broadcast %cst_8 : f32 to vector<16x8x16xf32>
    %15 = arith.mulf %14, %13 : vector<16x8x16xf32>
    %16 = arith.maximumf %13, %15 : vector<16x8x16xf32>
    %17 = vector.shape_cast %0 : vector<16x16xf32> to vector<16x1x16xf32>
    %18 = vector.broadcast %17 : vector<16x1x16xf32> to vector<16x8x16xf32>
    %19 = arith.addf %16, %18 : vector<16x8x16xf32>
    %cst_9 = arith.constant dense<0xFF800000> : vector<16x8xf32>
    %20 = vector.multi_reduction <maximumf>, %19, %cst_9 [2] : vector<16x8x16xf32> to vector<16x8xf32>
    %21 = vector.shape_cast %20 : vector<16x8xf32> to vector<16x8x1xf32>
    %22 = vector.broadcast %21 : vector<16x8x1xf32> to vector<16x8x16xf32>
    %23 = arith.subf %19, %22 : vector<16x8x16xf32>
    %24 = math.exp %23 : vector<16x8x16xf32>
    %cst_10 = arith.constant dense<0.000000e+00> : vector<16x8xf32>
    %25 = vector.multi_reduction <add>, %24, %cst_10 [2] : vector<16x8x16xf32> to vector<16x8xf32>
    %26 = vector.shape_cast %25 : vector<16x8xf32> to vector<16x8x1xf32>
    %27 = vector.shape_cast %3 : vector<16x64xf32> to vector<16x8x8xf32>
    %28 = tpu.iota {dimensions = array<i32: 0>} : vector<8x8xi32>
    %29 = tpu.iota {dimensions = array<i32: 1>} : vector<8x8xi32>
    %30 = arith.cmpi eq, %28, %29 : vector<8x8xi32>
    %31 = arith.extui %30 : vector<8x8xi1> to vector<8x8xi32>
    %32 = arith.sitofp %31 : vector<8x8xi32> to vector<8x8xf32>
    %33 = vector.shape_cast %32 : vector<8x8xf32> to vector<8x1x8x1xf32>
    %34 = vector.shape_cast %27 : vector<16x8x8xf32> to vector<1x16x8x8xf32>
    %35 = vector.broadcast %33 : vector<8x1x8x1xf32> to vector<8x16x8x8xf32>
    %36 = vector.broadcast %34 : vector<1x16x8x8xf32> to vector<8x16x8x8xf32>
    %37 = arith.mulf %35, %36 : vector<8x16x8x8xf32>
    %38 = vector.shape_cast %37 : vector<8x16x8x8xf32> to vector<128x64xf32>
    %39 = vector.shape_cast %24 : vector<16x8x16xf32> to vector<16x128xf32>
    %cst_11 = arith.constant dense<0.000000e+00> : vector<16x64xf32>
    %40 = tpu.matmul %39, %38, %cst_11 {dimension_numbers = #tpu.dot_dimension_numbers<[1], [0], [0], [1], [0, 0, 1, 1], [], []>} : vector<16x128xf32>, vector<128x64xf32>, vector<16x64xf32> -> vector<16x64xf32>
    %cst_12 = arith.constant 1.000000e+00 : f32
    %41 = vector.broadcast %cst_12 : f32 to vector<16x8x1xf32>
    %42 = arith.divf %41, %26 : vector<16x8x1xf32>
    %43 = vector.shape_cast %42 : vector<16x8x1xf32> to vector<16x8x1xf32>
    %44 = vector.broadcast %43 : vector<16x8x1xf32> to vector<16x8x8xf32>
    %45 = vector.shape_cast %44 : vector<16x8x8xf32> to vector<16x64xf32>
    %46 = arith.mulf %40, %45 : vector<16x64xf32>
    %c0_13 = arith.constant 0 : index
    %c0_14 = arith.constant 0 : index
    %47 = vector.load %arg4[%c0_13, %c0_14] : memref<1x64xf32, #tpu.memory_space<vmem>>, vector<1x64xf32>
    %48 = vector.broadcast %47 : vector<1x64xf32> to vector<16x64xf32>
    %49 = arith.addf %46, %48 : vector<16x64xf32>
    %cst_15 = arith.constant 0.000000e+00 : f32
    %50 = vector.broadcast %cst_15 : f32 to vector<16x64xf32>
    %51 = arith.cmpf ogt, %49, %50 : vector<16x64xf32>
    %cst_16 = arith.constant 0.000000e+00 : f32
    %52 = vector.broadcast %cst_16 : f32 to vector<16x64xf32>
    %53 = arith.minimumf %49, %52 : vector<16x64xf32>
    %54 = math.exp %53 : vector<16x64xf32>
    %cst_17 = arith.constant 1.000000e+00 : f32
    %55 = vector.broadcast %cst_17 : f32 to vector<16x64xf32>
    %56 = arith.subf %54, %55 : vector<16x64xf32>
    %57 = arith.select %51, %49, %56 : vector<16x64xi1>, vector<16x64xf32>
    %c0_18 = arith.constant 0 : index
    %c0_19 = arith.constant 0 : index
    %58 = vector.load %arg5[%c0_18, %c0_19] : memref<64x32xf32, #tpu.memory_space<vmem>>, vector<64x32xf32>
    %cst_20 = arith.constant dense<0.000000e+00> : vector<16x32xf32>
    %59 = tpu.matmul %57, %58, %cst_20 {dimension_numbers = #tpu.dot_dimension_numbers<[1], [0], [0], [1], [0, 0, 1, 1], [], []>} : vector<16x64xf32>, vector<64x32xf32>, vector<16x32xf32> -> vector<16x32xf32>
    %c0_21 = arith.constant 0 : index
    %c0_22 = arith.constant 0 : index
    %60 = vector.load %arg6[%c0_21, %c0_22] : memref<32x2xf32, #tpu.memory_space<vmem>>, vector<32x2xf32>
    %cst_23 = arith.constant dense<0.000000e+00> : vector<16x2xf32>
    %61 = tpu.matmul %59, %60, %cst_23 {dimension_numbers = #tpu.dot_dimension_numbers<[1], [0], [0], [1], [0, 0, 1, 1], [], []>} : vector<16x32xf32>, vector<32x2xf32>, vector<16x2xf32> -> vector<16x2xf32>
    %62 = vector.extract_strided_slice %61 {offsets = [0, 0], sizes = [16, 1], strides = [1, 1]} : vector<16x2xf32> to vector<16x1xf32>
    %63 = vector.extract_strided_slice %61 {offsets = [0, 1], sizes = [16, 1], strides = [1, 1]} : vector<16x2xf32> to vector<16x1xf32>
    %64 = tpu.transpose %62, [1, 0] : vector<16x1xf32> -> vector<1x16xf32>
    %65 = vector.broadcast %63 : vector<16x1xf32> to vector<16x16xf32>
    %66 = vector.broadcast %64 : vector<1x16xf32> to vector<16x16xf32>
    %67 = arith.addf %65, %66 : vector<16x16xf32>
    %cst_24 = arith.constant 2.000000e-01 : f32
    %68 = vector.broadcast %cst_24 : f32 to vector<16x16xf32>
    %69 = arith.mulf %68, %67 : vector<16x16xf32>
    %70 = arith.maximumf %67, %69 : vector<16x16xf32>
    %71 = arith.addf %70, %0 : vector<16x16xf32>
    %cst_25 = arith.constant dense<0xFF800000> : vector<16xf32>
    %72 = vector.multi_reduction <maximumf>, %71, %cst_25 [1] : vector<16x16xf32> to vector<16xf32>
    %73 = vector.shape_cast %72 : vector<16xf32> to vector<16x1xf32>
    %74 = vector.broadcast %73 : vector<16x1xf32> to vector<16x16xf32>
    %75 = arith.subf %71, %74 : vector<16x16xf32>
    %76 = math.exp %75 : vector<16x16xf32>
    %cst_26 = arith.constant dense<0.000000e+00> : vector<16xf32>
    %77 = vector.multi_reduction <add>, %76, %cst_26 [1] : vector<16x16xf32> to vector<16xf32>
    %78 = vector.shape_cast %77 : vector<16xf32> to vector<16x1xf32>
    %cst_27 = arith.constant dense<0.000000e+00> : vector<16x32xf32>
    %79 = tpu.matmul %76, %59, %cst_27 {dimension_numbers = #tpu.dot_dimension_numbers<[1], [0], [0], [1], [0, 0, 1, 1], [], []>} : vector<16x16xf32>, vector<16x32xf32>, vector<16x32xf32> -> vector<16x32xf32>
    %cst_28 = arith.constant 1.000000e+00 : f32
    %80 = vector.broadcast %cst_28 : f32 to vector<16x1xf32>
    %81 = arith.divf %80, %78 : vector<16x1xf32>
    %82 = vector.broadcast %81 : vector<16x1xf32> to vector<16x32xf32>
    %83 = arith.mulf %79, %82 : vector<16x32xf32>
    %c0_29 = arith.constant 0 : index
    %c0_30 = arith.constant 0 : index
    %84 = vector.load %arg7[%c0_29, %c0_30] : memref<1x32xf32, #tpu.memory_space<vmem>>, vector<1x32xf32>
    %85 = vector.broadcast %84 : vector<1x32xf32> to vector<16x32xf32>
    %86 = arith.addf %83, %85 : vector<16x32xf32>
    %c0_31 = arith.constant 0 : index
    %c0_32 = arith.constant 0 : index
    %87 = vector.load %arg8[%c0_31, %c0_32] : memref<2x16xf32, #tpu.memory_space<vmem>>, vector<2x16xf32>
    %cst_33 = arith.constant dense<0.000000e+00> : vector<2x32xf32>
    %88 = tpu.matmul %87, %86, %cst_33 {dimension_numbers = #tpu.dot_dimension_numbers<[1], [0], [0], [1], [0, 0, 1, 1], [], []>} : vector<2x16xf32>, vector<16x32xf32>, vector<2x32xf32> -> vector<2x32xf32>
    %c0_34 = arith.constant 0 : index
    %c0_35 = arith.constant 0 : index
    %89 = vector.load %arg9[%c0_34, %c0_35] : memref<32x2xf32, #tpu.memory_space<vmem>>, vector<32x2xf32>
    %cst_36 = arith.constant dense<0.000000e+00> : vector<2x2xf32>
    %90 = tpu.matmul %88, %89, %cst_36 {dimension_numbers = #tpu.dot_dimension_numbers<[1], [0], [0], [1], [0, 0, 1, 1], [], []>} : vector<2x32xf32>, vector<32x2xf32>, vector<2x2xf32> -> vector<2x2xf32>
    %c0_37 = arith.constant 0 : index
    %c0_38 = arith.constant 0 : index
    %91 = vector.load %arg10[%c0_37, %c0_38] : memref<1x2xf32, #tpu.memory_space<vmem>>, vector<1x2xf32>
    %92 = vector.broadcast %91 : vector<1x2xf32> to vector<2x2xf32>
    %93 = arith.addf %90, %92 : vector<2x2xf32>
    %c0_39 = arith.constant 0 : index
    %c0_40 = arith.constant 0 : index
    %94 = vector.load %arg11[%c0_39, %c0_40] : memref<2x2xf32, #tpu.memory_space<vmem>>, vector<2x2xf32>
    tpu.vector_store %arg11[%c0_39, %c0_40], %93 {strides = array<i32>} : memref<2x2xf32, #tpu.memory_space<vmem>>, vector<2x2xf32>,
    return
  }
}

</mosaic_0001>

<bundles_post_ra>
// kernel: tpu_custom_call.1
= control target key start
LH: loop header
LB: loop body
LE: loop exit
PB: predicated region body
PF: predicated region fallthrough
CT: control target
= control target key end

     0   :  { %vm47_vm0 = vcmask 261120   ;;  %v219_v3 = vlaneseq  ;;  %s8792_s0 = inlined_call_operand.vmem [shape: f32[16,16], index: 0, kind: input, shape index: {}]   ;;  %s8793_s1 = inlined_call_operand.vmem [shape: f32[16,32], index: 1, kind: input, shape index: {}]   ;;  %s8794_s2 = inlined_call_operand.vmem [shape: f32[32,64], index: 2, kind: input, shape index: {}]   ;;  %s8795_s3 = inlined_call_operand.vmem [shape: f32[64,16], index: 3, kind: input, shape index: {}]   ;;  %s8796_s4 = inlined_call_operand.vmem [shape: f32[1,64], index: 4, kind: input, shape index: {}]   ;;  %s8797_s5 = inlined_call_operand.vmem [shape: f32[64,32], index: 5, kind: input, shape index: {}]   ;;  %s8798_s6 = inlined_call_operand.vmem [shape: f32[32,2], index: 6, kind: input, shape index: {}]   ;;  %s8799_s7 = inlined_call_operand.vmem [shape: f32[1,32], index: 7, kind: input, shape index: {}]   ;;  %s8800_s8 = inlined_call_operand.vmem [shape: f32[2,16], index: 8, kind: input, shape index: {}]   ;;  %s8801_s9 = inlined_call_operand.vmem [shape: f32[32,2], index: 9, kind: input, shape index: {}]   ;;  %s8802_s10 = inlined_call_operand.vmem [shape: f32[1,2], index: 10, kind: input, shape index: {}]   ;;  %s8803_s11 = inlined_call_operand.hbm [shape: f32[2,2], index: 11, kind: output, shape index: {}]  }
   0x1   :  { %v43_v0 = vld [vmem:[%s8794_s2] sm:$0xff]  ;;  %v44_v1 = vld [vmem:[%s8794_s2 + $0x8] sm:$0xff]  ;;  %v45_v2 = vld [vmem:[%s8794_s2 + $0x10] sm:$0xff] }
   0x2   :  { %v5547_v4 = vpack.c.bf16 %v44_v1, %v43_v0  ;;  %v46_v5 = vld [vmem:[%s8794_s2 + $0x18] sm:$0xff]  ;;  %v41_v6 = vld [vmem:[%s8793_s1] sm:$0xff]  ;;  %v6183_v8 = vshrl.u32 %v219_v3, 7  ;;  %v130_v10 = vld [vmem:[%s8795_s3 + $0x8] sm:$0xff]  ;;  %v1085_v12 = vand.u32 127, %v219_v3 }
   0x3   :  { %v5551_v7 = vpack.c.bf16 %v46_v5, %v45_v2  ;;  %5435 = vmatprep.mubr.msk.f32.mxu0 %vm47_vm0, %v41_v6  ;;  %v129_v9 = vld [vmem:[%s8795_s3] sm:$0xff]  ;;  %v131_v11 = vld [vmem:[%s8795_s3 + $0x10] sm:$0xff]  ;;  %v132_v14 = vld [vmem:[%s8795_s3 + $0x18] sm:$0xff] }
   0x4   :  { %8992 = vst [vmem:[#allocation5_spill] sm:$0xff] %v6183_v8  ;;  %5548 = vmatprep.subr.bf16.mxu0 %v5547_v4  ;;  %v5555_v13 = vpack.c.bf16 %v130_v10, %v129_v9  ;;  %v6198_v15 = vsub.s32 0, %v6183_v8  ;;  %vm1086_vm1 = vcmp.eq.s32.totalorder %v6183_v8, %v1085_v12  ;;  %v6202_v16 = vsub.s32 1, %v6183_v8  ;;  %v133_v18 = vld [vmem:[%s8795_s3 + $0x20] sm:$0xff]  ;;  %v134_v19 = vld [vmem:[%s8795_s3 + $0x28] sm:$0xff] }
   0x5   :  { %5550 = vmatpush3.bf16.msra.mxu0 %v5547_v4  ;;  %v5559_v17 = vpack.c.bf16 %v132_v14, %v131_v11 }
   0x6   :  { %8993 = vst [vmem:[#allocation6_spill] sm:$0xff] %v6198_v15  ;;  %5552 = vmatprep.subr.bf16.mxu0 %v5551_v7  ;;  %8994 = vst [vmem:[#allocation7_spill] sm:$0xff] %v6202_v16  ;;  %5556 = vmatprep.subr.bf16.mxu1 %v5555_v13 }
   0x7   :  { %16 = vsyncpa [#allocation3], 0  ;;  %v8804_v20 = vmov 0.0   ;;  %5558 = vmatpush3.bf16.msra.mxu1 %v5555_v13  ;;  %v6212_v22 = vsub.s32 3, %v6183_v8  ;;  %v42_v24 = vld [vmem:[%s8793_s1 + $0x8] sm:$0xff]  ;;  %v5563_v26 = vpack.c.bf16 %v134_v19, %v133_v18  ;;  %v135_v27 = vld [vmem:[%s8795_s3 + $0x30] sm:$0xff] }
   0x8   :  { %v5351_v21 = vsel %vm1086_vm1, 1.0, %v8804_v20  ;;  %5560 = vmatprep.subr.bf16.mxu1 %v5559_v17  ;;  %v136_v28 = vld [vmem:[%s8795_s3 + $0x38] sm:$0xff]  ;;  %v6227_v30 = vsub.s32 2, %v6183_v8  ;;  %v6230_v31 = vsub.s32 6, %v6183_v8  ;;  %v6236_v35 = vsub.s32 4, %v6183_v8  ;;  %s6085_s1 = smov 88  }
   0x9   :  { %8995 = vst [vmem:[#allocation8_spill] sm:$0xff] %v6212_v22  ;;  %v1092_v23 = vrot.slane %v5351_v21, %v6198_v15  ;;  %5554 = vmatpush3.bf16.msra.mxu0 %v5551_v7  ;;  %v1113_v25 = vrot.slane %v5351_v21, %v6212_v22  ;;  %v1099_v29 = vrot.slane %v5351_v21, %v6202_v16  ;;  %v6240_v37 = vsub.s32 5, %v6183_v8  ;;  %s6086_s3 = smov 120   ;;  %s6087_s25 = smov 112  }
   0xa   :  { %8996 = vst [vmem:[#allocation9_spill] sm:$0xff] %v6227_v30  ;;  %8997 = vst [vmem:[#allocation10_spill] sm:$0xff] %v6230_v31  ;;  %v1134_v32 = vrot.slane %v5351_v21, %v6230_v31  ;;  %v5567_v33 = vpack.c.bf16 %v136_v28, %v135_v27  ;;  %v1106_v34 = vrot.slane %v5351_v21, %v6227_v30  ;;  %v6244_v39 = vsub.s32 7, %v6183_v8  ;;  %s6088_s26 = smov 104   ;;  %s6089_s27 = smov 96  }
   0xb   :  { %1094 = vbcast.lane.b32.xlu1 %v1092_v23, 256  ;;  %5562 = vmatpush3.bf16.msra.mxu1 %v5559_v17  ;;  %8998 = vst [vmem:[#allocation11_spill] sm:$0xff] %v6236_v35  ;;  %v1120_v36 = vrot.slane %v5351_v21, %v6236_v35  ;;  %8999 = vst [vmem:[#allocation12_spill] sm:$0xff] %v6240_v37  ;;  %v1127_v38 = vrot.slane %v5351_v21, %v6240_v37  ;;  %vm137_vm2 = vcmask 523264   ;;  %s6090_s28 = smov 80   ;;  %s6091_s29 = smov 72  }
   0xc   :  { %1115 = vbcast.lane.b32.xlu0 %v1113_v25, 256  ;;  %5436 = vmatmul.mubr.msk.f32.vlgmr.msra.gmra.mrb[0].mxu0 %vm47_vm0, %v42_v24  ;;  %9000 = vst [vmem:[#allocation13_spill] sm:$0xff] %v6244_v39  ;;  %v1141_v40 = vrot.slane %v5351_v21, %v6244_v39  ;;  %v6092_v51 = vmov 1983009808   ;;  %v6093_v57 = vmov 1934713408  }
   0xd   :  { %5564 = vmatprep.subr.bf16.mxu1 %v5563_v26  ;;  %v813_v52 = vunpack.c.l.s4 %v6092_v51  ;;  %v877_v58 = vunpack.c.l.s4 %v6093_v57  ;;  %s6094_s30 = smov 16   ;;  %s6095_s12 = smov 8   ;;  %vm3897_vm3 = vcmask 64512   ;;  %vm623_vm4 = vcmask 130048  }
   0xe   :  { %s6096_s13 = smov 32   ;;  %s6097_s2 = smov 24   ;;  %vm3930_vm5 = vcmask 195584   ;;  %vm3963_vm6 = vcmask 326656   ;;  %vm3980_vm7 = vcmask 392192   ;;  %vm3997_vm8 = vcmask 457728  }
   0xf   :  { %1101 = vbcast.lane.b32.xlu1 %v1099_v29, 256  ;;  %5566 = vmatpush3.bf16.msra.mxu1 %v5563_v26  ;;  %v814_v55 = vunpack.c.0.s8 %v813_v52  ;;  %v878_v1 = vunpack.c.0.s8 %v877_v58  ;;  %s6098_s14 = smov 40   ;;  %s6099_s15 = smov 48   ;;  %vm4350_vm9 = vcmask 654336   ;;  %vm4353_vm10 = vcmask 785408  }
  0x10   :  { %1136 = vbcast.lane.b32.xlu0 %v1134_v32, 256  ;;  %5568 = vmatprep.subr.bf16.mxu1 %v5567_v33  ;;  %s6100_s16 = smov 56   ;;  %s6102_s21 = smov 64   ;;  %vm4356_vm11 = vcmask 916480   ;;  %vm6105_vm14 = vmmov 0   ;;  %vm5331_vm15 = vcmask 9216  }
  0x11   :  { %v6282_v61 = vsub.s32 %v814_v55, %v6183_v8  ;;  %v6288_v13 = vsub.s32 %v878_v1, %v6183_v8 }
  0x13   :  { %1108 = vbcast.lane.b32.xlu1 %v1106_v34, 256  ;;  %5570 = vmatpush3.bf16.msra.mxu1 %v5567_v33  ;;  %9006 = vst [vmem:[#allocation19_spill] sm:$0xff] %v6282_v61  ;;  %9007 = vst [vmem:[#allocation20_spill] sm:$0xff] %v6288_v13 }
  0x17   :  { %1122 = vbcast.lane.b32.xlu1 %v1120_v36, 256 }
  0x1b   :  { %1129 = vbcast.lane.b32.xlu1 %v1127_v38, 256 }
  0x1f   :  { %1143 = vbcast.lane.b32.xlu1 %v1141_v40, 256 }
  0x7d   :  { %v6265_v43 = vpop.permute.xlu1 %1094 }
  0x7e   :  { %v6277_v53 = vpop.permute.xlu0 %1115 }
  0x7f   :  { %9004 = vst [vmem:[#allocation17_spill] sm:$0xff] %v6277_v53 }
  0x81   :  { %v6267_v44 = vpop.permute.xlu1 %1101 }
  0x82   :  { %v6279_v59 = vpop.permute.xlu0 %1136 }
  0x83   :  { %9005 = vst [vmem:[#allocation18_spill] sm:$0xff] %v6279_v59 }
  0x85   :  { %v6269_v45 = vpop.permute.xlu1 %1108 }
  0x89   :  { %v6271_v46 = vpop.permute.xlu1 %1122 }
  0x8a   :  { %9001 = vst [vmem:[#allocation14_spill] sm:$0xff] %v6271_v46 }
  0x8d   :  { %v6273_v47 = vpop.permute.xlu1 %1129 }
  0x8e   :  { %9002 = vst [vmem:[#allocation15_spill] sm:$0xff] %v6273_v47 }
  0x91   :  { %v6275_v48 = vpop.permute.xlu1 %1143 }
  0x92   :  { %9003 = vst [vmem:[#allocation16_spill] sm:$0xff] %v6275_v48 }
  0xdf   :  { %v5437_v41 = vpop.f32.mrb[0].mxu0 }
  0xe0   :  { %794 = vrot.lane.b32.xlu0 %v5437_v41, %s6085_s1  ;;  %770 = vrot.lane.b32.xlu1 %v5437_v41, %s6086_s3  ;;  %v6247_v42 = vpop.f32.mrb[1].mxu0 }
  0xe1   :  { %5454 = vmatprep.mubr.msk.f32.mxu1 %vm137_vm2, %v6247_v42 }
  0xe2   :  { %5455 = vmatmul.mubr.msk.f32.vlgmr.msra.gmra.mrb[0].mxu1 %vm137_vm2, %v5437_v41 }
  0xe4   :  { %776 = vrot.lane.b32.xlu1 %v5437_v41, %s6087_s25 }
  0xe8   :  { %782 = vrot.lane.b32.xlu1 %v5437_v41, %s6088_s26 }
  0xec   :  { %788 = vrot.lane.b32.xlu1 %v5437_v41, %s6089_s27 }
  0xf0   :  { %800 = vrot.lane.b32.xlu1 %v5437_v41, %s6090_s28 }
  0xf4   :  { %806 = vrot.lane.b32.xlu1 %v5437_v41, %s6091_s29 }
  0xf8   :  { %768 = vrot.lane.b32.xlu1 %v6247_v42, %s6086_s3 }
  0xfc   :  { %774 = vrot.lane.b32.xlu1 %v6247_v42, %s6087_s25 }
 0x100   :  { %780 = vrot.lane.b32.xlu1 %v6247_v42, %s6088_s26 }
 0x104   :  { %786 = vrot.lane.b32.xlu1 %v6247_v42, %s6089_s27 }
 0x108   :  { %792 = vrot.lane.b32.xlu1 %v6247_v42, %s6085_s1 }
 0x10c   :  { %798 = vrot.lane.b32.xlu1 %v6247_v42, %s6090_s28 }
 0x110   :  { %804 = vrot.lane.b32.xlu1 %v6247_v42, %s6091_s29 }
 0x152   :  { %v771_v49 = vpop.permute.xlu1 %770  ;;  %v795_v6 = vpop.permute.xlu0 %794 }
 0x156   :  { %v777_v50 = vpop.permute.xlu1 %776 }
 0x157   :  { %v946_v62 = vcombine.low %v5437_v41, %v777_v50  ;;  %v947_v2 = vcombine.high %v5437_v41, %v777_v50 }
 0x159   :  { %v954_v7 = vrot.slane %v946_v62, %v6282_v61  ;;  %v961_v14 = vrot.slane %v947_v2, %v6282_v61 }
 0x15a   :  { %v783_v54 = vpop.permute.xlu1 %782 }
 0x15b   :  { %v962_v60 = vcombine.low %v771_v49, %v783_v54  ;;  %v963_v63 = vcombine.high %v771_v49, %v783_v54 }
 0x15d   :  { %v970_v3 = vrot.slane %v962_v60, %v6282_v61  ;;  %v977_v9 = vrot.slane %v963_v63, %v6282_v61 }
 0x15e   :  { %v789_v56 = vpop.permute.xlu1 %788 }
 0x15f   :  { %v1010_v17 = vcombine.low %v954_v7, %v970_v3  ;;  %v1011_v18 = vcombine.high %v954_v7, %v970_v3  ;;  %v1026_v25 = vcombine.low %v961_v14, %v977_v9  ;;  %v1027_v26 = vcombine.high %v961_v14, %v977_v9 }
 0x161   :  { %v1018_v34 = vrot.slane %v1010_v17, %v6288_v13  ;;  %v1025_v36 = vrot.slane %v1011_v18, %v6288_v13  ;;  %v1034_v50 = vrot.slane %v1026_v25, %v6288_v13  ;;  %v1041_v51 = vrot.slane %v1027_v26, %v6288_v13 }
 0x162   :  { %v801_v0 = vpop.permute.xlu1 %800 }
 0x163   :  { %v978_v4 = vcombine.low %v789_v56, %v801_v0  ;;  %v979_v5 = vcombine.high %v789_v56, %v801_v0 }
 0x165   :  { %v986_v19 = vrot.slane %v978_v4, %v6282_v61  ;;  %v993_v21 = vrot.slane %v979_v5, %v6282_v61 }
 0x166   :  { %v807_v10 = vpop.permute.xlu1 %806 }
 0x167   :  { %v994_v11 = vcombine.low %v795_v6, %v807_v10  ;;  %v995_v12 = vcombine.high %v795_v6, %v807_v10 }
 0x169   :  { %v1002_v23 = vrot.slane %v994_v11, %v6282_v61  ;;  %v1009_v24 = vrot.slane %v995_v12, %v6282_v61 }
 0x16a   :  { %v769_v27 = vpop.permute.xlu1 %768 }
 0x16b   :  { %v1042_v28 = vcombine.low %v986_v19, %v1002_v23  ;;  %v1043_v29 = vcombine.high %v986_v19, %v1002_v23  ;;  %v1058_v32 = vcombine.low %v993_v21, %v1009_v24  ;;  %v1059_v33 = vcombine.high %v993_v21, %v1009_v24 }
 0x16d   :  { %v1050_v38 = vrot.slane %v1042_v28, %v6288_v13  ;;  %v1057_v40 = vrot.slane %v1043_v29, %v6288_v13  ;;  %v1066_v41 = vrot.slane %v1058_v32, %v6288_v13  ;;  %v1073_v49 = vrot.slane %v1059_v33, %v6288_v13 }
 0x16e   :  { %v775_v52 = vpop.permute.xlu1 %774 }
 0x16f   :  { %v6303_v54 = vcombine.low %v1018_v34, %v1050_v38  ;;  %v6305_v55 = vcombine.high %v1018_v34, %v1050_v38  ;;  %v6307_v56 = vcombine.low %v1025_v36, %v1057_v40  ;;  %v6309_v57 = vcombine.high %v1025_v36, %v1057_v40 }
 0x170   :  { %v6311_v58 = vcombine.low %v1034_v50, %v1066_v41  ;;  %v6313_v60 = vcombine.high %v1034_v50, %v1066_v41  ;;  %v6315_v62 = vcombine.low %v1041_v51, %v1073_v49  ;;  %v6317_v63 = vcombine.high %v1041_v51, %v1073_v49 }
 0x171   :  { %9008 = vst [vmem:[#allocation21_spill] sm:$0xff] %v6303_v54  ;;  %9009 = vst [vmem:[#allocation22_spill] sm:$0xff] %v6305_v55  ;;  %v810_v0 = vcombine.low %v6247_v42, %v775_v52  ;;  %v811_v1 = vcombine.high %v6247_v42, %v775_v52  ;;  %v1153_v2 = vmul.f32 %v6265_v43, %v6303_v54 }
 0x172   :  { %9010 = vst [vmem:[#allocation23_spill] sm:$0xff] %v6307_v56  ;;  %9011 = vst [vmem:[#allocation24_spill] sm:$0xff] %v6309_v57  ;;  %v1154_v3 = vmul.f32 %v6265_v43, %v6305_v55  ;;  %v781_v4 = vpop.permute.xlu1 %780  ;;  %v1155_v5 = vmul.f32 %v6265_v43, %v6307_v56  ;;  %v1156_v6 = vmul.f32 %v6265_v43, %v6309_v57 }
 0x173   :  { %9012 = vst [vmem:[#allocation25_spill] sm:$0xff] %v6311_v58  ;;  %9013 = vst [vmem:[#allocation26_spill] sm:$0xff] %v6313_v60  ;;  %v1157_v7 = vmul.f32 %v6265_v43, %v6311_v58  ;;  %v1158_v9 = vmul.f32 %v6265_v43, %v6313_v60  ;;  %v818_v42 = vrot.slane %v810_v0, %v6282_v61 }
 0x174   :  { %9014 = vst [vmem:[#allocation27_spill] sm:$0xff] %v6315_v62  ;;  %9015 = vst [vmem:[#allocation28_spill] sm:$0xff] %v6317_v63  ;;  %v825_v10 = vrot.slane %v811_v1, %v6282_v61  ;;  %v826_v11 = vcombine.low %v769_v27, %v781_v4  ;;  %v827_v12 = vcombine.high %v769_v27, %v781_v4 }
 0x175   :  { %v1159_v14 = vmul.f32 %v6265_v43, %v6315_v62  ;;  %v1160_v17 = vmul.f32 %v6265_v43, %v6317_v63  ;;  %v1409_v18 = vcombine.low %v1153_v2, %v1155_v5  ;;  %v1425_v19 = vcombine.low %v1154_v3, %v1156_v6 }
 0x176   :  { %v834_v21 = vrot.slane %v826_v11, %v6282_v61  ;;  %v841_v23 = vrot.slane %v827_v12, %v6282_v61  ;;  %v1410_v24 = vcombine.high %v1153_v2, %v1155_v5  ;;  %v1426_v25 = vcombine.high %v1154_v3, %v1156_v6  ;;  %v787_v26 = vpop.permute.xlu1 %786 }
 0x177   :  { %v1417_v28 = vrot.slane %v1409_v18, %v6282_v61  ;;  %v1433_v29 = vrot.slane %v1425_v19, %v6282_v61  ;;  %v1441_v27 = vcombine.low %v1157_v7, %v1159_v14  ;;  %v1457_v32 = vcombine.low %v1158_v9, %v1160_v17 }
 0x178   :  { %v874_v33 = vcombine.low %v818_v42, %v834_v21  ;;  %v875_v34 = vcombine.high %v818_v42, %v834_v21  ;;  %v890_v36 = vcombine.low %v825_v10, %v841_v23  ;;  %v891_v38 = vcombine.high %v825_v10, %v841_v23 }
 0x179   :  { %v1449_v40 = vrot.slane %v1441_v27, %v6282_v61  ;;  %v1465_v41 = vrot.slane %v1457_v32, %v6282_v61  ;;  %v1474_v49 = vcombine.high %v1417_v28, %v1433_v29  ;;  %v1473_v50 = vcombine.low %v1417_v28, %v1433_v29 }
 0x17a   :  { %v6346_v51 = vrot.slane %v874_v33, %v6288_v13  ;;  %v6349_v52 = vrot.slane %v875_v34, %v6288_v13  ;;  %v6352_v0 = vrot.slane %v890_v36, %v6288_v13  ;;  %v6355_v1 = vrot.slane %v891_v38, %v6288_v13  ;;  %v793_v2 = vpop.permute.xlu1 %792 }
 0x17b   :  { %v6358_v3 = vrot.slane %v1474_v49, %v6288_v13  ;;  %v1506_v4 = vcombine.high %v1449_v40, %v1465_v41  ;;  %v6361_v5 = vrot.slane %v1473_v50, %v6288_v13  ;;  %v1505_v6 = vcombine.low %v1449_v40, %v1465_v41 }
 0x17c   :  { %v1424_v42 = vrot.slane %v1410_v24, %v6282_v61  ;;  %v1440_v10 = vrot.slane %v1426_v25, %v6282_v61  ;;  %v1442_v11 = vcombine.high %v1157_v7, %v1159_v14  ;;  %v1458_v12 = vcombine.high %v1158_v9, %v1160_v17 }
 0x17d   :  { %9016 = vst [vmem:[#allocation29_spill] sm:$0xff] %v6361_v5  ;;  %v6366_v18 = vrot.slane %v1506_v4, %v6288_v13  ;;  %v6369_v19 = vrot.slane %v1505_v6, %v6288_v13  ;;  %v6373_v21 = vmul.f32 %v6267_v44, %v6303_v54  ;;  %v6377_v23 = vmul.f32 %v6267_v44, %v6305_v55 }
 0x17e   :  { %v1456_v24 = vrot.slane %v1442_v11, %v6282_v61  ;;  %v1472_v25 = vrot.slane %v1458_v12, %v6282_v61  ;;  %v1489_v7 = vcombine.low %v1424_v42, %v1440_v10  ;;  %v6383_v9 = vmul.f32 %v6267_v44, %v6307_v56  ;;  %v799_v14 = vpop.permute.xlu1 %798 }
 0x17f   :  { %9017 = vst [vmem:[#allocation30_spill] sm:$0xff] %v6369_v19  ;;  %9018 = vst [vmem:[#allocation31_spill] sm:$0xff] %v6377_v23  ;;  %v842_v32 = vcombine.low %v787_v26, %v799_v14  ;;  %v843_v33 = vcombine.high %v787_v26, %v799_v14  ;;  %v6398_v38 = vmul.f32 %v6267_v44, %v6309_v57 }
 0x180   :  { %v6394_v34 = vrot.slane %v1489_v7, %v6288_v13  ;;  %v1521_v36 = vcombine.low %v1456_v24, %v1472_v25  ;;  %v6402_v40 = vmul.f32 %v6267_v44, %v6311_v58  ;;  %v6406_v41 = vmul.f32 %v6267_v44, %v6313_v60 }
 0x181   :  { %9019 = vst [vmem:[#allocation32_spill] sm:$0xff] %v6398_v38  ;;  %v6410_v49 = vmul.f32 %v6267_v44, %v6315_v62  ;;  %v850_v26 = vrot.slane %v842_v32, %v6282_v61  ;;  %v857_v50 = vrot.slane %v843_v33, %v6282_v61  ;;  %v6419_v6 = vmul.f32 %v6267_v44, %v6317_v63 }
 0x182   :  { %9020 = vst [vmem:[#allocation33_spill] sm:$0xff] %v6402_v40  ;;  %9021 = vst [vmem:[#allocation34_spill] sm:$0xff] %v6406_v41  ;;  %v6415_v4 = vrot.slane %v1521_v36, %v6288_v13  ;;  %v805_v11 = vpop.permute.xlu1 %804  ;;  %v1681_v12 = vcombine.low %v6373_v21, %v6383_v9  ;;  %v1697_v7 = vcombine.low %v6377_v23, %v6398_v38 }
 0x183   :  { %9022 = vst [vmem:[#allocation35_spill] sm:$0xff] %v6410_v49  ;;  %9023 = vst [vmem:[#allocation36_spill] sm:$0xff] %v6419_v6  ;;  %v1713_v14 = vcombine.low %v6402_v40, %v6410_v49  ;;  %v1490_v32 = vcombine.high %v1424_v42, %v1440_v10  ;;  %v858_v20 = vcombine.low %v793_v2, %v805_v11 }
 0x184   :  { %v859_v33 = vcombine.high %v793_v2, %v805_v11  ;;  %v1689_v27 = vrot.slane %v1681_v12, %v6282_v61  ;;  %v1705_v29 = vrot.slane %v1697_v7, %v6282_v61  ;;  %v1729_v8 = vcombine.low %v6406_v41, %v6419_v6 }
 0x185   :  { %v6434_v17 = vrot.slane %v1713_v14, %v6282_v61  ;;  %v866_v42 = vrot.slane %v858_v20, %v6282_v61  ;;  %v6441_v10 = vrot.slane %v1490_v32, %v6288_v13  ;;  %v1522_v11 = vcombine.high %v1456_v24, %v1472_v25 }
 0x186   :  { %v873_v2 = vrot.slane %v859_v33, %v6282_v61  ;;  %v6444_v28 = vrot.slane %v1729_v8, %v6282_v61  ;;  %v1745_v12 = vcombine.low %v1689_v27, %v1705_v29  ;;  %v1746_v36 = vcombine.high %v1689_v27, %v1705_v29 }
 0x187   :  { %v6448_v7 = vmul.f32 %v6269_v45, %v6303_v54  ;;  %v906_v14 = vcombine.low %v850_v26, %v866_v42  ;;  %v907_v59 = vcombine.high %v850_v26, %v866_v42  ;;  %v6456_v24 = vrot.slane %v1522_v11, %v6288_v13 }
 0x188   :  { %v922_v48 = vcombine.low %v857_v50, %v873_v2  ;;  %v923_v47 = vcombine.high %v857_v50, %v873_v2  ;;  %v6451_v20 = vrot.slane %v1745_v12, %v6288_v13  ;;  %v1777_v32 = vcombine.low %v6434_v17, %v6444_v28 }
 0x189   :  { %v6459_v8 = vrot.slane %v1746_v36, %v6288_v13  ;;  %v914_v25 = vrot.slane %v906_v14, %v6288_v13  ;;  %v921_v29 = vrot.slane %v907_v59, %v6288_v13  ;;  %v9037_v23 = vcombine.high %v6361_v5, %v6369_v19 }
 0x18a   :  { %9024 = vst [vmem:[#allocation37_spill] sm:$0xff] %v6451_v20  ;;  %v930_v27 = vrot.slane %v922_v48, %v6288_v13  ;;  %v937_v26 = vrot.slane %v923_v47, %v6288_v13  ;;  %v6466_v50 = vrot.slane %v1777_v32, %v6288_v13 }
 0x18b   :  { %v6475_v2 = vcombine.low %v6346_v51, %v914_v25  ;;  %v6478_v59 = vcombine.high %v6346_v51, %v914_v25  ;;  %v6481_v47 = vcombine.low %v6349_v52, %v921_v29  ;;  %v6484_v48 = vcombine.high %v6349_v52, %v921_v29 }
 0x18c   :  { %9025 = vst [vmem:[#allocation38_spill] sm:$0xff] %v6466_v50  ;;  %v6487_v11 = vcombine.low %v6352_v0, %v930_v27  ;;  %v6490_v12 = vcombine.high %v6352_v0, %v930_v27  ;;  %v6493_v14 = vcombine.low %v6355_v1, %v937_v26  ;;  %v6496_v32 = vcombine.high %v6355_v1, %v937_v26 }
 0x18d   :  { %9026 = vst [vmem:[#allocation39_spill] sm:$0xff] %v6475_v2  ;;  %9027 = vst [vmem:[#allocation40_spill] sm:$0xff] %v6478_v59  ;;  %v1145_v51 = vmul.f32 %v6265_v43, %v6475_v2  ;;  %v1146_v25 = vmul.f32 %v6265_v43, %v6478_v59  ;;  %v1147_v52 = vmul.f32 %v6265_v43, %v6481_v47 }
 0x18e   :  { %9028 = vst [vmem:[#allocation41_spill] sm:$0xff] %v6481_v47  ;;  %9029 = vst [vmem:[#allocation42_spill] sm:$0xff] %v6484_v48  ;;  %v1148_v29 = vmul.f32 %v6265_v43, %v6484_v48  ;;  %v1149_v0 = vmul.f32 %v6265_v43, %v6487_v11  ;;  %v1150_v27 = vmul.f32 %v6265_v43, %v6490_v12 }
 0x18f   :  { %9030 = vst [vmem:[#allocation43_spill] sm:$0xff] %v6487_v11  ;;  %9031 = vst [vmem:[#allocation44_spill] sm:$0xff] %v6490_v12  ;;  %v1151_v1 = vmul.f32 %v6265_v43, %v6493_v14  ;;  %v1152_v26 = vmul.f32 %v6265_v43, %v6496_v32  ;;  %v1273_v36 = vcombine.low %v1145_v51, %v1147_v52 }
 0x190   :  { %9032 = vst [vmem:[#allocation45_spill] sm:$0xff] %v6493_v14  ;;  %9033 = vst [vmem:[#allocation46_spill] sm:$0xff] %v6496_v32  ;;  %v1289_v33 = vcombine.low %v1146_v25, %v1148_v29  ;;  %v1274_v42 = vcombine.high %v1145_v51, %v1147_v52  ;;  %v1290_v46 = vcombine.high %v1146_v25, %v1148_v29 }
 0x191   :  { %v1305_v31 = vcombine.low %v1149_v0, %v1151_v1  ;;  %v1321_v35 = vcombine.low %v1150_v27, %v1152_v26  ;;  %v1306_v39 = vcombine.high %v1149_v0, %v1151_v1  ;;  %v1322_v30 = vcombine.high %v1150_v27, %v1152_v26 }
 0x192   :  { %v1281_v37 = vrot.slane %v1273_v36, %v6282_v61  ;;  %v1297_v15 = vrot.slane %v1289_v33, %v6282_v61  ;;  %v1288_v22 = vrot.slane %v1274_v42, %v6282_v61  ;;  %v1304_v16 = vrot.slane %v1290_v46, %v6282_v61 }
 0x193   :  { %v1313_v54 = vrot.slane %v1305_v31, %v6282_v61  ;;  %v1329_v43 = vrot.slane %v1321_v35, %v6282_v61  ;;  %v1320_v53 = vrot.slane %v1306_v39, %v6282_v61  ;;  %v1336_v51 = vrot.slane %v1322_v30, %v6282_v61 }
 0x194   :  { %v1338_v25 = vcombine.high %v1281_v37, %v1297_v15  ;;  %v1337_v52 = vcombine.low %v1281_v37, %v1297_v15  ;;  %v1353_v29 = vcombine.low %v1288_v22, %v1304_v16  ;;  %v6524_v36 = vmul.f32 %v6267_v44, %v6475_v2 }
 0x195   :  { %v1370_v33 = vcombine.high %v1313_v54, %v1329_v43  ;;  %v1369_v0 = vcombine.low %v1313_v54, %v1329_v43  ;;  %v1385_v42 = vcombine.low %v1320_v53, %v1336_v51  ;;  %v6528_v46 = vmul.f32 %v6267_v44, %v6478_v59 }
 0x196   :  { %v1352_v31 = vrot.slane %v1338_v25, %v6288_v13  ;;  %v6532_v35 = vrot.slane %v1337_v52, %v6288_v13  ;;  %v1361_v30 = vrot.slane %v1353_v29, %v6288_v13  ;;  %v6537_v15 = vmul.f32 %v6267_v44, %v6481_v47 }
 0x197   :  { %v1384_v37 = vrot.slane %v1370_v33, %v6288_v13  ;;  %v6541_v39 = vrot.slane %v1369_v0, %v6288_v13  ;;  %v1393_v54 = vrot.slane %v1385_v42, %v6288_v13  ;;  %v6546_v27 = vmul.f32 %v6267_v44, %v6484_v48 }
 0x198   :  { %9034 = vst [vmem:[#allocation47_spill] sm:$0xff] %v6532_v35  ;;  %v6550_v1 = vmul.f32 %v6267_v44, %v6487_v11  ;;  %v6554_v26 = vmul.f32 %v6267_v44, %v6490_v12  ;;  %v6558_v43 = vmul.f32 %v6267_v44, %v6493_v14  ;;  %v6562_v25 = vmul.f32 %v6267_v44, %v6496_v32 }
 0x199   :  { %9035 = vst [vmem:[#allocation48_spill] sm:$0xff] %v6541_v39  ;;  %v1403_v52 = vcombine.low %v1352_v31, %v1384_v37  ;;  %v1402_v29 = vcombine.high %v6532_v35, %v6541_v39  ;;  %v1405_v0 = vcombine.low %v1361_v30, %v1393_v54  ;;  %v1404_v42 = vcombine.high %v1352_v31, %v1384_v37 }
 0x19a   :  { %v1406_v41 = vcombine.high %v1361_v30, %v1393_v54  ;;  %v1545_v6 = vcombine.low %v6524_v36, %v6537_v15  ;;  %v1561_v40 = vcombine.low %v6528_v46, %v6546_v27  ;;  %v9036_v44 = vcombine.low %v6358_v3, %v6366_v18 }
 0x19b   :  { %v5663_v38 = vpack.i.bf16 %v9037_v23, %v1402_v29  ;;  %v9038_v33 = vcombine.low %v6394_v34, %v6415_v4  ;;  %v1577_v31 = vcombine.low %v6550_v1, %v6558_v43  ;;  %v9039_v30 = vcombine.high %v6358_v3, %v6366_v18 }
 0x19c   :  { %v5668_v49 = vpack.i.bf16 %v9036_v44, %v1403_v52  ;;  %v9040_v54 = vcombine.high %v6394_v34, %v6415_v4  ;;  %v1553_v52 = vrot.slane %v1545_v6, %v6282_v61  ;;  %v1569_v44 = vrot.slane %v1561_v40, %v6282_v61 }
 0x19d   :  { %v5678_v39 = vpack.i.bf16 %v9038_v33, %v1405_v0  ;;  %v5673_v37 = vpack.i.bf16 %v9039_v30, %v1404_v42  ;;  %5664 = vrot.lane.b32.xlu0 %v5663_v38, %s6095_s12  ;;  %v1585_v23 = vrot.slane %v1577_v31, %v6282_v61  ;;  %v1593_v3 = vcombine.low %v6554_v26, %v6562_v25 }
 0x19e   :  { %v5688_v35 = vpack.i.bf16 %v9040_v54, %v1406_v41  ;;  %5669 = vrot.lane.b32.xlu1 %v5668_v49, %s6094_s30  ;;  %v1609_v34 = vcombine.low %v1553_v52, %v1569_v44  ;;  %v1810_v41 = vcombine.high %v6451_v20, %v6466_v50  ;;  %v1354_v4 = vcombine.high %v1288_v22, %v1304_v16 }
 0x19f   :  { %v1386_v40 = vcombine.high %v1320_v53, %v1336_v51  ;;  %v1601_v6 = vrot.slane %v1593_v3, %v6282_v61  ;;  %v1610_v49 = vcombine.high %v1553_v52, %v1569_v44  ;;  %v9041_v38 = vcombine.high %v6434_v17, %v6444_v28 }
 0x1a0   :  { %v6607_v33 = vmul.f32 %v6269_v45, %v6475_v2  ;;  %v6610_v0 = vrot.slane %v1609_v34, %v6288_v13  ;;  %v1368_v42 = vrot.slane %v1354_v4, %v6288_v13  ;;  %v6616_v22 = vmul.f32 %v6269_v45, %v6478_v59 }
 0x1a1   :  { %v1792_v29 = vrot.slane %v9041_v38, %v6288_v13  ;;  %v1400_v16 = vrot.slane %v1386_v40, %v6288_v13  ;;  %5674 = vrot.lane.b32.xlu0 %v5673_v37, %s6097_s2  ;;  %v1641_v53 = vcombine.low %v1585_v23, %v1601_v6  ;;  %v1624_v17 = vrot.slane %v1610_v49, %v6288_v13 }
 0x1a2   :  { %9042 = vst [vmem:[#allocation49_spill] sm:$0xff] %v6610_v0  ;;  %5679 = vrot.lane.b32.xlu1 %v5678_v39, %s6096_s13  ;;  %v1642_v28 = vcombine.high %v1585_v23, %v1601_v6  ;;  %v6629_v39 = vmul.f32 %v6269_v45, %v6481_v47  ;;  %v6633_v37 = vmul.f32 %v6269_v45, %v6484_v48 }
 0x1a3   :  { %v1407_v51 = vcombine.low %v1368_v42, %v1400_v16  ;;  %v1811_v31 = vcombine.low %v6459_v8, %v1792_v29  ;;  %v1408_v30 = vcombine.high %v1368_v42, %v1400_v16  ;;  %v1812_v54 = vcombine.high %v6459_v8, %v1792_v29 }
 0x1a4   :  { %v6624_v52 = vrot.slane %v1641_v53, %v6288_v13  ;;  %v1656_v44 = vrot.slane %v1642_v28, %v6288_v13  ;;  %v9044_v23 = vcombine.low %v6441_v10, %v6456_v24  ;;  %v9045_v8 = vcombine.high %v6441_v10, %v6456_v24 }
 0x1a5   :  { %v6643_v4 = vmul.f32 %v6269_v45, %v6487_v11  ;;  %v6647_v40 = vmul.f32 %v6269_v45, %v6490_v12  ;;  %v6656_v24 = vmul.f32 %v6269_v45, %v6493_v14  ;;  %v6660_v29 = vmul.f32 %v6269_v45, %v6496_v32 }
 0x1a6   :  { %9043 = vst [vmem:[#allocation50_spill] sm:$0xff] %v6624_v52  ;;  %v5698_v3 = vpack.i.bf16 %v9044_v23, %v1407_v51  ;;  %v5708_v34 = vpack.i.bf16 %v9045_v8, %v1408_v30  ;;  %5689 = vrot.lane.b32.xlu1 %v5688_v35, %s6098_s14  ;;  %v1674_v6 = vcombine.high %v6610_v0, %v6624_v52 }
 0x1a7   :  { %v1675_v38 = vcombine.low %v1624_v17, %v1656_v44  ;;  %v1676_v10 = vcombine.high %v1624_v17, %v1656_v44  ;;  %v6664_v42 = vmul.f32 %v6269_v45, %v6305_v55  ;;  %v6668_v35 = vmul.f32 %v6269_v45, %v6307_v56 }
 0x1a8   :  { %v5683_v16 = vpack.i.bf16 %v1810_v41, %v1674_v6  ;;  %v6672_v17 = vmul.f32 %v6269_v45, %v6309_v57  ;;  %v6676_v51 = vmul.f32 %v6269_v45, %v6311_v58  ;;  %v6680_v30 = vmul.f32 %v6269_v45, %v6313_v60 }
 0x1a9   :  { %v5693_v53 = vpack.i.bf16 %v1811_v31, %v1675_v38  ;;  %v5703_v28 = vpack.i.bf16 %v1812_v54, %v1676_v10  ;;  %v6684_v44 = vmul.f32 %v6269_v45, %v6315_v62  ;;  %v6688_v41 = vmul.f32 %v6269_v45, %v6317_v63 }
 0x1aa   :  { %5684 = vrot.lane.b32.xlu0 %v5683_v16, %s6095_s12  ;;  %5699 = vrot.lane.b32.xlu1 %v5698_v3, %s6099_s15  ;;  %v1817_v31 = vcombine.low %v6607_v33, %v6629_v39  ;;  %v1833_v54 = vcombine.low %v6616_v22, %v6633_v37  ;;  %v1849_v23 = vcombine.low %v6643_v4, %v6656_v24 }
 0x1ab   :  { %v1865_v8 = vcombine.low %v6647_v40, %v6660_v29  ;;  %v1953_v45 = vcombine.low %v6448_v7, %v6668_v35  ;;  %v1969_v6 = vcombine.low %v6664_v42, %v6672_v17  ;;  %v1985_v3 = vcombine.low %v6676_v51, %v6684_v44 }
 0x1ac   :  { %v1825_v38 = vrot.slane %v1817_v31, %v6282_v61  ;;  %v1841_v10 = vrot.slane %v1833_v54, %v6282_v61  ;;  %v1857_v16 = vrot.slane %v1849_v23, %v6282_v61  ;;  %v2001_v49 = vcombine.low %v6680_v30, %v6688_v41 }
 0x1ad   :  { %v1873_v18 = vrot.slane %v1865_v8, %v6282_v61  ;;  %v1961_v52 = vrot.slane %v1953_v45, %v6282_v61  ;;  %v1977_v0 = vrot.slane %v1969_v6, %v6282_v61  ;;  %v1993_v50 = vrot.slane %v1985_v3, %v6282_v61 }
 0x1ae   :  { %5694 = vrot.lane.b32.xlu0 %v5693_v53, %s6094_s30  ;;  %5709 = vrot.lane.b32.xlu1 %v5708_v34, %s6100_s16  ;;  %v1881_v31 = vcombine.low %v1825_v38, %v1841_v10  ;;  %v2009_v54 = vrot.slane %v2001_v49, %v6282_v61  ;;  %v1546_v23 = vcombine.high %v6524_v36, %v6537_v15 }
 0x1af   :  { %v1913_v20 = vcombine.low %v1857_v16, %v1873_v18  ;;  %v2017_v19 = vcombine.low %v1961_v52, %v1977_v0  ;;  %v1562_v8 = vcombine.high %v6528_v46, %v6546_v27  ;;  %v1578_v45 = vcombine.high %v6550_v1, %v6558_v43  ;;  %v9050_v43 = vld [vmem:[#allocation32_spill] sm:$0xff] }
 0x1b0   :  { %v6725_v6 = vrot.slane %v1881_v31, %v6288_v13  ;;  %v2049_v53 = vcombine.low %v1993_v50, %v2009_v54  ;;  %v1560_v34 = vrot.slane %v1546_v23, %v6282_v61  ;;  %v1594_v49 = vcombine.high %v6554_v26, %v6562_v25  ;;  %v9054_v31 = vld [vmem:[#allocation36_spill] sm:$0xff] }
 0x1b1   :  { %v6731_v3 = vrot.slane %v1913_v20, %v6288_v13  ;;  %v6734_v36 = vrot.slane %v2017_v19, %v6288_v13  ;;  %v1576_v46 = vrot.slane %v1562_v8, %v6282_v61  ;;  %v1592_v15 = vrot.slane %v1578_v45, %v6282_v61  ;;  %v9051_v20 = vld [vmem:[#allocation31_spill] sm:$0xff] }
 0x1b2   :  { %9046 = vst [vmem:[#allocation51_spill] sm:$0xff] %v6725_v6  ;;  %5704 = vrot.lane.b32.xlu0 %v5703_v28, %s6097_s2  ;;  %v6740_v27 = vrot.slane %v2049_v53, %v6288_v13  ;;  %v1608_v1 = vrot.slane %v1594_v49, %v6282_v61  ;;  %v1682_v26 = vcombine.high %v6373_v21, %v6383_v9  ;;  %v9052_v8 = vld [vmem:[#allocation35_spill] sm:$0xff]  ;;  %v9053_v28 = vld [vmem:[#allocation33_spill] sm:$0xff] }
 0x1b3   :  { %9047 = vst [vmem:[#allocation52_spill] sm:$0xff] %v6731_v3  ;;  %9048 = vst [vmem:[#allocation53_spill] sm:$0xff] %v6734_v36  ;;  %v1698_v25 = vcombine.high %v9051_v20, %v9050_v43  ;;  %v1946_v19 = vcombine.high %v6725_v6, %v6731_v3  ;;  %v1625_v23 = vcombine.low %v1560_v34, %v1576_v46  ;;  %v9055_v3 = vld [vmem:[#allocation34_spill] sm:$0xff] }
 0x1b4   :  { %9049 = vst [vmem:[#allocation54_spill] sm:$0xff] %v6740_v27  ;;  %v1714_v45 = vcombine.high %v9053_v28, %v9052_v8  ;;  %v2082_v49 = vcombine.high %v6734_v36, %v6740_v27  ;;  %v1657_v21 = vcombine.low %v1592_v15, %v1608_v1  ;;  %v1696_v9 = vrot.slane %v1682_v26, %v6282_v61 }
 0x1b5   :  { %v1633_v43 = vrot.slane %v1625_v23, %v6288_v13  ;;  %v1712_v20 = vrot.slane %v1698_v25, %v6282_v61  ;;  %v1730_v6 = vcombine.high %v9055_v3, %v9054_v31  ;;  %v1882_v28 = vcombine.high %v1825_v38, %v1841_v10  ;;  %v6765_v26 = vpop.f32.mrb[0].mxu1 }
 0x1b6   :  { %v1728_v5 = vrot.slane %v1714_v45, %v6282_v61  ;;  %v5718_v63 = vpack.i.bf16 %v2082_v49, %v1946_v19  ;;  %v1665_v8 = vrot.slane %v1657_v21, %v6288_v13  ;;  %v1914_v53 = vcombine.high %v1857_v16, %v1873_v18  ;;  %9056 = vst [vmem:[#allocation32_spill] sm:$0xff] %v6765_v26  ;;  %v6770_v19 = vpop.f32.mrb[1].mxu1 }
 0x1b7   :  { %v1744_v62 = vrot.slane %v1730_v6, %v6282_v61  ;;  %v1761_v27 = vcombine.low %v1696_v9, %v1712_v20  ;;  %v2018_v36 = vcombine.high %v1961_v52, %v1977_v0  ;;  %v2050_v60 = vcombine.high %v1993_v50, %v2009_v54 }
 0x1b8   :  { %5719 = vrot.lane.b32.xlu1 %v5718_v63, %s6095_s12  ;;  %v1677_v25 = vcombine.low %v1633_v43, %v1665_v8  ;;  %v1896_v23 = vrot.slane %v1882_v28, %v6288_v13  ;;  %v1928_v45 = vrot.slane %v1914_v53, %v6288_v13  ;;  %v1678_v3 = vcombine.high %v1633_v43, %v1665_v8 }
 0x1b9   :  { %v1769_v38 = vrot.slane %v1761_v27, %v6288_v13  ;;  %v1793_v18 = vcombine.low %v1728_v5, %v1744_v62  ;;  %v2032_v10 = vrot.slane %v2018_v36, %v6288_v13  ;;  %v2064_v0 = vrot.slane %v2050_v60, %v6288_v13 }
 0x1ba   :  { %v1947_v50 = vcombine.low %v1896_v23, %v1928_v45  ;;  %v1948_v52 = vcombine.high %v1896_v23, %v1928_v45  ;;  %v1626_v16 = vcombine.high %v1560_v34, %v1576_v46  ;;  %v1658_v54 = vcombine.high %v1592_v15, %v1608_v1 }
 0x1bb   :  { %v1801_v63 = vrot.slane %v1793_v18, %v6288_v13  ;;  %v2083_v6 = vcombine.low %v2032_v10, %v2064_v0  ;;  %v2084_v31 = vcombine.high %v2032_v10, %v2064_v0  ;;  %v1762_v49 = vcombine.high %v1696_v9, %v1712_v20 }
 0x1bc   :  { %v1640_v53 = vrot.slane %v1626_v16, %v6288_v13  ;;  %v1672_v21 = vrot.slane %v1658_v54, %v6288_v13  ;;  %v1794_v43 = vcombine.high %v1728_v5, %v1744_v62  ;;  %v1818_v27 = vcombine.high %v6607_v33, %v6629_v39 }
 0x1bd   :  { %v1813_v36 = vcombine.low %v1769_v38, %v1801_v63  ;;  %v5728_v8 = vpack.i.bf16 %v2083_v6, %v1947_v50  ;;  %v1814_v60 = vcombine.high %v1769_v38, %v1801_v63  ;;  %v5738_v28 = vpack.i.bf16 %v2084_v31, %v1948_v52 }
 0x1be   :  { %v1679_v23 = vcombine.low %v1640_v53, %v1672_v21  ;;  %v1776_v34 = vrot.slane %v1762_v49, %v6288_v13  ;;  %v1808_v46 = vrot.slane %v1794_v43, %v6288_v13  ;;  %v6783_v15 = vrot.slane %v1818_v27, %v6282_v61  ;;  %v9065_v27 = vld [vmem:[#allocation21_spill] sm:$0xff] }
 0x1bf   :  { %v5713_v1 = vpack.i.bf16 %v1813_v36, %v1677_v25  ;;  %5729 = vrot.lane.b32.xlu1 %v5728_v8, %s6094_s30  ;;  %v5723_v9 = vpack.i.bf16 %v1814_v60, %v1678_v3  ;;  %v1834_v62 = vcombine.high %v6616_v22, %v6633_v37  ;;  %v1850_v5 = vcombine.high %v6643_v4, %v6656_v24  ;;  %v9057_v3 = vld [vmem:[#allocation17_spill] sm:$0xff] }
 0x1c0   :  { %v1815_v33 = vcombine.low %v1776_v34, %v1808_v46  ;;  %v1866_v39 = vcombine.high %v6647_v40, %v6660_v29  ;;  %v1954_v20 = vcombine.high %v6448_v7, %v6668_v35  ;;  %v1970_v45 = vcombine.high %v6664_v42, %v6672_v17 }
 0x1c1   :  { %5714 = vrot.lane.b32.xlu0 %v5713_v1, %s6096_s13  ;;  %v6798_v25 = vrot.slane %v1834_v62, %v6282_v61  ;;  %v6801_v22 = vrot.slane %v1850_v5, %v6282_v61  ;;  %v1986_v37 = vcombine.high %v6676_v51, %v6684_v44  ;;  %v2002_v4 = vcombine.high %v6680_v30, %v6688_v41  ;;  %v9075_v5 = vld [vmem:[#allocation28_spill] sm:$0xff] }
 0x1c2   :  { %v5733_v40 = vpack.i.bf16 %v1815_v33, %v1679_v23  ;;  %v6808_v7 = vrot.slane %v1866_v39, %v6282_v61  ;;  %v6811_v24 = vrot.slane %v1954_v20, %v6282_v61  ;;  %v6814_v29 = vrot.slane %v1970_v45, %v6282_v61 }
 0x1c3   :  { %5739 = vrot.lane.b32.xlu1 %v5738_v28, %s6097_s2  ;;  %v1897_v42 = vcombine.low %v6783_v15, %v6798_v25  ;;  %v6820_v35 = vrot.slane %v1986_v37, %v6282_v61  ;;  %v6823_v17 = vrot.slane %v2002_v4, %v6282_v61  ;;  %v1680_v51 = vcombine.high %v1640_v53, %v1672_v21 }
 0x1c4   :  { %v1929_v30 = vcombine.low %v6801_v22, %v6808_v7  ;;  %v2033_v44 = vcombine.low %v6811_v24, %v6814_v29  ;;  %v1816_v41 = vcombine.high %v1776_v34, %v1808_v46  ;;  %v6831_v38 = vmul.f32 %v9057_v3, %v6475_v2  ;;  %v9071_v46 = vld [vmem:[#allocation26_spill] sm:$0xff] }
 0x1c5   :  { %5724 = vrot.lane.b32.xlu0 %v5723_v9, %s6098_s14  ;;  %v6835_v18 = vrot.slane %v1897_v42, %v6288_v13  ;;  %v2065_v10 = vcombine.low %v6820_v35, %v6823_v17  ;;  %v6841_v0 = vmul.f32 %v9057_v3, %v6478_v59  ;;  %v6845_v50 = vmul.f32 %v9057_v3, %v6481_v47  ;;  %v9073_v9 = vld [vmem:[#allocation27_spill] sm:$0xff] }
 0x1c6   :  { %9058 = vst [vmem:[#allocation31_spill] sm:$0xff] %v6831_v38  ;;  %v6848_v52 = vrot.slane %v1929_v30, %v6288_v13  ;;  %v6851_v16 = vrot.slane %v2033_v44, %v6288_v13  ;;  %v5743_v54 = vpack.i.bf16 %v1816_v41, %v1680_v51  ;;  %v6855_v63 = vmul.f32 %v9057_v3, %v6484_v48 }
 0x1c7   :  { %9059 = vst [vmem:[#allocation35_spill] sm:$0xff] %v6841_v0  ;;  %v6858_v6 = vrot.slane %v2065_v10, %v6288_v13  ;;  %v6862_v31 = vmul.f32 %v9057_v3, %v6487_v11  ;;  %v6866_v49 = vmul.f32 %v9057_v3, %v6490_v12  ;;  %v6870_v53 = vmul.f32 %v9057_v3, %v6493_v14 }
 0x1c8   :  { %9060 = vst [vmem:[#allocation33_spill] sm:$0xff] %v6855_v63  ;;  %v1949_v21 = vcombine.low %v6835_v18, %v6848_v52  ;;  %v6876_v43 = vmul.f32 %v9057_v3, %v6496_v32  ;;  %v6880_v36 = vmul.f32 %v9057_v3, %v9065_v27  ;;  %v6884_v8 = vmul.f32 %v9057_v3, %v6305_v55 }
 0x1c9   :  { %9061 = vst [vmem:[#allocation36_spill] sm:$0xff] %v6862_v31  ;;  %9062 = vst [vmem:[#allocation34_spill] sm:$0xff] %v6866_v49  ;;  %5734 = vrot.lane.b32.xlu0 %v5733_v40, %s6099_s15  ;;  %v2085_v60 = vcombine.low %v6851_v16, %v6858_v6  ;;  %v6891_v28 = vmul.f32 %v9057_v3, %v6307_v56  ;;  %v6895_v23 = vmul.f32 %v9057_v3, %v6309_v57 }
 0x1ca   :  { %9063 = vst [vmem:[#allocation17_spill] sm:$0xff] %v6870_v53  ;;  %9064 = vst [vmem:[#allocation55_spill] sm:$0xff] %v6876_v43  ;;  %v6899_v34 = vmul.f32 %v9057_v3, %v6311_v58  ;;  %v6903_v1 = vmul.f32 %v9057_v3, %v9071_v46  ;;  %v6907_v62 = vmul.f32 %v9057_v3, %v9073_v9 }
 0x1cb   :  { %9066 = vst [vmem:[#allocation56_spill] sm:$0xff] %v6880_v36  ;;  %9067 = vst [vmem:[#allocation57_spill] sm:$0xff] %v6884_v8  ;;  %v6911_v33 = vmul.f32 %v9057_v3, %v9075_v5  ;;  %v2089_v39 = vcombine.low %v6831_v38, %v6845_v50  ;;  %v5748_v20 = vpack.i.bf16 %v2085_v60, %v1949_v21 }
 0x1cc   :  { %9068 = vst [vmem:[#allocation58_spill] sm:$0xff] %v6891_v28  ;;  %9069 = vst [vmem:[#allocation59_spill] sm:$0xff] %v6895_v23  ;;  %v2105_v45 = vcombine.low %v6841_v0, %v6855_v63  ;;  %v2121_v37 = vcombine.low %v6862_v31, %v6870_v53  ;;  %v2137_v4 = vcombine.low %v6866_v49, %v6876_v43  ;;  %v9086_v43 = vld [vmem:[#allocation11_spill] sm:$0xff]  ;;  %v9087_v53 = vld [vmem:[#allocation10_spill] sm:$0xff] }
 0x1cd   :  { %9070 = vst [vmem:[#allocation60_spill] sm:$0xff] %v6899_v34  ;;  %9072 = vst [vmem:[#allocation61_spill] sm:$0xff] %v6903_v1  ;;  %v2097_v40 = vrot.slane %v2089_v39, %v6282_v61  ;;  %v2225_v42 = vcombine.low %v6880_v36, %v6891_v28  ;;  %v2241_v51 = vcombine.low %v6884_v8, %v6895_v23  ;;  %5749 = vrot.lane.b32.xlu1 %v5748_v20, %s6096_s13  ;;  %v9077_v20 = vld [vmem:[#allocation7_spill] sm:$0xff]  ;;  %v9083_v36 = vld [vmem:[#allocation12_spill] sm:$0xff] }
 0x1ce   :  { %9074 = vst [vmem:[#allocation62_spill] sm:$0xff] %v6907_v62  ;;  %9076 = vst [vmem:[#allocation63_spill] sm:$0xff] %v6911_v33  ;;  %v2257_v30 = vcombine.low %v6899_v34, %v6907_v62  ;;  %5744 = vrot.lane.b32.xlu0 %v5743_v54, %s6100_s16  ;;  %v2113_v44 = vrot.slane %v2105_v45, %v6282_v61  ;;  %v2129_v41 = vrot.slane %v2121_v37, %v6282_v61  ;;  %v9084_v28 = vld [vmem:[#allocation9_spill] sm:$0xff] }
 0x1cf   :  { %v2145_v3 = vrot.slane %v2137_v4, %v6282_v61  ;;  %v2233_v10 = vrot.slane %v2225_v42, %v6282_v61  ;;  %v2249_v21 = vrot.slane %v2241_v51, %v6282_v61  ;;  %v2273_v39 = vcombine.low %v6903_v1, %v6911_v33  ;;  %v9080_v42 = vld [vmem:[#allocation8_spill] sm:$0xff] }
 0x1d0   :  { %v2265_v60 = vrot.slane %v2257_v30, %v6282_v61  ;;  %v2153_v34 = vcombine.low %v2097_v40, %v2113_v44  ;;  %v294_v54 = vrot.slane %v6765_v26, %v9077_v20  ;;  %v310_v51 = vrot.slane %v6765_v26, %v9080_v42  ;;  %v9081_v30 = vld [vmem:[#allocation6_spill] sm:$0xff] }
 0x1d1   :  { %v2185_v62 = vcombine.low %v2129_v41, %v2145_v3  ;;  %v2281_v45 = vrot.slane %v2273_v39, %v6282_v61  ;;  %v2289_v8 = vcombine.low %v2233_v10, %v2249_v21  ;;  %v286_v1 = vrot.slane %v6765_v26, %v9081_v30 }
 0x1d2   :  { %v6942_v37 = vrot.slane %v2153_v34, %v6288_v13  ;;  %297 = vbcast.lane.b32.xlu1 %v294_v54, 264  ;;  %v326_v39 = vrot.slane %v6765_v26, %v9083_v36  ;;  %v9085_v54 = vld [vmem:[#allocation13_spill] sm:$0xff]  ;;  %v238_v34 = vrot.slane %v6770_v19, %v9084_v28  ;;  %v1898_v38 = vcombine.high %v6783_v15, %v6798_v25 }
 0x1d3   :  { %v6945_v4 = vrot.slane %v2185_v62, %v6288_v13  ;;  %v6952_v33 = vrot.slane %v2289_v8, %v6288_v13  ;;  %v2321_v23 = vcombine.low %v2265_v60, %v2281_v45  ;;  %v342_v49 = vrot.slane %v6765_v26, %v9085_v54 }
 0x1d4   :  { %9078 = vst [vmem:[#allocation7_spill] sm:$0xff] %v6942_v37  ;;  %v2086_v31 = vcombine.high %v6851_v16, %v6858_v6  ;;  %v1930_v8 = vcombine.high %v6801_v22, %v6808_v7  ;;  %v2290_v7 = vcombine.high %v2233_v10, %v2249_v21 }
 0x1d5   :  { %9079 = vst [vmem:[#allocation64_spill] sm:$0xff] %v6945_v4  ;;  %9082 = vst [vmem:[#allocation8_spill] sm:$0xff] %v6952_v33  ;;  %v2218_v0 = vcombine.high %v6942_v37, %v6945_v4  ;;  %v6969_v63 = vrot.slane %v2321_v23, %v6288_v13  ;;  %v2034_v23 = vcombine.high %v6811_v24, %v6814_v29 }
 0x1d6   :  { %313 = vbcast.lane.b32.xlu1 %v310_v51, 264  ;;  %v1950_v51 = vcombine.high %v6835_v18, %v6848_v52  ;;  %v2066_v4 = vcombine.high %v6820_v35, %v6823_v17  ;;  %v2154_v18 = vcombine.high %v2097_v40, %v2113_v44  ;;  %v2186_v52 = vcombine.high %v2129_v41, %v2145_v3 }
 0x1d7   :  { %9088 = vst [vmem:[#allocation12_spill] sm:$0xff] %v6969_v63  ;;  %v2354_v37 = vcombine.high %v6952_v33, %v6969_v63  ;;  %v7000_v63 = vrot.slane %v1898_v38, %v6288_v13  ;;  %v7003_v15 = vrot.slane %v1930_v8, %v6288_v13  ;;  %v7006_v25 = vrot.slane %v2034_v23, %v6288_v13 }
 0x1d8   :  { %v7009_v22 = vrot.slane %v2066_v4, %v6288_v13  ;;  %v7015_v29 = vrot.slane %v2154_v18, %v6288_v13  ;;  %v7018_v35 = vrot.slane %v2186_v52, %v6288_v13  ;;  %v2322_v17 = vcombine.high %v2265_v60, %v2281_v45 }
 0x1d9   :  { %v5753_v62 = vpack.i.bf16 %v2354_v37, %v2218_v0  ;;  %v7020_v38 = vpack.i.bf16 %v2086_v31, %v1950_v51  ;;  %v1951_v16 = vcombine.low %v7000_v63, %v7003_v15  ;;  %v7029_v40 = vrot.slane %v2290_v7, %v6288_v13  ;;  %v9089_v31 = vld [vmem:[#allocation14_spill] sm:$0xff] }
 0x1da   :  { %329 = vbcast.lane.b32.xlu1 %v326_v39, 264  ;;  %v2087_v6 = vcombine.low %v7006_v25, %v7009_v22  ;;  %v7032_v44 = vrot.slane %v2322_v17, %v6288_v13  ;;  %v7038_v3 = vmul.f32 %v9089_v31, %v6475_v2  ;;  %v7050_v37 = vmul.f32 %v9089_v31, %v6478_v59  ;;  %v9111_v2 = vld [vmem:[#allocation62_spill] sm:$0xff] }
 0x1db   :  { %5754 = vrot.lane.b32.xlu0 %v5753_v62, %s6095_s12  ;;  %v7054_v4 = vmul.f32 %v9089_v31, %v6481_v47  ;;  %v7062_v39 = vmul.f32 %v9089_v31, %v6487_v11  ;;  %v7066_v62 = vmul.f32 %v9089_v31, %v6490_v12  ;;  %v7074_v8 = vmul.f32 %v9089_v31, %v6496_v32  ;;  %v9097_v32 = vld [vmem:[#allocation17_spill] sm:$0xff]  ;;  %v9099_v12 = vld [vmem:[#allocation55_spill] sm:$0xff]  ;;  %v9100_v11 = vld [vmem:[#allocation34_spill] sm:$0xff] }
 0x1dc   :  { %v7040_v10 = vpack.i.bf16 %v2087_v6, %v1951_v16  ;;  %v7078_v23 = vmul.f32 %v9089_v31, %v9065_v27  ;;  %v7086_v52 = vmul.f32 %v9089_v31, %v6305_v55  ;;  %v7090_v7 = vmul.f32 %v9089_v31, %v6307_v56  ;;  %v9095_v55 = vld [vmem:[#allocation33_spill] sm:$0xff] }
 0x1dd   :  { %v7094_v17 = vmul.f32 %v9089_v31, %v6309_v57  ;;  %v7098_v16 = vmul.f32 %v9089_v31, %v6311_v58  ;;  %v7102_v6 = vmul.f32 %v9089_v31, %v9071_v46  ;;  %v7106_v0 = vmul.f32 %v9089_v31, %v9073_v9 }
 0x1de   :  { %345 = vbcast.lane.b32.xlu1 %v342_v49, 264  ;;  %v7058_v49 = vmul.f32 %v9089_v31, %v6484_v48  ;;  %v9091_v24 = vrot.slane %v6765_v26, %v9084_v28  ;;  %v2361_v18 = vcombine.low %v7038_v3, %v7054_v4  ;;  %v2409_v41 = vcombine.low %v7066_v62, %v7074_v8 }
 0x1df   :  { %289 = vbcast.lane.b32.xlu0 %v286_v1, 264  ;;  %v7070_v1 = vmul.f32 %v9089_v31, %v6493_v14  ;;  %9090 = vst [vmem:[#allocation9_spill] sm:$0xff] %v7102_v6  ;;  %v2497_v28 = vcombine.low %v7078_v23, %v7090_v7  ;;  %v9092_v9 = vrot.slane %v6770_v19, %v9080_v42  ;;  %v9094_v42 = vld [vmem:[#allocation31_spill] sm:$0xff] }
 0x1e0   :  { %v2377_v45 = vcombine.low %v7050_v37, %v7058_v49  ;;  %v7130_v51 = vrot.slane %v2361_v18, %v6282_v61  ;;  %v2417_v46 = vrot.slane %v2409_v41, %v6282_v61  ;;  %v9096_v41 = vld [vmem:[#allocation35_spill] sm:$0xff] }
 0x1e1   :  { %v2393_v60 = vcombine.low %v7062_v39, %v7070_v1  ;;  %v2505_v58 = vrot.slane %v2497_v28, %v6282_v61  ;;  %v2106_v27 = vcombine.high %v9096_v41, %v9095_v55  ;;  %v9102_v55 = vrot.slane %v6770_v19, %v9083_v36  ;;  %v9107_v36 = vld [vmem:[#allocation58_spill] sm:$0xff]  ;;  %v9108_v41 = vld [vmem:[#allocation56_spill] sm:$0xff] }
 0x1e2   :  { %241 = vbcast.lane.b32.xlu1 %v238_v34, 264  ;;  %v7113_v34 = vmul.f32 %v9089_v31, %v9075_v5  ;;  %v2529_v31 = vcombine.low %v7098_v16, %v7106_v0  ;;  %v7133_v21 = vrot.slane %v2377_v45, %v6282_v61  ;;  %v9093_v45 = vrot.slane %v6765_v26, %v9086_v43 }
 0x1e3   :  { %305 = vbcast.lane.b32.xlu0 %v9091_v24, 264  ;;  %v2513_v24 = vcombine.low %v7086_v52, %v7094_v17  ;;  %v7136_v33 = vrot.slane %v2393_v60, %v6282_v61 }
 0x1e4   :  { %v2545_v5 = vcombine.low %v7102_v6, %v7113_v34  ;;  %v2537_v57 = vrot.slane %v2529_v31, %v6282_v61  ;;  %v2425_v60 = vcombine.low %v7130_v51, %v7133_v21  ;;  %v9098_v31 = vld [vmem:[#allocation36_spill] sm:$0xff] }
 0x1e5   :  { %v2521_v18 = vrot.slane %v2513_v24, %v6282_v61  ;;  %v2457_v28 = vcombine.low %v7136_v33, %v2417_v46  ;;  %v2122_v14 = vcombine.high %v9098_v31, %v9097_v32  ;;  %v2226_v31 = vcombine.high %v9108_v41, %v9107_v36 }
 0x1e6   :  { %249 = vbcast.lane.b32.xlu1 %v9092_v9, 264  ;;  %v2553_v56 = vrot.slane %v2545_v5, %v6282_v61  ;;  %v2090_v9 = vcombine.high %v9094_v42, %v6845_v50  ;;  %v7163_v48 = vrot.slane %v2425_v60, %v6288_v13  ;;  %v2120_v50 = vrot.slane %v2106_v27, %v6282_v61 }
 0x1e7   :  { %321 = vbcast.lane.b32.xlu0 %v9093_v45, 264  ;;  %v2561_v24 = vcombine.low %v2505_v58, %v2521_v18  ;;  %v2138_v45 = vcombine.high %v9100_v11, %v9099_v12  ;;  %v7171_v42 = vrot.slane %v2457_v28, %v6288_v13  ;;  %v2136_v11 = vrot.slane %v2122_v14, %v6282_v61  ;;  %v9109_v28 = vld [vmem:[#allocation59_spill] sm:$0xff] }
 0x1e8   :  { %9101 = vst [vmem:[#allocation13_spill] sm:$0xff] %v7163_v48  ;;  %v2593_v47 = vcombine.low %v2537_v57, %v2553_v56  ;;  %v2104_v5 = vrot.slane %v2090_v9, %v6282_v61  ;;  %v9105_v60 = vrot.slane %v6765_v26, %v9087_v53  ;;  %v9112_v26 = vld [vmem:[#allocation60_spill] sm:$0xff]  ;;  %v2240_v41 = vrot.slane %v2226_v31, %v6282_v61 }
 0x1e9   :  { %9103 = vst [vmem:[#allocation11_spill] sm:$0xff] %v7171_v42  ;;  %v7174_v32 = vrot.slane %v2561_v24, %v6288_v13  ;;  %v2152_v12 = vrot.slane %v2138_v45, %v6282_v61  ;;  %v2490_v24 = vcombine.high %v7163_v48, %v7171_v42  ;;  %v9115_v42 = vld [vmem:[#allocation61_spill] sm:$0xff]  ;;  %v9116_v48 = vrot.slane %v6770_v19, %v9081_v30 }
 0x1ea   :  { %265 = vbcast.lane.b32.xlu1 %v9102_v55, 264  ;;  %v7182_v27 = vrot.slane %v2593_v47, %v6288_v13  ;;  %v2169_v9 = vcombine.low %v2104_v5, %v2120_v50  ;;  %v9110_v55 = vld [vmem:[#allocation57_spill] sm:$0xff] }
 0x1eb   :  { %9104 = vst [vmem:[#allocation10_spill] sm:$0xff] %v7174_v32  ;;  %337 = vbcast.lane.b32.xlu0 %v9105_v60, 264  ;;  %v2242_v59 = vcombine.high %v9110_v55, %v9109_v28  ;;  %v2201_v45 = vcombine.low %v2136_v11, %v2152_v12  ;;  %v2258_v60 = vcombine.high %v9112_v26, %v9111_v2  ;;  %v9114_v26 = vld [vmem:[#allocation63_spill] sm:$0xff] }
 0x1ec   :  { %9106 = vst [vmem:[#allocation14_spill] sm:$0xff] %v7182_v27  ;;  %v2626_v6 = vcombine.high %v7174_v32, %v7182_v27  ;;  %v2177_v36 = vrot.slane %v2169_v9, %v6288_v13  ;;  %v9113_v28 = vrot.slane %v6770_v19, %v9085_v54  ;;  %v2274_v47 = vcombine.high %v9115_v42, %v9114_v26 }
 0x1ed   :  { %v2209_v55 = vrot.slane %v2201_v45, %v6288_v13  ;;  %v2256_v14 = vrot.slane %v2242_v59, %v6282_v61  ;;  %v2272_v2 = vrot.slane %v2258_v60, %v6282_v61  ;;  %v9117_v9 = vcombine.low %v7015_v29, %v7018_v35 }
 0x1ee   :  { %281 = vbcast.lane.b32.xlu1 %v9113_v28, 264  ;;  %v9118_v54 = vcombine.low %v7029_v40, %v7032_v44  ;;  %v9119_v59 = vcombine.high %v7000_v63, %v7003_v15  ;;  %v9120_v45 = vcombine.high %v7006_v25, %v7009_v22  ;;  %v9121_v42 = vcombine.high %v7015_v29, %v7018_v35 }
 0x1ef   :  { %225 = vbcast.lane.b32.xlu0 %v9116_v48, 264  ;;  %v9122_v48 = vcombine.high %v7029_v40, %v7032_v44  ;;  %v7233_v26 = vpack.i.bf16 %v2626_v6, %v2490_v24  ;;  %v2221_v27 = vcombine.low %v2177_v36, %v2209_v55  ;;  %v2222_v32 = vcombine.high %v2177_v36, %v2209_v55 }
 0x1f0   :  { %v7217_v31 = vpack.i.bf16 %v9118_v54, %v9117_v9  ;;  %v5778_v60 = vpack.i.bf16 %v9120_v45, %v9119_v59  ;;  %v2288_v9 = vrot.slane %v2274_v47, %v6282_v61  ;;  %v2305_v54 = vcombine.low %v2240_v41, %v2256_v14 }
 0x1f1   :  { %v7231_v28 = vpack.i.bf16 %v9122_v48, %v9121_v42  ;;  %v2426_v63 = vcombine.high %v7130_v51, %v7133_v21  ;;  %v2458_v15 = vcombine.high %v7136_v33, %v2417_v46  ;;  %v2562_v25 = vcombine.high %v2505_v58, %v2521_v18 }
 0x1f2   :  { %v2594_v22 = vcombine.high %v2537_v57, %v2553_v56  ;;  %5759 = vrot.lane.b32.xlu1 %v7020_v38, %s6098_s14  ;;  %v2313_v29 = vrot.slane %v2305_v54, %v6288_v13  ;;  %v2337_v35 = vcombine.low %v2272_v2, %v2288_v9  ;;  %v2170_v40 = vcombine.high %v2104_v5, %v2120_v50 }
 0x1f3   :  { %v2202_v44 = vcombine.high %v2136_v11, %v2152_v12  ;;  %v9123_v6 = vrot.slane %v6770_v19, %v9077_v20  ;;  %v2440_v24 = vrot.slane %v2426_v63, %v6288_v13  ;;  %v2472_v21 = vrot.slane %v2458_v15, %v6288_v13 }
 0x1f4   :  { %v2576_v46 = vrot.slane %v2562_v25, %v6288_v13  ;;  %v2608_v56 = vrot.slane %v2594_v22, %v6288_v13  ;;  %v2345_v57 = vrot.slane %v2337_v35, %v6288_v13  ;;  %v2184_v58 = vrot.slane %v2170_v40, %v6288_v13  ;;  %v9132_v25 = vld [vmem:[#allocation39_spill] sm:$0xff]  ;;  %v9134_v22 = vld [vmem:[#allocation40_spill] sm:$0xff] }
 0x1f5   :  { %233 = vbcast.lane.b32.xlu0 %v9123_v6, 264  ;;  %v2216_v33 = vrot.slane %v2202_v44, %v6288_v13  ;;  %v2306_v38 = vcombine.high %v2240_v41, %v2256_v14  ;;  %v2491_v51 = vcombine.low %v2440_v24, %v2472_v21  ;;  %v2338_v5 = vcombine.high %v2272_v2, %v2288_v9  ;;  %v9136_v6 = vld [vmem:[#allocation42_spill] sm:$0xff] }
 0x1f6   :  { %v2627_v18 = vcombine.low %v2576_v46, %v2608_v56  ;;  %v2492_v20 = vcombine.high %v2440_v24, %v2472_v21  ;;  %5769 = vrot.lane.b32.xlu1 %v7040_v10, %s6099_s15  ;;  %v2357_v50 = vcombine.low %v2313_v29, %v2345_v57  ;;  %v2358_v11 = vcombine.high %v2313_v29, %v2345_v57  ;;  %v9137_v21 = vld [vmem:[#allocation43_spill] sm:$0xff]  ;;  %v9138_v57 = vld [vmem:[#allocation44_spill] sm:$0xff] }
 0x1f7   :  { %v2223_v12 = vcombine.low %v2184_v58, %v2216_v33  ;;  %v2320_v47 = vrot.slane %v2306_v38, %v6288_v13  ;;  %v9124_v36 = vrot.slane %v6770_v19, %v9086_v43  ;;  %v2352_v14 = vrot.slane %v2338_v5, %v6288_v13  ;;  %v9140_v38 = vld [vmem:[#allocation46_spill] sm:$0xff] }
 0x1f8   :  { %v7258_v55 = vpack.i.bf16 %v2627_v18, %v2491_v51  ;;  %v2628_v41 = vcombine.high %v2576_v46, %v2608_v56  ;;  %v2224_v59 = vcombine.high %v2184_v58, %v2216_v33  ;;  %v7261_v2 = vpack.i.bf16 %v2357_v50, %v2221_v27 }
 0x1f9   :  { %257 = vbcast.lane.b32.xlu0 %v9124_v36, 264  ;;  %v7263_v45 = vpack.i.bf16 %v2358_v11, %v2222_v32  ;;  %v2362_v10 = vcombine.high %v7038_v3, %v7054_v4  ;;  %v2378_v42 = vcombine.high %v7050_v37, %v7058_v49  ;;  %v2359_v48 = vcombine.low %v2320_v47, %v2352_v14  ;;  %v9142_v11 = vld [vmem:[#allocation22_spill] sm:$0xff]  ;;  %v9143_v36 = vld [vmem:[#allocation23_spill] sm:$0xff] }
 0x1fa   :  { %9125 = vst [vmem:[#allocation31_spill] sm:$0xff] %v7258_v55  ;;  %v7269_v9 = vpack.i.bf16 %v2628_v41, %v2492_v20  ;;  %v2360_v43 = vcombine.high %v2320_v47, %v2352_v14  ;;  %v2394_v54 = vcombine.high %v7062_v39, %v7070_v1  ;;  %5779 = vrot.lane.b32.xlu1 %v5778_v60, %s6100_s16  ;;  %v9141_v20 = vld [vmem:[#allocation21_spill] sm:$0xff]  ;;  %v9144_v41 = vld [vmem:[#allocation24_spill] sm:$0xff] }
 0x1fb   :  { %9126 = vst [vmem:[#allocation33_spill] sm:$0xff] %v7263_v45  ;;  %v7275_v27 = vrot.slane %v2362_v10, %v6282_v61  ;;  %v7278_v32 = vrot.slane %v2378_v42, %v6282_v61  ;;  %v2410_v3 = vcombine.high %v7066_v62, %v7074_v8  ;;  %v2498_v37 = vcombine.high %v7078_v23, %v7090_v7  ;;  %v9131_v7 = vld [vmem:[#allocation9_spill] sm:$0xff] }
 0x1fc   :  { %9127 = vst [vmem:[#allocation35_spill] sm:$0xff] %v7269_v9  ;;  %v9128_v4 = vrot.slane %v6770_v19, %v9087_v53  ;;  %v7287_v49 = vpack.i.bf16 %v2359_v48, %v2223_v12  ;;  %v7289_v39 = vpack.i.bf16 %v2360_v43, %v2224_v59  ;;  %v7292_v1 = vrot.slane %v2394_v54, %v6282_v61  ;;  %v9145_v10 = vld [vmem:[#allocation25_spill] sm:$0xff]  ;;  %v9146_v43 = vld [vmem:[#allocation26_spill] sm:$0xff] }
 0x1fd   :  { %v2514_v60 = vcombine.high %v7086_v52, %v7094_v17  ;;  %v7297_v63 = vrot.slane %v2410_v3, %v6282_v61  ;;  %v2441_v62 = vcombine.low %v7275_v27, %v7278_v32  ;;  %v7302_v8 = vrot.slane %v2498_v37, %v6282_v61  ;;  %v9133_v52 = vld [vmem:[#allocation15_spill] sm:$0xff] }
 0x1fe   :  { %273 = vbcast.lane.b32.xlu0 %v9128_v4, 264  ;;  %9129 = vst [vmem:[#allocation17_spill] sm:$0xff] %v7287_v49  ;;  %9130 = vst [vmem:[#allocation36_spill] sm:$0xff] %v7289_v39  ;;  %v2530_v53 = vcombine.high %v7098_v16, %v7106_v0  ;;  %v2546_v15 = vcombine.high %v9131_v7, %v7113_v34  ;;  %v7313_v17 = vmul.f32 %v9133_v52, %v9132_v25  ;;  %v9135_v34 = vld [vmem:[#allocation41_spill] sm:$0xff]  ;;  %v9147_v3 = vld [vmem:[#allocation27_spill] sm:$0xff] }
 0x1ff   :  { %v7307_v23 = vrot.slane %v2514_v60, %v6282_v61  ;;  %v7317_v29 = vmul.f32 %v9133_v52, %v9134_v22  ;;  %5789 = vrot.lane.b32.xlu1 %v7233_v26, %s6095_s12  ;;  %v2449_v35 = vrot.slane %v2441_v62, %v6288_v13  ;;  %v2473_v0 = vcombine.low %v7292_v1, %v7297_v63  ;;  %v9148_v4 = vld [vmem:[#allocation28_spill] sm:$0xff] }
 0x200   :  { %v7325_v16 = vrot.slane %v2530_v53, %v6282_v61  ;;  %v7329_v40 = vmul.f32 %v9133_v52, %v9135_v34  ;;  %v2560_v44 = vrot.slane %v2546_v15, %v6282_v61  ;;  %v7338_v24 = vmul.f32 %v9133_v52, %v9136_v6 }
 0x201   :  { %v2577_v26 = vcombine.low %v7302_v8, %v7307_v23  ;;  %v7342_v46 = vmul.f32 %v9133_v52, %v9137_v21  ;;  %v2481_v56 = vrot.slane %v2473_v0, %v6288_v13  ;;  %v7347_v58 = vmul.f32 %v9133_v52, %v9138_v57 }
 0x202   :  { %5764 = vrot.lane.b32.xlu0 %v7217_v31, %s6094_s30  ;;  %v9139_v31 = vld [vmem:[#allocation45_spill] sm:$0xff]  ;;  %v7355_v51 = vmul.f32 %v9133_v52, %v9140_v38  ;;  %v2609_v5 = vcombine.low %v7325_v16, %v2560_v44  ;;  %v7361_v50 = vmul.f32 %v9133_v52, %v9141_v20  ;;  %v7365_v12 = vmul.f32 %v9133_v52, %v9142_v11 }
 0x203   :  { %v7351_v33 = vmul.f32 %v9133_v52, %v9139_v31  ;;  %v2585_v18 = vrot.slane %v2577_v26, %v6288_v13  ;;  %v2493_v47 = vcombine.low %v2449_v35, %v2481_v56  ;;  %v7369_v14 = vmul.f32 %v9133_v52, %v9143_v36 }
 0x204   :  { %v7373_v59 = vmul.f32 %v9133_v52, %v9144_v41  ;;  %v7377_v42 = vmul.f32 %v9133_v52, %v9145_v10  ;;  %v2617_v48 = vrot.slane %v2609_v5, %v6288_v13  ;;  %v7384_v54 = vmul.f32 %v9133_v52, %v9146_v43 }
 0x205   :  { %v7388_v37 = vmul.f32 %v9133_v52, %v9147_v3  ;;  %v7392_v60 = vmul.f32 %v9133_v52, %v9148_v4  ;;  %v2633_v62 = vcombine.low %v7313_v17, %v7329_v40  ;;  %v2665_v53 = vcombine.low %v7342_v46, %v7351_v33 }
 0x206   :  { %5774 = vrot.lane.b32.xlu0 %v7231_v28, %s6097_s2  ;;  %v2649_v28 = vcombine.low %v7317_v29, %v7338_v24  ;;  %v2681_v7 = vcombine.low %v7347_v58, %v7355_v51  ;;  %v2629_v15 = vcombine.low %v2585_v18, %v2617_v48  ;;  %v2769_v0 = vcombine.low %v7361_v50, %v7369_v14 }
 0x207   :  { %v2785_v52 = vcombine.low %v7365_v12, %v7373_v59  ;;  %v2801_v26 = vcombine.low %v7377_v42, %v7388_v37  ;;  %v7409_v5 = vrot.slane %v2633_v62, %v6282_v61  ;;  %v7415_v9 = vrot.slane %v2665_v53, %v6282_v61 }
 0x208   :  { %v7412_v39 = vrot.slane %v2649_v28, %v6282_v61  ;;  %v7418_v49 = vrot.slane %v2681_v7, %v6282_v61  ;;  %v7422_v55 = vpack.i.bf16 %v2629_v15, %v2493_v47  ;;  %v7425_v45 = vrot.slane %v2769_v0, %v6282_v61 }
 0x209   :  { %9149 = vst [vmem:[#allocation55_spill] sm:$0xff] %v7409_v5  ;;  %9151 = vst [vmem:[#allocation58_spill] sm:$0xff] %v7415_v9  ;;  %v7428_v62 = vrot.slane %v2785_v52, %v6282_v61  ;;  %v7431_v28 = vrot.slane %v2801_v26, %v6282_v61  ;;  %v2494_v47 = vcombine.high %v2449_v35, %v2481_v56 }
 0x20a   :  { %9150 = vst [vmem:[#allocation34_spill] sm:$0xff] %v7412_v39  ;;  %9152 = vst [vmem:[#allocation56_spill] sm:$0xff] %v7418_v49  ;;  %5784 = vrot.lane.b32.xlu0 %v7261_v2, %s6096_s13  ;;  %v2697_v53 = vcombine.low %v7409_v5, %v7412_v39  ;;  %v2729_v7 = vcombine.low %v7415_v9, %v7418_v49  ;;  %v2817_v2 = vcombine.low %v7384_v54, %v7392_v60 }
 0x20b   :  { %9153 = vst [vmem:[#allocation59_spill] sm:$0xff] %v7422_v55  ;;  %9154 = vst [vmem:[#allocation57_spill] sm:$0xff] %v7425_v45  ;;  %v2833_v15 = vcombine.low %v7425_v45, %v7428_v62  ;;  %v2630_v0 = vcombine.high %v2585_v18, %v2617_v48  ;;  %v2442_v18 = vcombine.high %v7275_v27, %v7278_v32 }
 0x20c   :  { %9155 = vst [vmem:[#allocation62_spill] sm:$0xff] %v7428_v62  ;;  %9156 = vst [vmem:[#allocation60_spill] sm:$0xff] %v7431_v28  ;;  %v7442_v52 = vrot.slane %v2697_v53, %v6288_v13  ;;  %v7445_v26 = vrot.slane %v2729_v7, %v6288_v13  ;;  %v7448_v55 = vrot.slane %v2817_v2, %v6282_v61 }
 0x20d   :  { %v7450_v5 = vpack.i.bf16 %v2630_v0, %v2494_v47  ;;  %v7453_v9 = vrot.slane %v2833_v15, %v6288_v13  ;;  %v2474_v48 = vcombine.high %v7292_v1, %v7297_v63  ;;  %v2578_v7 = vcombine.high %v7302_v8, %v7307_v23 }
 0x20e   :  { %9157 = vst [vmem:[#allocation63_spill] sm:$0xff] %v7442_v52  ;;  %9158 = vst [vmem:[#allocation61_spill] sm:$0xff] %v7445_v26  ;;  %v2865_v35 = vcombine.low %v7431_v28, %v7448_v55  ;;  %v2610_v2 = vcombine.high %v7325_v16, %v2560_v44  ;;  %v2456_v47 = vrot.slane %v2442_v18, %v6288_v13 }
 0x20f   :  { %9159 = vst [vmem:[#allocation9_spill] sm:$0xff] %v7448_v55  ;;  %9160 = vst [vmem:[#allocation15_spill] sm:$0xff] %v7450_v5  ;;  %v2488_v15 = vrot.slane %v2474_v48, %v6288_v13  ;;  %v2592_v27 = vrot.slane %v2578_v7, %v6288_v13  ;;  %v5665_v63 = vpop.permute.xlu0 %5664 }
 0x210   :  { %9161 = vst [vmem:[#allocation21_spill] sm:$0xff] %v7453_v9  ;;  %v7464_v53 = vrot.slane %v2865_v35, %v6288_v13  ;;  %v2624_v32 = vrot.slane %v2610_v2, %v6288_v13  ;;  %v5670_v1 = vpop.permute.xlu1 %5669  ;;  %v5667_v16 = vunpack.i.h.bf16 %v5665_v63  ;;  %v5666_v44 = vunpack.i.l.bf16 %v5665_v63  ;;  %v9165_v2 = vld [vmem:[#allocation29_spill] sm:$0xff] }
 0x211   :  { %v2495_v35 = vcombine.low %v2456_v47, %v2488_v15  ;;  %v2496_v56 = vcombine.high %v2456_v47, %v2488_v15  ;;  %v5672_v0 = vunpack.i.h.bf16 %v5670_v1  ;;  %v5671_v9 = vunpack.i.l.bf16 %v5670_v1  ;;  %v9168_v15 = vld [vmem:[#allocation47_spill] sm:$0xff] }
 0x212   :  { %9162 = vst [vmem:[#allocation22_spill] sm:$0xff] %v7464_v53  ;;  %v2631_v5 = vcombine.low %v2592_v27, %v2624_v32  ;;  %v2632_v52 = vcombine.high %v2592_v27, %v2624_v32  ;;  %v9166_v53 = vld [vmem:[#allocation30_spill] sm:$0xff]  ;;  %v9169_v27 = vld [vmem:[#allocation48_spill] sm:$0xff] }
 0x213   :  { %v5675_v18 = vpop.permute.xlu0 %5674  ;;  %v9167_v26 = vcombine.low %v9165_v2, %v9166_v53  ;;  %v9170_v32 = vcombine.low %v9168_v15, %v9169_v27 }
 0x214   :  { %v5680_v8 = vpop.permute.xlu1 %5679  ;;  %v7475_v23 = vpack.i.bf16 %v2631_v5, %v2495_v35  ;;  %v7477_v48 = vpack.i.bf16 %v2632_v52, %v2496_v56  ;;  %v5677_v35 = vunpack.i.h.bf16 %v5675_v18  ;;  %v5676_v63 = vunpack.i.l.bf16 %v5675_v18 }
 0x215   :  { %v3899_v47 = vsel %vm3897_vm3, %v9167_v26, %v5667_v16  ;;  %v3898_v5 = vsel %vm3897_vm3, %v9170_v32, %v5666_v44  ;;  %v5681_v52 = vunpack.i.l.bf16 %v5680_v8 }
 0x216   :  { %9163 = vst [vmem:[#allocation23_spill] sm:$0xff] %v7475_v23  ;;  %9164 = vst [vmem:[#allocation24_spill] sm:$0xff] %v7477_v48  ;;  %v5682_v23 = vunpack.i.h.bf16 %v5680_v8  ;;  %v3914_v56 = vsel %vm623_vm4, %v3898_v5, %v5671_v9  ;;  %v3915_v1 = vsel %vm623_vm4, %v3899_v47, %v5672_v0 }
 0x217   :  { %v3931_v28 = vsel %vm3930_vm5, %v3914_v56, %v5676_v63  ;;  %v3932_v53 = vsel %vm3930_vm5, %v3915_v1, %v5677_v35  ;;  %v9171_v63 = vld [vmem:[#allocation32_spill] sm:$0xff] }
 0x218   :  { %v5690_v7 = vpop.permute.xlu1 %5689  ;;  %v3947_v44 = vsel %vm47_vm0, %v3931_v28, %v5681_v52  ;;  %v3948_v18 = vsel %vm47_vm0, %v3932_v53, %v5682_v23 }
 0x219   :  { %v5692_v26 = vunpack.i.h.bf16 %v5690_v7  ;;  %v5691_v16 = vunpack.i.l.bf16 %v5690_v7 }
 0x21b   :  { %v3964_v9 = vsel %vm3963_vm6, %v3947_v44, %v5691_v16  ;;  %v3965_v0 = vsel %vm3963_vm6, %v3948_v18, %v5692_v26 }
 0x21c   :  { %v5700_v48 = vpop.permute.xlu1 %5699  ;;  %v5685_v47 = vpop.permute.xlu0 %5684 }
 0x21d   :  { %v5702_v2 = vunpack.i.h.bf16 %v5700_v48  ;;  %v5701_v15 = vunpack.i.l.bf16 %v5700_v48  ;;  %v5687_v16 = vunpack.i.h.bf16 %v5685_v47 }
 0x21f   :  { %v3981_v5 = vsel %vm3980_vm7, %v3964_v9, %v5701_v15  ;;  %v3982_v7 = vsel %vm3980_vm7, %v3965_v0, %v5702_v2  ;;  %v5686_v2 = vunpack.i.l.bf16 %v5685_v47 }
 0x220   :  { %v5710_v8 = vpop.permute.xlu1 %5709  ;;  %v5695_v23 = vpop.permute.xlu0 %5694 }
 0x221   :  { %v5712_v27 = vunpack.i.h.bf16 %v5710_v8  ;;  %v5711_v32 = vunpack.i.l.bf16 %v5710_v8  ;;  %v5697_v15 = vunpack.i.h.bf16 %v5695_v23  ;;  %v5696_v44 = vunpack.i.l.bf16 %v5695_v23 }
 0x223   :  { %v3998_v48 = vsel %vm3997_vm8, %v3981_v5, %v5711_v32  ;;  %v3999_v35 = vsel %vm3997_vm8, %v3982_v7, %v5712_v27  ;;  %v9172_v32 = vld [vmem:[#allocation37_spill] sm:$0xff]  ;;  %v9173_v5 = vld [vmem:[#allocation38_spill] sm:$0xff] }
 0x224   :  { %v5571_v28 = vpack.c.bf16 %v3999_v35, %v3998_v48  ;;  %v5705_v52 = vpop.permute.xlu0 %5704  ;;  %v9174_v7 = vcombine.low %v9172_v32, %v9173_v5  ;;  %v9175_v35 = vld [vmem:[#allocation49_spill] sm:$0xff] }
 0x225   :  { %v5706_v8 = vunpack.i.l.bf16 %v5705_v52 }
 0x226   :  { %5572 = vmatprep.subr.bf16.mxu0 %v5571_v28  ;;  %v3901_v48 = vsel %vm3897_vm3, %v9174_v7, %v5687_v16 }
 0x227   :  { %5574 = vmatpush3.bf16.msra.mxu0 %v5571_v28  ;;  %v9176_v28 = vld [vmem:[#allocation50_spill] sm:$0xff]  ;;  %v3917_v62 = vsel %vm623_vm4, %v3901_v48, %v5697_v15 }
 0x228   :  { %347 = vxpose.xlu0.b32.start [1/2] (short) (narrow) %v6770_v19, 8  ;;  %v5707_v19 = vunpack.i.h.bf16 %v5705_v52 }
 0x22a   :  { %v7501_v56 = vpop.permute.xlu1 %5719  ;;  %v3934_v39 = vsel %vm3930_vm5, %v3917_v62, %v5707_v19 }
 0x22c   :  { %348 = vxpose.xlu0.b32.end [2/2] (short) (narrow) %v9171_v63, 8  ;;  %v9177_v63 = vcombine.low %v9175_v35, %v9176_v28  ;;  %v9178_v35 = vld [vmem:[#allocation16_spill] sm:$0xff] }
 0x22d   :  { %v7543_v28 = vmul.f32 %v9178_v35, %v9132_v25 }
 0x22e   :  { %v3900_v55 = vsel %vm3897_vm3, %v9177_v63, %v5686_v2  ;;  %v7547_v63 = vmul.f32 %v9178_v35, %v9134_v22 }
 0x22f   :  { %v3916_v23 = vsel %vm623_vm4, %v3900_v55, %v5696_v44  ;;  %9179 = vst [vmem:[#allocation25_spill] sm:$0xff] %v7543_v28 }
 0x230   :  { %9180 = vst [vmem:[#allocation26_spill] sm:$0xff] %v7547_v63 }
 0x231   :  { %v7503_v53 = vpop.permute.xlu1 %5729 }
 0x233   :  { %v5715_v1 = vpop.permute.xlu0 %5714 }
 0x234   :  { %v5717_v9 = vunpack.i.h.bf16 %v5715_v1  ;;  %v5716_v0 = vunpack.i.l.bf16 %v5715_v1  ;;  %v3933_v1 = vsel %vm3930_vm5, %v3916_v23, %v5706_v8  ;;  %v7555_v23 = vmul.f32 %v9178_v35, %v9136_v6 }
 0x235   :  { %v7505_v18 = vpop.permute.xlu1 %5739 }
 0x236   :  { %v3949_v32 = vsel %vm47_vm0, %v3933_v1, %v5716_v0  ;;  %v3950_v16 = vsel %vm47_vm0, %v3934_v39, %v5717_v9  ;;  %9182 = vst [vmem:[#allocation28_spill] sm:$0xff] %v7555_v23  ;;  %v7563_v1 = vmul.f32 %v9178_v35, %v9138_v57 }
 0x237   :  { %v5725_v26 = vpop.permute.xlu0 %5724 }
 0x238   :  { %v5727_v47 = vunpack.i.h.bf16 %v5725_v26  ;;  %v5726_v45 = vunpack.i.l.bf16 %v5725_v26  ;;  %9184 = vst [vmem:[#allocation30_spill] sm:$0xff] %v7563_v1 }
 0x23a   :  { %v3966_v2 = vsel %vm3963_vm6, %v3949_v32, %v5726_v45  ;;  %v3967_v26 = vsel %vm3963_vm6, %v3950_v16, %v5727_v47  ;;  %v7551_v47 = vmul.f32 %v9178_v35, %v9135_v34  ;;  %v7567_v32 = vmul.f32 %v9178_v35, %v9139_v31 }
 0x23b   :  { %v5735_v27 = vpop.permute.xlu0 %5734  ;;  %v7571_v16 = vmul.f32 %v9178_v35, %v9140_v38  ;;  %v3193_v31 = vcombine.low %v7547_v63, %v7555_v23  ;;  %v5721_v23 = vunpack.i.l.bf16 %v7501_v56 }
 0x23c   :  { %v5737_v52 = vunpack.i.h.bf16 %v5735_v27  ;;  %v5736_v49 = vunpack.i.l.bf16 %v5735_v27  ;;  %9181 = vst [vmem:[#allocation27_spill] sm:$0xff] %v7551_v47  ;;  %9185 = vst [vmem:[#allocation47_spill] sm:$0xff] %v7567_v32  ;;  %v3177_v38 = vcombine.low %v7543_v28, %v7551_v47 }
 0x23d   :  { %9186 = vst [vmem:[#allocation48_spill] sm:$0xff] %v7571_v16  ;;  %v7629_v63 = vrot.slane %v3193_v31, %v6282_v61 }
 0x23e   :  { %v3983_v15 = vsel %vm3980_vm7, %v3966_v2, %v5736_v49  ;;  %v3984_v27 = vsel %vm3980_vm7, %v3967_v26, %v5737_v52  ;;  %v7559_v52 = vmul.f32 %v9178_v35, %v9137_v21  ;;  %v7581_v26 = vmul.f32 %v9178_v35, %v9142_v11 }
 0x23f   :  { %v7521_v5 = vpop.permute.xlu1 %5749  ;;  %v3225_v21 = vcombine.low %v7563_v1, %v7571_v16  ;;  %v7626_v28 = vrot.slane %v3177_v38, %v6282_v61  ;;  %9196 = vst [vmem:[#allocation68_spill] sm:$0xff] %v7629_v63 }
 0x240   :  { %v5745_v7 = vpop.permute.xlu0 %5744  ;;  %9183 = vst [vmem:[#allocation29_spill] sm:$0xff] %v7559_v52  ;;  %9188 = vst [vmem:[#allocation37_spill] sm:$0xff] %v7581_v26  ;;  %v3209_v57 = vcombine.low %v7559_v52, %v7567_v32 }
 0x241   :  { %v5747_v55 = vunpack.i.h.bf16 %v5745_v7  ;;  %v5746_v44 = vunpack.i.l.bf16 %v5745_v7  ;;  %v7575_v7 = vmul.f32 %v9178_v35, %v9141_v20  ;;  %9195 = vst [vmem:[#allocation67_spill] sm:$0xff] %v7626_v28  ;;  %v7635_v1 = vrot.slane %v3225_v21, %v6282_v61 }
 0x242   :  { %v7632_v52 = vrot.slane %v3209_v57, %v6282_v61  ;;  %v3241_v38 = vcombine.low %v7626_v28, %v7629_v63 }
 0x243   :  { %v4000_v8 = vsel %vm3997_vm8, %v3983_v15, %v5746_v44  ;;  %v4001_v62 = vsel %vm3997_vm8, %v3984_v27, %v5747_v55  ;;  %9187 = vst [vmem:[#allocation32_spill] sm:$0xff] %v7575_v7  ;;  %v7585_v55 = vmul.f32 %v9178_v35, %v9143_v36  ;;  %v7589_v44 = vmul.f32 %v9178_v35, %v9144_v41 }
 0x244   :  { %v7529_v19 = vpop.permute.xlu1 %297  ;;  %v5575_v39 = vpack.c.bf16 %v4001_v62, %v4000_v8  ;;  %v7593_v15 = vmul.f32 %v9178_v35, %v9145_v10  ;;  %v7599_v8 = vmul.f32 %v9178_v35, %v9146_v43  ;;  %v7603_v62 = vmul.f32 %v9178_v35, %v9147_v3  ;;  %9197 = vst [vmem:[#allocation69_spill] sm:$0xff] %v7632_v52 }
 0x245   :  { %9189 = vst [vmem:[#allocation38_spill] sm:$0xff] %v7585_v55  ;;  %9190 = vst [vmem:[#allocation49_spill] sm:$0xff] %v7589_v44  ;;  %v3313_v6 = vcombine.low %v7575_v7, %v7585_v55  ;;  %v3329_v34 = vcombine.low %v7581_v26, %v7589_v44  ;;  %v3273_v31 = vcombine.low %v7632_v52, %v7635_v1 }
 0x246   :  { %5576 = vmatprep.subr.bf16.mxu0 %v5575_v39  ;;  %9191 = vst [vmem:[#allocation50_spill] sm:$0xff] %v7593_v15  ;;  %9192 = vst [vmem:[#allocation16_spill] sm:$0xff] %v7599_v8 }
 0x247   :  { %5578 = vmatpush3.bf16.msra.mxu0 %v5575_v39  ;;  %9193 = vst [vmem:[#allocation65_spill] sm:$0xff] %v7603_v62  ;;  %v7607_v39 = vmul.f32 %v9178_v35, %v9148_v4  ;;  %v3345_v35 = vcombine.low %v7593_v15, %v7603_v62  ;;  %9198 = vst [vmem:[#allocation70_spill] sm:$0xff] %v7635_v1  ;;  %v7640_v26 = vrot.slane %v3313_v6, %v6282_v61 }
 0x248   :  { %v7531_v9 = vpop.permute.xlu1 %313  ;;  %v7643_v15 = vrot.slane %v3329_v34, %v6282_v61  ;;  %v7659_v34 = vrot.slane %v3241_v38, %v6288_v13  ;;  %v7662_v44 = vrot.slane %v3273_v31, %v6288_v13  ;;  %v5752_v1 = vunpack.i.h.bf16 %v7521_v5 }
 0x249   :  { %9194 = vst [vmem:[#allocation66_spill] sm:$0xff] %v7607_v39  ;;  %9199 = vst [vmem:[#allocation71_spill] sm:$0xff] %v7640_v26  ;;  %v7650_v57 = vrot.slane %v3345_v35, %v6282_v61  ;;  %v3361_v21 = vcombine.low %v7599_v8, %v7607_v39  ;;  %v9205_v35 = vld [vmem:[#allocation18_spill] sm:$0xff] }
 0x24a   :  { %9200 = vst [vmem:[#allocation72_spill] sm:$0xff] %v7643_v15  ;;  %v3377_v62 = vcombine.low %v7640_v26, %v7643_v15  ;;  %9202 = vst [vmem:[#allocation74_spill] sm:$0xff] %v7659_v34  ;;  %v7671_v32 = vmul.f32 %v9205_v35, %v9141_v20  ;;  %v7682_v31 = vmul.f32 %v9205_v35, %v9142_v11  ;;  %v5741_v26 = vunpack.i.l.bf16 %v7505_v18 }
 0x24b   :  { %9201 = vst [vmem:[#allocation73_spill] sm:$0xff] %v7650_v57  ;;  %9203 = vst [vmem:[#allocation75_spill] sm:$0xff] %v7662_v44  ;;  %v7665_v55 = vrot.slane %v3361_v21, %v6282_v61  ;;  %v7686_v21 = vmul.f32 %v9205_v35, %v9143_v36  ;;  %v7690_v20 = vmul.f32 %v9205_v35, %v9144_v41 }
 0x24c   :  { %v7533_v45 = vpop.permute.xlu1 %329  ;;  %9206 = vst [vmem:[#allocation77_spill] sm:$0xff] %v7671_v32  ;;  %v7674_v8 = vrot.slane %v3377_v62, %v6288_v13  ;;  %9208 = vst [vmem:[#allocation79_spill] sm:$0xff] %v7682_v31  ;;  %v7694_v62 = vmul.f32 %v9205_v35, %v9145_v10  ;;  %v7700_v38 = vmul.f32 %v9205_v35, %v9146_v43  ;;  %v5732_v10 = vunpack.i.h.bf16 %v7503_v53 }
 0x24d   :  { %v7535_v0 = vpop.permute.xlu0 %5754  ;;  %9204 = vst [vmem:[#allocation76_spill] sm:$0xff] %v7665_v55  ;;  %v3409_v39 = vcombine.low %v7650_v57, %v7665_v55  ;;  %9209 = vst [vmem:[#allocation80_spill] sm:$0xff] %v7686_v21  ;;  %v7704_v11 = vmul.f32 %v9205_v35, %v9147_v3  ;;  %v7708_v36 = vmul.f32 %v9205_v35, %v9148_v4 }
 0x24e   :  { %9207 = vst [vmem:[#allocation78_spill] sm:$0xff] %v7674_v8  ;;  %9210 = vst [vmem:[#allocation81_spill] sm:$0xff] %v7690_v20  ;;  %v3041_v43 = vcombine.low %v7671_v32, %v7686_v21  ;;  %v3057_v44 = vcombine.low %v7682_v31, %v7690_v20  ;;  %v5731_v8 = vunpack.i.l.bf16 %v7503_v53 }
 0x24f   :  { %9211 = vst [vmem:[#allocation82_spill] sm:$0xff] %v7694_v62  ;;  %9212 = vst [vmem:[#allocation83_spill] sm:$0xff] %v7700_v38  ;;  %v7711_v41 = vrot.slane %v3409_v39, %v6288_v13  ;;  %v3073_v55 = vcombine.low %v7694_v62, %v7704_v11  ;;  %v3089_v4 = vcombine.low %v7700_v38, %v7708_v36  ;;  %v5722_v39 = vunpack.i.h.bf16 %v7501_v56  ;;  %v9220_v38 = vld [vmem:[#allocation53_spill] sm:$0xff]  ;;  %v9223_v62 = vld [vmem:[#allocation51_spill] sm:$0xff] }
 0x250   :  { %v7537_v48 = vpop.permute.xlu1 %345  ;;  %9213 = vst [vmem:[#allocation84_spill] sm:$0xff] %v7704_v11  ;;  %9214 = vst [vmem:[#allocation85_spill] sm:$0xff] %v7708_v36  ;;  %v7734_v15 = vrot.slane %v3041_v43, %v6282_v61  ;;  %v7737_v52 = vrot.slane %v3057_v44, %v6282_v61  ;;  %v5751_v56 = vunpack.i.l.bf16 %v7521_v5  ;;  %v9221_v36 = vld [vmem:[#allocation54_spill] sm:$0xff]  ;;  %v9224_v11 = vld [vmem:[#allocation52_spill] sm:$0xff] }
 0x251   :  { %v7539_v49 = vpop.permute.xlu0 %289  ;;  %9215 = vst [vmem:[#allocation86_spill] sm:$0xff] %v7711_v41  ;;  %v5742_v41 = vunpack.i.h.bf16 %v7505_v18  ;;  %v7742_v63 = vrot.slane %v3073_v55, %v6282_v61  ;;  %v7745_v53 = vrot.slane %v3089_v4, %v6282_v61  ;;  %v9222_v18 = vcombine.low %v9220_v38, %v9221_v36 }
 0x252   :  { %9216 = vst [vmem:[#allocation87_spill] sm:$0xff] %v7734_v15  ;;  %9217 = vst [vmem:[#allocation88_spill] sm:$0xff] %v7737_v52  ;;  %v9225_v44 = vcombine.low %v9223_v62, %v9224_v11 }
 0x253   :  { %9218 = vst [vmem:[#allocation89_spill] sm:$0xff] %v7742_v63  ;;  %9219 = vst [vmem:[#allocation90_spill] sm:$0xff] %v7745_v53  ;;  %v3903_v43 = vsel %vm3897_vm3, %v9222_v18, %v5722_v39 }
 0x254   :  { %v7577_v2 = vpop.permute.xlu1 %241  ;;  %v3902_v31 = vsel %vm3897_vm3, %v9225_v44, %v5721_v23  ;;  %v3919_v21 = vsel %vm623_vm4, %v3903_v43, %v5732_v10  ;;  %v3105_v23 = vcombine.low %v7734_v15, %v7737_v52 }
 0x255   :  { %v7595_v27 = vpop.permute.xlu0 %305  ;;  %v3918_v55 = vsel %vm623_vm4, %v3902_v31, %v5731_v8  ;;  %v3936_v38 = vsel %vm3930_vm5, %v3919_v21, %v5742_v41  ;;  %v5756_v41 = vunpack.i.l.bf16 %v7535_v0 }
 0x256   :  { %v3935_v35 = vsel %vm3930_vm5, %v3918_v55, %v5741_v26  ;;  %v3952_v62 = vsel %vm47_vm0, %v3936_v38, %v5752_v1  ;;  %v5757_v1 = vunpack.i.h.bf16 %v7535_v0  ;;  %v9228_v55 = vld [vmem:[#allocation8_spill] sm:$0xff] }
 0x257   :  { %v3951_v36 = vsel %vm47_vm0, %v3935_v35, %v5751_v56 }
 0x258   :  { %v7623_v22 = vpop.permute.xlu1 %249 }
 0x259   :  { %v7637_v7 = vpop.permute.xlu0 %321 }
 0x25c   :  { %v7656_v6 = vpop.permute.xlu1 %265 }
 0x25d   :  { %v7667_v16 = vpop.permute.xlu0 %337 }
 0x260   :  { %v7696_v57 = vpop.permute.xlu1 %281 }
 0x261   :  { %v7713_v34 = vpop.permute.xlu0 %225 }
 0x264   :  { %v5760_v3 = vpop.permute.xlu1 %5759 }
 0x265   :  { %v5762_v5 = vunpack.i.h.bf16 %v5760_v3  ;;  %v5761_v32 = vunpack.i.l.bf16 %v5760_v3  ;;  %v3137_v3 = vcombine.low %v7742_v63, %v7745_v53 }
 0x267   :  { %v7727_v47 = vpop.permute.xlu0 %233  ;;  %v3969_v8 = vsel %vm3963_vm6, %v3952_v62, %v5762_v5  ;;  %v3968_v31 = vsel %vm3963_vm6, %v3951_v36, %v5761_v32  ;;  %v7778_v32 = vrot.slane %v3105_v23, %v6288_v13  ;;  %v7781_v44 = vrot.slane %v3137_v3, %v6288_v13  ;;  %v9231_v36 = vld [vmem:[#allocation7_spill] sm:$0xff]  ;;  %v9232_v62 = vld [vmem:[#allocation64_spill] sm:$0xff] }
 0x268   :  { %v5770_v28 = vpop.permute.xlu1 %5769 }
 0x269   :  { %v5772_v4 = vunpack.i.h.bf16 %v5770_v28  ;;  %v5771_v61 = vunpack.i.l.bf16 %v5770_v28  ;;  %9226 = vst [vmem:[#allocation53_spill] sm:$0xff] %v7778_v32  ;;  %9227 = vst [vmem:[#allocation54_spill] sm:$0xff] %v7781_v44 }
 0x26b   :  { %v7755_v20 = vpop.permute.xlu0 %257  ;;  %v3985_v21 = vsel %vm3980_vm7, %v3968_v31, %v5771_v61  ;;  %v3986_v35 = vsel %vm3980_vm7, %v3969_v8, %v5772_v4  ;;  %v9229_v4 = vld [vmem:[#allocation12_spill] sm:$0xff] }
 0x26c   :  { %v5780_v11 = vpop.permute.xlu1 %5779  ;;  %v9230_v38 = vcombine.low %v9228_v55, %v9229_v4  ;;  %v9236_v4 = vld [vmem:[#allocation5_spill] sm:$0xff] }
 0x26d   :  { %v5782_v26 = vunpack.i.h.bf16 %v5780_v11  ;;  %v5781_v10 = vunpack.i.l.bf16 %v5780_v11  ;;  %v9233_v11 = vcombine.low %v9231_v36, %v9232_v62 }
 0x26e   :  { %v3905_v0 = vsel %vm3897_vm3, %v9230_v38, %v5757_v1 }
 0x26f   :  { %v4002_v39 = vsel %vm3997_vm8, %v3985_v21, %v5781_v10  ;;  %v4003_v56 = vsel %vm3997_vm8, %v3986_v35, %v5782_v26  ;;  %v3904_v8 = vsel %vm3897_vm3, %v9233_v11, %v5756_v41 }
 0x270   :  { %v7769_v28 = vpop.permute.xlu0 %273  ;;  %v5579_v18 = vpack.c.bf16 %v4003_v56, %v4002_v39 }
 0x272   :  { %5580 = vmatprep.subr.bf16.mxu0 %v5579_v18 }
 0x273   :  { %5582 = vmatpush3.bf16.msra.mxu0 %v5579_v18 }
 0x274   :  { %v5765_v43 = vpop.permute.xlu0 %5764 }
 0x275   :  { %v5767_v5 = vunpack.i.h.bf16 %v5765_v43  ;;  %v5766_v61 = vunpack.i.l.bf16 %v5765_v43 }
 0x277   :  { %v3921_v23 = vsel %vm623_vm4, %v3905_v0, %v5767_v5  ;;  %v3920_v31 = vsel %vm623_vm4, %v3904_v8, %v5766_v61  ;;  %v6101_v5 = vmov 1966171168   ;;  %v40_v0 = vld [vmem:[%s8792_s0 + $0x8] sm:$0xff] }
 0x278   :  { %v5775_v3 = vpop.permute.xlu0 %5774  ;;  %v431_v61 = vunpack.c.l.s4 %v6101_v5  ;;  %v478_v11 = vcombine.high %v40_v0, %v40_v0 }
 0x279   :  { %v5777_v10 = vunpack.i.h.bf16 %v5775_v3  ;;  %v5776_v21 = vunpack.i.l.bf16 %v5775_v3 }
 0x27a   :  { %v432_v55 = vunpack.c.0.s8 %v431_v61 }
 0x27b   :  { %v3937_v35 = vsel %vm3930_vm5, %v3920_v31, %v5776_v21  ;;  %v3938_v1 = vsel %vm3930_vm5, %v3921_v23, %v5777_v10 }
 0x27c   :  { %v5785_v39 = vpop.permute.xlu0 %5784  ;;  %v7804_v38 = vsub.s32 %v432_v55, %v9236_v4 }
 0x27d   :  { %v5787_v56 = vunpack.i.h.bf16 %v5785_v39  ;;  %v5786_v43 = vunpack.i.l.bf16 %v5785_v39 }
 0x27e   :  { %v485_v36 = vrot.slane %v40_v0, %v7804_v38  ;;  %v492_v31 = vrot.slane %v478_v11, %v7804_v38 }
 0x27f   :  { %v7798_v41 = vsel %vm47_vm0, %v3937_v35, %v5786_v43  ;;  %v7801_v18 = vsel %vm47_vm0, %v3938_v1, %v5787_v56  ;;  %v39_v43 = vld [vmem:[%s8792_s0] sm:$0xff] }
 0x280   :  { %9234 = vst [vmem:[#allocation51_spill] sm:$0xff] %v7798_v41  ;;  %9235 = vst [vmem:[#allocation52_spill] sm:$0xff] %v7801_v18  ;;  %v493_v62 = vcombine.high %v485_v36, %v485_v36  ;;  %v501_v8 = vrot.slane %v485_v36, %v7804_v38  ;;  %v508_v21 = vrot.slane %v492_v31, %v7804_v38 }
 0x281   :  { %v494_v35 = vcombine.high %v492_v31, %v492_v31 }
 0x282   :  { %v515_v23 = vrot.slane %v493_v62, %v7804_v38  ;;  %v523_v3 = vcombine.high %v501_v8, %v501_v8  ;;  %v562_v1 = vrot.slane %v501_v8, %v9081_v30  ;;  %v578_v55 = vrot.slane %v508_v21, %v9081_v30 }
 0x283   :  { %v522_v4 = vrot.slane %v494_v35, %v7804_v38  ;;  %v524_v0 = vcombine.high %v508_v21, %v508_v21 }
 0x284   :  { %v525_v10 = vcombine.high %v515_v23, %v515_v23  ;;  %v566_v39 = vrot.slane %v515_v23, %v9081_v30  ;;  %v570_v56 = vrot.slane %v523_v3, %v9081_v30  ;;  %v436_v3 = vrot.slane %v39_v43, %v7804_v38 }
 0x285   :  { %v526_v63 = vcombine.high %v522_v4, %v522_v4 }
 0x286   :  { %v574_v61 = vrot.slane %v525_v10, %v9081_v30  ;;  %v429_v10 = vcombine.high %v39_v43, %v39_v43  ;;  %v444_v43 = vcombine.high %v436_v3, %v436_v3 }
 0x288   :  { %v7844_v53 = vrot.slane %v429_v10, %v7804_v38 }
 0x2a8   :  { %v7820_v5 = vpop.trf.xlu0 }
 0x2a9   :  { %v387_v36 = vadd.f32 %v7820_v5, %v7539_v49  ;;  %v388_v62 = vadd.f32 %v7820_v5, %v7529_v19  ;;  %v389_v11 = vadd.f32 %v7820_v5, %v7595_v27  ;;  %v390_v8 = vadd.f32 %v7820_v5, %v7531_v9 }
 0x2aa   :  { %v391_v23 = vadd.f32 %v7820_v5, %v7637_v7  ;;  %v392_v31 = vadd.f32 %v7820_v5, %v7533_v45  ;;  %v393_v19 = vadd.f32 %v7820_v5, %v7667_v16  ;;  %v394_v9 = vadd.f32 %v7820_v5, %v7537_v48 }
 0x2ab   :  { %v403_v21 = vmul.f32 0.2, %v387_v36  ;;  %v404_v49 = vmul.f32 0.2, %v388_v62  ;;  %v405_v35 = vmul.f32 0.2, %v389_v11  ;;  %v582_v45 = vrot.slane %v522_v4, %v9081_v30 }
 0x2ac   :  { %v406_v26 = vmul.f32 0.2, %v390_v8  ;;  %v407_v27 = vmul.f32 0.2, %v391_v23  ;;  %v408_v41 = vmul.f32 0.2, %v392_v31 }
 0x2ad   :  { %v419_v18 = vmax.f32 %v387_v36, %v403_v21  ;;  %v420_v7 = vmax.f32 %v388_v62, %v404_v49  ;;  %v421_v32 = vmax.f32 %v389_v11, %v405_v35  ;;  %v409_v13 = vmul.f32 0.2, %v393_v19 }
 0x2ae   :  { %v422_v44 = vmax.f32 %v390_v8, %v406_v26  ;;  %v423_v52 = vmax.f32 %v391_v23, %v407_v27  ;;  %v424_v36 = vmax.f32 %v392_v31, %v408_v41  ;;  %v410_v62 = vmul.f32 0.2, %v394_v9 }
 0x2af   :  { %v7846_v15 = vadd.f32 %v562_v1, %v419_v18  ;;  %v7848_v16 = vadd.f32 %v566_v39, %v420_v7  ;;  %v7850_v25 = vadd.f32 %v570_v56, %v421_v32  ;;  %v379_v18 = vadd.f32 %v7820_v5, %v7713_v34 }
 0x2b0   :  { %v7852_v48 = vadd.f32 %v574_v61, %v422_v44  ;;  %v380_v1 = vadd.f32 %v7820_v5, %v7727_v47  ;;  %v586_v32 = vrot.slane %v524_v0, %v9081_v30  ;;  %v590_v44 = vrot.slane %v526_v63, %v9081_v30 }
 0x2b1   :  { %v648_v26 = vsel %vm623_vm4, %v7846_v15, -inf  ;;  %v651_v4 = vsel %vm623_vm4, %v7848_v16, -inf  ;;  %v452_v41 = vrot.slane %v436_v3, %v7804_v38  ;;  %v7865_v39 = vadd.f32 %v578_v55, %v423_v52 }
 0x2b2   :  { %649 = vmax.xlane.f32.xlu1 %v648_v26  ;;  %652 = vmax.xlane.f32.xlu0 %v651_v4  ;;  %v425_v56 = vmax.f32 %v393_v19, %v409_v13  ;;  %v466_v61 = vrot.slane %v444_v43, %v7804_v38  ;;  %v445_v11 = vcombine.high %v7844_v53, %v7844_v53  ;;  %v654_v34 = vsel %vm623_vm4, %v7850_v25, -inf }
 0x2b3   :  { %v657_v47 = vsel %vm623_vm4, %v7852_v48, -inf  ;;  %v7874_v8 = vadd.f32 %v582_v45, %v424_v36  ;;  %v426_v0 = vmax.f32 %v394_v9, %v410_v62  ;;  %v395_v63 = vmul.f32 0.2, %v379_v18 }
 0x2b4   :  { %v396_v23 = vmul.f32 0.2, %v380_v1  ;;  %v381_v52 = vadd.f32 %v7820_v5, %v7577_v2  ;;  %v384_v13 = vadd.f32 %v7820_v5, %v7656_v6  ;;  %v530_v55 = vrot.slane %v452_v41, %v9081_v30 }
 0x2b5   :  { %v474_v31 = vcombine.high %v452_v41, %v452_v41  ;;  %v660_v3 = vsel %vm623_vm4, %v7865_v39, -inf  ;;  %v7883_v10 = vadd.f32 %v586_v32, %v425_v56  ;;  %v534_v21 = vrot.slane %v466_v61, %v9081_v30 }
 0x2b6   :  { %655 = vmax.xlane.f32.xlu1 %v654_v34  ;;  %658 = vmax.xlane.f32.xlu0 %v657_v47  ;;  %v473_v49 = vrot.slane %v445_v11, %v7804_v38  ;;  %v663_v2 = vsel %vm623_vm4, %v7874_v8, -inf  ;;  %v7889_v35 = vadd.f32 %v590_v44, %v426_v0  ;;  %v382_v6 = vadd.f32 %v7820_v5, %v7623_v22 }
 0x2b7   :  { %v386_v19 = vadd.f32 %v7820_v5, %v7696_v57  ;;  %v411_v27 = vmax.f32 %v379_v18, %v395_v63  ;;  %v412_v9 = vmax.f32 %v380_v1, %v396_v23  ;;  %v397_v7 = vmul.f32 0.2, %v381_v52 }
 0x2b8   :  { %v400_v45 = vmul.f32 0.2, %v384_v13  ;;  %v538_v43 = vrot.slane %v474_v31, %v9081_v30  ;;  %v666_v36 = vsel %vm623_vm4, %v7883_v10, -inf  ;;  %v550_v62 = vrot.slane %v473_v49, %v9081_v30 }
 0x2b9   :  { %v476_v26 = vcombine.high %v466_v61, %v466_v61  ;;  %v477_v4 = vcombine.high %v473_v49, %v473_v49  ;;  %v669_v22 = vsel %vm623_vm4, %v7889_v35, -inf  ;;  %v398_v32 = vmul.f32 0.2, %v382_v6 }
 0x2ba   :  { %661 = vmax.xlane.f32.xlu1 %v660_v3  ;;  %664 = vmax.xlane.f32.xlu0 %v663_v2  ;;  %v402_v57 = vmul.f32 0.2, %v386_v19  ;;  %v383_v18 = vadd.f32 %v7820_v5, %v7755_v20  ;;  %v7903_v1 = vadd.f32 %v530_v55, %v411_v27  ;;  %v7905_v44 = vadd.f32 %v534_v21, %v412_v9 }
 0x2bb   :  { %v413_v41 = vmax.f32 %v381_v52, %v397_v7  ;;  %v416_v56 = vmax.f32 %v384_v13, %v400_v45  ;;  %v542_v11 = vrot.slane %v476_v26, %v9081_v30  ;;  %v558_v61 = vrot.slane %v477_v4, %v9081_v30 }
 0x2bc   :  { %v459_v34 = vrot.slane %v7844_v53, %v7804_v38  ;;  %v414_v47 = vmax.f32 %v382_v6, %v398_v32  ;;  %v418_v0 = vmax.f32 %v386_v19, %v402_v57  ;;  %v399_v63 = vmul.f32 0.2, %v383_v18 }
 0x2bd   :  { %v385_v20 = vadd.f32 %v7820_v5, %v7769_v28  ;;  %v624_v23 = vsel %vm623_vm4, %v7903_v1, -inf  ;;  %v627_v52 = vsel %vm623_vm4, %v7905_v44, -inf  ;;  %v7917_v13 = vadd.f32 %v538_v43, %v413_v41 }
 0x2be   :  { %667 = vmax.xlane.f32.xlu1 %v666_v36  ;;  %670 = vmax.xlane.f32.xlu0 %v669_v22  ;;  %v7919_v55 = vadd.f32 %v550_v62, %v416_v56  ;;  %v415_v31 = vmax.f32 %v383_v18, %v399_v63  ;;  %v546_v53 = vrot.slane %v459_v34, %v9081_v30  ;;  %v9245_v18 = vld [vmem:[#allocation46_spill] sm:$0xff] }
 0x2bf   :  { %v401_v38 = vmul.f32 0.2, %v385_v20  ;;  %v475_v3 = vcombine.high %v459_v34, %v459_v34  ;;  %v630_v28 = vsel %vm623_vm4, %v7917_v13, -inf  ;;  %v7926_v21 = vadd.f32 %v542_v11, %v414_v47  ;;  %v9246_v56 = vld [vmem:[#allocation34_spill] sm:$0xff]  ;;  %v9247_v11 = vld [vmem:[#allocation55_spill] sm:$0xff]  ;;  %v9248_v34 = vld [vmem:[#allocation56_spill] sm:$0xff] }
 0x2c0   :  { %v639_v5 = vsel %vm623_vm4, %v7919_v55, -inf  ;;  %v7928_v49 = vadd.f32 %v558_v61, %v418_v0  ;;  %v7935_v27 = vadd.f32 %v546_v53, %v415_v31  ;;  %v2634_v36 = vcombine.high %v7313_v17, %v7329_v40  ;;  %v9237_v40 = vld [vmem:[#allocation39_spill] sm:$0xff]  ;;  %v9249_v47 = vld [vmem:[#allocation58_spill] sm:$0xff]  ;;  %v9253_v31 = vld [vmem:[#allocation60_spill] sm:$0xff] }
 0x2c1   :  { %v554_v2 = vrot.slane %v475_v3, %v9081_v30  ;;  %v633_v6 = vsel %vm623_vm4, %v7926_v21, -inf  ;;  %v417_v9 = vmax.f32 %v385_v20, %v401_v38  ;;  %v2650_v62 = vcombine.high %v7317_v29, %v7338_v24  ;;  %v9238_v29 = vld [vmem:[#allocation18_spill] sm:$0xff]  ;;  %v9251_v20 = vld [vmem:[#allocation57_spill] sm:$0xff]  ;;  %v9255_v3 = vld [vmem:[#allocation19_spill] sm:$0xff] }
 0x2c2   :  { %625 = vmax.xlane.f32.xlu1 %v624_v23  ;;  %628 = vmax.xlane.f32.xlu0 %v627_v52  ;;  %v645_v19 = vsel %vm623_vm4, %v7928_v49, -inf  ;;  %v636_v7 = vsel %vm623_vm4, %v7935_v27, -inf  ;;  %v2666_v26 = vcombine.high %v7342_v46, %v7351_v33  ;;  %v2682_v4 = vcombine.high %v7347_v58, %v7355_v51  ;;  %v9239_v46 = vld [vmem:[#allocation40_spill] sm:$0xff]  ;;  %v9240_v58 = vld [vmem:[#allocation41_spill] sm:$0xff]  ;;  %v9250_v63 = vld [vmem:[#allocation62_spill] sm:$0xff] }
 0x2c3   :  { %v7939_v45 = vadd.f32 %v554_v2, %v417_v9  ;;  %v2770_v22 = vcombine.high %v7361_v50, %v7369_v14  ;;  %v2786_v32 = vcombine.high %v7365_v12, %v7373_v59  ;;  %v2802_v57 = vcombine.high %v7377_v42, %v7388_v37  ;;  %v9241_v50 = vld [vmem:[#allocation42_spill] sm:$0xff]  ;;  %v9242_v14 = vld [vmem:[#allocation43_spill] sm:$0xff]  ;;  %v9243_v42 = vld [vmem:[#allocation44_spill] sm:$0xff] }
 0x2c4   :  { %v2818_v17 = vcombine.high %v7384_v54, %v7392_v60  ;;  %v7961_v24 = vmul.f32 %v9238_v29, %v9237_v40  ;;  %v7965_v33 = vmul.f32 %v9238_v29, %v9239_v46  ;;  %v7969_v51 = vmul.f32 %v9238_v29, %v9240_v58  ;;  %v9244_v37 = vld [vmem:[#allocation45_spill] sm:$0xff]  ;;  %v9266_v30 = vld [vmem:[#allocation80_spill] sm:$0xff] }
 0x2c5   :  { %v642_v43 = vsel %vm623_vm4, %v7939_v45, -inf  ;;  %v7973_v12 = vmul.f32 %v9238_v29, %v9241_v50  ;;  %v7977_v59 = vmul.f32 %v9238_v29, %v9242_v14  ;;  %v7981_v54 = vmul.f32 %v9238_v29, %v9243_v42  ;;  %v9252_v52 = vld [vmem:[#allocation9_spill] sm:$0xff] }
 0x2c6   :  { %631 = vmax.xlane.f32.xlu1 %v630_v28  ;;  %640 = vmax.xlane.f32.xlu0 %v639_v5  ;;  %v7985_v60 = vmul.f32 %v9238_v29, %v9244_v37  ;;  %v7989_v41 = vmul.f32 %v9238_v29, %v9245_v18  ;;  %v2698_v61 = vcombine.high %v9247_v11, %v9246_v56  ;;  %v9254_v38 = vld [vmem:[#allocation33_spill] sm:$0xff]  ;;  %v9260_v29 = vld [vmem:[#allocation63_spill] sm:$0xff] }
 0x2c7   :  { %v2730_v0 = vcombine.high %v9249_v47, %v9248_v34  ;;  %v2834_v23 = vcombine.high %v9251_v20, %v9250_v63  ;;  %v2866_v53 = vcombine.high %v9253_v31, %v9252_v52  ;;  %v8002_v28 = vrot.slane %v2634_v36, %v9255_v3  ;;  %v9259_v40 = vld [vmem:[#allocation61_spill] sm:$0xff]  ;;  %v9262_v63 = vld [vmem:[#allocation22_spill] sm:$0xff]  ;;  %v9264_v52 = vld [vmem:[#allocation36_spill] sm:$0xff] }
 0x2c8   :  { %v8005_v5 = vrot.slane %v2650_v62, %v9255_v3  ;;  %v8008_v2 = vrot.slane %v2666_v26, %v9255_v3  ;;  %v8017_v9 = vrot.slane %v2786_v32, %v9255_v3  ;;  %v2905_v36 = vcombine.low %v7961_v24, %v7969_v51  ;;  %v9257_v32 = vld [vmem:[#allocation20_spill] sm:$0xff]  ;;  %v9263_v20 = vld [vmem:[#allocation21_spill] sm:$0xff] }
 0x2c9   :  { %v2921_v62 = vcombine.low %v7965_v33, %v7973_v12  ;;  %v2937_v26 = vcombine.low %v7977_v59, %v7985_v60  ;;  %v2762_v46 = vcombine.high %v9260_v29, %v9259_v40  ;;  %v2744_v58 = vrot.slane %v2730_v0, %v9257_v32  ;;  %v9261_v0 = vld [vmem:[#allocation35_spill] sm:$0xff]  ;;  %v9267_v40 = vld [vmem:[#allocation77_spill] sm:$0xff] }
 0x2ca   :  { %634 = vmax.xlane.f32.xlu1 %v633_v6  ;;  %646 = vmax.xlane.f32.xlu0 %v645_v19  ;;  %v8011_v6 = vrot.slane %v2682_v4, %v9255_v3  ;;  %v8014_v19 = vrot.slane %v2770_v22, %v9255_v3  ;;  %v2953_v4 = vcombine.low %v7981_v54, %v7989_v41  ;;  %v9256_v22 = vld [vmem:[#allocation31_spill] sm:$0xff] }
 0x2cb   :  { %v2713_v50 = vcombine.low %v8002_v28, %v8005_v5  ;;  %v2848_v42 = vrot.slane %v2834_v23, %v9257_v32  ;;  %v2880_v37 = vrot.slane %v2866_v53, %v9257_v32  ;;  %v2913_v11 = vrot.slane %v2905_v36, %v9255_v3  ;;  %v9269_v29 = vld [vmem:[#allocation79_spill] sm:$0xff] }
 0x2cc   :  { %v2745_v14 = vcombine.low %v8008_v2, %v8011_v6  ;;  %v2849_v18 = vcombine.low %v8014_v19, %v8017_v9  ;;  %v2945_v34 = vrot.slane %v2937_v26, %v9255_v3  ;;  %v2961_v47 = vrot.slane %v2953_v4, %v9255_v3 }
 0x2cd   :  { %v2898_v23 = vcombine.high %v9263_v20, %v9262_v63  ;;  %v8062_v53 = vrot.slane %v2713_v50, %v9257_v32  ;;  %v2906_v50 = vcombine.high %v7961_v24, %v7969_v51  ;;  %v3042_v24 = vcombine.high %v9267_v40, %v9266_v30  ;;  %v9268_v51 = vld [vmem:[#allocation81_spill] sm:$0xff]  ;;  %v9271_v63 = vld [vmem:[#allocation82_spill] sm:$0xff]  ;;  %v9273_v20 = vld [vmem:[#allocation83_spill] sm:$0xff] }
 0x2ce   :  { %637 = vmax.xlane.f32.xlu1 %v636_v7  ;;  %v8020_v7 = vrot.slane %v2802_v57, %v9255_v3  ;;  %v2712_v57 = vrot.slane %v2698_v61, %v9257_v32  ;;  %v2929_v61 = vrot.slane %v2921_v62, %v9255_v3  ;;  %v2899_v62 = vcombine.low %v2848_v42, %v2880_v37  ;;  %v9274_v30 = vld [vmem:[#allocation15_spill] sm:$0xff] }
 0x2cf   :  { %v5823_v36 = vpack.i.bf16 %v2898_v23, %v2762_v46  ;;  %v8068_v26 = vrot.slane %v2849_v18, %v9257_v32  ;;  %v2938_v46 = vcombine.high %v7977_v59, %v7985_v60  ;;  %v2954_v18 = vcombine.high %v7981_v54, %v7989_v41  ;;  %v9272_v60 = vld [vmem:[#allocation85_spill] sm:$0xff] }
 0x2d0   :  { %v2763_v31 = vcombine.low %v2712_v57, %v2744_v58  ;;  %v2764_v23 = vcombine.high %v2712_v57, %v2744_v58  ;;  %v3090_v54 = vcombine.high %v9273_v20, %v9272_v60  ;;  %v8105_v40 = vrot.slane %v2906_v50, %v9255_v3 }
 0x2d1   :  { %v3002_v20 = vcombine.high %v2945_v34, %v2961_v47 }
 0x2d2   :  { %643 = vmax.xlane.f32.xlu1 %v642_v43  ;;  %v8023_v43 = vrot.slane %v2818_v17, %v9255_v3  ;;  %v9258_v17 = vld [vmem:[#allocation17_spill] sm:$0xff] }
 0x2d4   :  { %v2881_v56 = vcombine.low %v8020_v7, %v8023_v43 }
 0x2d6   :  { %v8071_v4 = vrot.slane %v2881_v56, %v9257_v32  ;;  %v5833_v56 = vpack.i.bf16 %v2899_v62, %v2763_v31  ;;  %v9275_v31 = vld [vmem:[#allocation88_spill] sm:$0xff]  ;;  %v2746_v62 = vcombine.high %v8008_v2, %v8011_v6  ;;  %v9279_v2 = vld [vmem:[#allocation23_spill] sm:$0xff] }
 0x2d8   :  { %v2901_v41 = vcombine.low %v8068_v26, %v8071_v4 }
 0x2e0   :  { %5794 = vrot.lane.b32.xlu0 %v9254_v38, %s6098_s14  ;;  %v8065_v38 = vrot.slane %v2745_v14, %v9257_v32  ;;  %v2922_v14 = vcombine.high %v7965_v33, %v7973_v12  ;;  %v3058_v33 = vcombine.high %v9269_v29, %v9268_v51  ;;  %v9270_v12 = vld [vmem:[#allocation84_spill] sm:$0xff]  ;;  %v9280_v51 = vld [vmem:[#allocation54_spill] sm:$0xff] }
 0x2e1   :  { %v3074_v59 = vcombine.high %v9271_v63, %v9270_v12  ;;  %v8114_v63 = vrot.slane %v2954_v18, %v9255_v3 }
 0x2e2   :  { %v8108_v29 = vrot.slane %v2922_v14, %v9255_v3  ;;  %v9277_v14 = vld [vmem:[#allocation90_spill] sm:$0xff] }
 0x2e3   :  { %5799 = vrot.lane.b32.xlu1 %v9256_v22, %s6094_s30  ;;  %v2969_v22 = vcombine.low %v2913_v11, %v2929_v61  ;;  %v8130_v50 = vrot.slane %v3074_v59, %v9255_v3 }
 0x2e4   :  { %5804 = vrot.lane.b32.xlu0 %v9258_v17, %s6099_s15  ;;  %v3001_v17 = vcombine.low %v2945_v34, %v2961_v47  ;;  %v8133_v34 = vrot.slane %v3090_v54, %v9255_v3 }
 0x2e5   :  { %v8097_v57 = vrot.slane %v2969_v22, %v9257_v32  ;;  %v8124_v22 = vrot.slane %v3042_v24, %v9255_v3  ;;  %v2985_v24 = vcombine.low %v8105_v40, %v8108_v29 }
 0x2e6   :  { %v8100_v58 = vrot.slane %v3001_v17, %v9257_v32  ;;  %v8127_v17 = vrot.slane %v3058_v33, %v9255_v3  ;;  %v9281_v33 = vld [vmem:[#allocation53_spill] sm:$0xff] }
 0x2e7   :  { %5809 = vrot.lane.b32.xlu1 %v9261_v0, %s6097_s2  ;;  %v9265_v0 = vld [vmem:[#allocation59_spill] sm:$0xff]  ;;  %v3170_v12 = vcombine.high %v9281_v33, %v9280_v51 }
 0x2e8   :  { %5814 = vrot.lane.b32.xlu0 %v9264_v52, %s6100_s16  ;;  %v2900_v52 = vcombine.high %v2848_v42, %v2880_v37  ;;  %v2970_v42 = vcombine.high %v2913_v11, %v2929_v61  ;;  %v8111_v37 = vrot.slane %v2938_v46, %v9255_v3  ;;  %v9276_v11 = vld [vmem:[#allocation87_spill] sm:$0xff]  ;;  %v9278_v46 = vld [vmem:[#allocation89_spill] sm:$0xff] }
 0x2e9   :  { %v3106_v61 = vcombine.high %v9276_v11, %v9275_v31  ;;  %v3138_v18 = vcombine.high %v9278_v46, %v9277_v14  ;;  %v2902_v31 = vcombine.high %v8068_v26, %v8071_v4  ;;  %v9283_v4 = vld [vmem:[#allocation68_spill] sm:$0xff] }
 0x2ea   :  { %v5843_v47 = vpack.i.bf16 %v2900_v52, %v2764_v23  ;;  %v3017_v23 = vcombine.low %v8111_v37, %v8114_v63 }
 0x2eb   :  { %5819 = vrot.lane.b32.xlu1 %v9265_v0, %s6096_s13  ;;  %v2765_v0 = vcombine.low %v8062_v53, %v8065_v38  ;;  %v3152_v59 = vrot.slane %v3138_v18, %v9257_v32 }
 0x2ec   :  { %5824 = vrot.lane.b32.xlu0 %v5823_v36, %s6095_s12  ;;  %v2714_v36 = vcombine.high %v8002_v28, %v8005_v5  ;;  %v2850_v28 = vcombine.high %v8014_v19, %v8017_v9  ;;  %v2882_v5 = vcombine.high %v8020_v7, %v8023_v43  ;;  %v3034_v19 = vcombine.high %v8097_v57, %v8100_v58 }
 0x2ed   :  { %v5853_v6 = vpack.i.bf16 %v2901_v41, %v2765_v0  ;;  %v2984_v9 = vrot.slane %v2970_v42, %v9257_v32  ;;  %v3016_v7 = vrot.slane %v3002_v20, %v9257_v32  ;;  %v3120_v43 = vrot.slane %v3106_v61, %v9257_v32  ;;  %v9282_v41 = vld [vmem:[#allocation24_spill] sm:$0xff] }
 0x2ee   :  { %v2728_v52 = vrot.slane %v2714_v36, %v9257_v32  ;;  %v3153_v0 = vcombine.low %v8130_v50, %v8133_v34  ;;  %v2864_v60 = vrot.slane %v2850_v28, %v9257_v32  ;;  %v2896_v54 = vrot.slane %v2882_v5, %v9257_v32 }
 0x2ef   :  { %5829 = vrot.lane.b32.xlu1 %v9274_v30, %s6098_s14  ;;  %v8169_v42 = vrot.slane %v2985_v24, %v9257_v32  ;;  %v8172_v30 = vrot.slane %v3017_v23, %v9257_v32  ;;  %v5858_v20 = vpack.i.bf16 %v3170_v12, %v3034_v19  ;;  %v3035_v11 = vcombine.low %v2984_v9, %v3016_v7  ;;  %v9285_v23 = vld [vmem:[#allocation70_spill] sm:$0xff]  ;;  %v9286_v19 = vld [vmem:[#allocation69_spill] sm:$0xff] }
 0x2f0   :  { %5834 = vrot.lane.b32.xlu0 %v5833_v56, %s6094_s30  ;;  %v2766_v56 = vcombine.high %v8062_v53, %v8065_v38  ;;  %v2760_v53 = vrot.slane %v2746_v62, %v9257_v32  ;;  %v3121_v38 = vcombine.low %v8124_v22, %v8127_v17  ;;  %v3036_v61 = vcombine.high %v2984_v9, %v3016_v7 }
 0x2f1   :  { %v8181_v14 = vrot.slane %v3153_v0, %v9257_v32  ;;  %v3171_v18 = vcombine.low %v3120_v43, %v3152_v59  ;;  %v2903_v28 = vcombine.low %v2864_v60, %v2896_v54  ;;  %v3172_v5 = vcombine.high %v3120_v43, %v3152_v59  ;;  %v9288_v0 = vld [vmem:[#allocation71_spill] sm:$0xff] }
 0x2f2   :  { %v2767_v36 = vcombine.low %v2728_v52, %v2760_v53  ;;  %v2768_v62 = vcombine.high %v2728_v52, %v2760_v53  ;;  %v5863_v46 = vpack.i.bf16 %v2902_v31, %v2766_v56  ;;  %v3037_v26 = vcombine.low %v8169_v42, %v8172_v30  ;;  %v9289_v59 = vld [vmem:[#allocation27_spill] sm:$0xff] }
 0x2f3   :  { %5839 = vrot.lane.b32.xlu1 %v9279_v2, %s6099_s15  ;;  %v2904_v2 = vcombine.high %v2864_v60, %v2896_v54  ;;  %v3274_v9 = vcombine.high %v9286_v19, %v9285_v23  ;;  %v5868_v7 = vpack.i.bf16 %v3171_v18, %v3035_v11  ;;  %v5878_v52 = vpack.i.bf16 %v3172_v5, %v3036_v61  ;;  %v9290_v60 = vld [vmem:[#allocation25_spill] sm:$0xff]  ;;  %v9296_v11 = vld [vmem:[#allocation30_spill] sm:$0xff] }
 0x2f4   :  { %5844 = vrot.lane.b32.xlu0 %v5843_v47, %s6097_s2  ;;  %v8178_v47 = vrot.slane %v3121_v38, %v9257_v32  ;;  %v5873_v56 = vpack.i.bf16 %v2903_v28, %v2767_v36  ;;  %v9287_v38 = vld [vmem:[#allocation72_spill] sm:$0xff]  ;;  %v3178_v54 = vcombine.high %v9290_v60, %v9289_v59  ;;  %v9298_v5 = vld [vmem:[#allocation73_spill] sm:$0xff]  ;;  %v9299_v19 = vld [vmem:[#allocation38_spill] sm:$0xff] }
 0x2f5   :  { %v5883_v53 = vpack.i.bf16 %v2904_v2, %v2768_v62  ;;  %v3378_v12 = vcombine.high %v9288_v0, %v9287_v38  ;;  %v3288_v18 = vrot.slane %v3274_v9, %v9257_v32  ;;  %v9297_v28 = vld [vmem:[#allocation76_spill] sm:$0xff]  ;;  %v9301_v59 = vld [vmem:[#allocation49_spill] sm:$0xff] }
 0x2f6   :  { %v3173_v43 = vcombine.low %v8178_v47, %v8181_v14  ;;  %v3410_v2 = vcombine.high %v9298_v5, %v9297_v28  ;;  %v9300_v38 = vld [vmem:[#allocation32_spill] sm:$0xff]  ;;  %v9302_v60 = vld [vmem:[#allocation37_spill] sm:$0xff]  ;;  %v3018_v28 = vcombine.high %v8111_v37, %v8114_v63  ;;  %v3192_v5 = vrot.slane %v3178_v54, %v9255_v3 }
 0x2f7   :  { %5849 = vrot.lane.b32.xlu1 %v9282_v41, %s6100_s16  ;;  %v9291_v41 = vld [vmem:[#allocation28_spill] sm:$0xff]  ;;  %v3314_v0 = vcombine.high %v9300_v38, %v9299_v19 }
 0x2f8   :  { %5854 = vrot.lane.b32.xlu0 %v5853_v6, %s6096_s13  ;;  %v9284_v6 = vld [vmem:[#allocation67_spill] sm:$0xff]  ;;  %v5888_v36 = vpack.i.bf16 %v3173_v43, %v3037_v26  ;;  %v9306_v26 = vld [vmem:[#allocation16_spill] sm:$0xff] }
 0x2f9   :  { %v3242_v24 = vcombine.high %v9284_v6, %v9283_v4  ;;  %v9293_v4 = vld [vmem:[#allocation47_spill] sm:$0xff]  ;;  %v9294_v6 = vld [vmem:[#allocation29_spill] sm:$0xff]  ;;  %v3328_v37 = vrot.slane %v3314_v0, %v9255_v3 }
 0x2fa   :  { %v3210_v23 = vcombine.high %v9294_v6, %v9293_v4  ;;  %v9304_v4 = vld [vmem:[#allocation50_spill] sm:$0xff] }
 0x2fb   :  { %5859 = vrot.lane.b32.xlu1 %v5858_v20, %s6095_s12  ;;  %v9292_v20 = vld [vmem:[#allocation26_spill] sm:$0xff]  ;;  %v3256_v62 = vrot.slane %v3242_v24, %v9257_v32  ;;  %v9307_v24 = vld [vmem:[#allocation75_spill] sm:$0xff] }
 0x2fc   :  { %5864 = vrot.lane.b32.xlu0 %v5863_v46, %s6098_s14  ;;  %v3194_v31 = vcombine.high %v9292_v20, %v9291_v41  ;;  %v9295_v46 = vld [vmem:[#allocation48_spill] sm:$0xff]  ;;  %v3330_v41 = vcombine.high %v9302_v60, %v9301_v59  ;;  %v9303_v20 = vld [vmem:[#allocation65_spill] sm:$0xff]  ;;  %v3224_v38 = vrot.slane %v3210_v23, %v9255_v3  ;;  %v9309_v60 = vld [vmem:[#allocation86_spill] sm:$0xff] }
 0x2fd   :  { %v3226_v61 = vcombine.high %v9296_v11, %v9295_v46  ;;  %v3346_v6 = vcombine.high %v9304_v4, %v9303_v20  ;;  %v9308_v46 = vld [vmem:[#allocation74_spill] sm:$0xff]  ;;  %v3392_v11 = vrot.slane %v3378_v12, %v9257_v32  ;;  %v3424_v12 = vrot.slane %v3410_v2, %v9257_v32 }
 0x2fe   :  { %v3306_v9 = vcombine.high %v9308_v46, %v9307_v24  ;;  %v3208_v19 = vrot.slane %v3194_v31, %v9255_v3  ;;  %v9310_v20 = vld [vmem:[#allocation78_spill] sm:$0xff]  ;;  %v3344_v63 = vrot.slane %v3330_v41, %v9255_v3  ;;  %v3038_v31 = vcombine.high %v8169_v42, %v8172_v30 }
 0x2ff   :  { %5869 = vrot.lane.b32.xlu1 %v5868_v7, %s6094_s30  ;;  %v9305_v7 = vld [vmem:[#allocation66_spill] sm:$0xff]  ;;  %v3240_v59 = vrot.slane %v3226_v61, %v9255_v3  ;;  %v3442_v4 = vcombine.high %v9310_v20, %v9309_v60  ;;  %v3360_v54 = vrot.slane %v3346_v6, %v9255_v3  ;;  %v3307_v23 = vcombine.low %v3256_v62, %v3288_v18 }
 0x300   :  { %5874 = vrot.lane.b32.xlu0 %v5873_v56, %s6099_s15  ;;  %v3362_v43 = vcombine.high %v9306_v26, %v9305_v7  ;;  %v2986_v56 = vcombine.high %v8105_v40, %v8108_v29  ;;  %v3122_v40 = vcombine.high %v8124_v22, %v8127_v17  ;;  %v3154_v29 = vcombine.high %v8130_v50, %v8133_v34 }
 0x301   :  { %v3032_v22 = vrot.slane %v3018_v28, %v9257_v32  ;;  %v5893_v17 = vpack.i.bf16 %v3442_v4, %v3306_v9  ;;  %v3257_v50 = vcombine.low %v3192_v5, %v3208_v19  ;;  %v3289_v34 = vcombine.low %v3224_v38, %v3240_v59 }
 0x302   :  { %v3000_v61 = vrot.slane %v2986_v56, %v9257_v32  ;;  %v3443_v2 = vcombine.low %v3392_v11, %v3424_v12  ;;  %v3136_v0 = vrot.slane %v3122_v40, %v9257_v32  ;;  %v3168_v41 = vrot.slane %v3154_v29, %v9257_v32 }
 0x303   :  { %5879 = vrot.lane.b32.xlu1 %v5878_v52, %s6097_s2  ;;  %v3376_v52 = vrot.slane %v3362_v43, %v9255_v3  ;;  %v3393_v42 = vcombine.low %v3328_v37, %v3344_v63  ;;  %v3308_v43 = vcombine.high %v3256_v62, %v3288_v18  ;;  %v3265_v9 = vrot.slane %v3257_v50, %v9257_v32 }
 0x304   :  { %5884 = vrot.lane.b32.xlu0 %v5883_v53, %s6100_s16  ;;  %v3174_v53 = vcombine.high %v8178_v47, %v8181_v14  ;;  %v5903_v7 = vpack.i.bf16 %v3443_v2, %v3307_v23  ;;  %v3039_v26 = vcombine.low %v3000_v61, %v3032_v22  ;;  %v3258_v56 = vcombine.high %v3192_v5, %v3208_v19 }
 0x305   :  { %v3425_v30 = vcombine.low %v3360_v54, %v3376_v52  ;;  %v3290_v28 = vcombine.high %v3224_v38, %v3240_v59  ;;  %v3175_v47 = vcombine.low %v3136_v0, %v3168_v41  ;;  %v3444_v14 = vcombine.high %v3392_v11, %v3424_v12 }
 0x306   :  { %v5898_v6 = vpack.i.bf16 %v3174_v53, %v3038_v31  ;;  %v3401_v4 = vrot.slane %v3393_v42, %v9257_v32  ;;  %v3394_v29 = vcombine.high %v3328_v37, %v3344_v63  ;;  %v3426_v31 = vcombine.high %v3360_v54, %v3376_v52 }
 0x307   :  { %5889 = vrot.lane.b32.xlu1 %v5888_v36, %s6096_s13  ;;  %v3297_v36 = vrot.slane %v3289_v34, %v9257_v32  ;;  %v3433_v40 = vrot.slane %v3425_v30, %v9257_v32  ;;  %v5908_v23 = vpack.i.bf16 %v3175_v47, %v3039_v26  ;;  %v3040_v62 = vcombine.high %v3000_v61, %v3032_v22 }
 0x308   :  { %5894 = vrot.lane.b32.xlu0 %v5893_v17, %s6095_s12  ;;  %v5913_v18 = vpack.i.bf16 %v3444_v14, %v3308_v43  ;;  %v3272_v50 = vrot.slane %v3258_v56, %v9257_v32  ;;  %v3304_v5 = vrot.slane %v3290_v28, %v9257_v32  ;;  %v3176_v19 = vcombine.high %v3136_v0, %v3168_v41  ;;  %v8268_v41 = vpop.permute.xlu1 %5789 }
 0x309   :  { %v3309_v17 = vcombine.low %v3265_v9, %v3297_v36  ;;  %v3445_v11 = vcombine.low %v3401_v4, %v3433_v40  ;;  %v3408_v38 = vrot.slane %v3394_v29, %v9257_v32  ;;  %v3440_v59 = vrot.slane %v3426_v31, %v9257_v32 }
 0x30a   :  { %v5918_v12 = vpack.i.bf16 %v3176_v19, %v3040_v62  ;;  %v3310_v37 = vcombine.high %v3265_v9, %v3297_v36  ;;  %v3311_v54 = vcombine.low %v3272_v50, %v3304_v5  ;;  %v3446_v52 = vcombine.high %v3401_v4, %v3433_v40 }
 0x30b   :  { %5899 = vrot.lane.b32.xlu1 %v5898_v6, %s6098_s14  ;;  %v5923_v63 = vpack.i.bf16 %v3445_v11, %v3309_v17  ;;  %v3447_v61 = vcombine.low %v3408_v38, %v3440_v59  ;;  %v3312_v53 = vcombine.high %v3272_v50, %v3304_v5  ;;  %v3448_v2 = vcombine.high %v3408_v38, %v3440_v59 }
 0x30c   :  { %5904 = vrot.lane.b32.xlu0 %v5903_v7, %s6094_s30  ;;  %v5928_v22 = vpack.i.bf16 %v3446_v52, %v3310_v37 }
 0x30d   :  { %v5933_v34 = vpack.i.bf16 %v3447_v61, %v3311_v54  ;;  %v5938_v0 = vpack.i.bf16 %v3448_v2, %v3312_v53 }
 0x30f   :  { %5909 = vrot.lane.b32.xlu1 %v5908_v23, %s6099_s15 }
 0x310   :  { %5914 = vrot.lane.b32.xlu0 %v5913_v18, %s6097_s2 }
 0x313   :  { %5919 = vrot.lane.b32.xlu1 %v5918_v12, %s6100_s16 }
 0x314   :  { %5924 = vrot.lane.b32.xlu0 %v5923_v63, %s6096_s13 }
 0x317   :  { %5929 = vrot.lane.b32.xlu1 %v5928_v22, %s6098_s14 }
 0x318   :  { %5934 = vrot.lane.b32.xlu0 %v5933_v34, %s6099_s15 }
 0x31c   :  { %5939 = vrot.lane.b32.xlu0 %v5938_v0, %s6100_s16 }
 0x33f   :  { %v650_v42 = vpop.xlane.xlu1 %649  ;;  %v653_v30 = vpop.xlane.xlu0 %652 }
 0x340   :  { %v680_v6 = vsub.f32 %v7846_v15, %v650_v42  ;;  %v681_v7 = vsub.f32 %v7848_v16, %v653_v30 }
 0x342   :  { %v704_v26 = vmul.f32 1.442695, %v680_v6  ;;  %v706_v43 = vmul.f32 1.442695, %v681_v7 }
 0x343   :  { %v656_v9 = vpop.xlane.xlu1 %655  ;;  %v659_v36 = vpop.xlane.xlu0 %658 }
 0x344   :  { %v682_v56 = vsub.f32 %v7850_v25, %v656_v9  ;;  %v683_v28 = vsub.f32 %v7852_v48, %v659_v36  ;;  %5982 = vpow2.f32 %v704_v26 }
 0x345   :  { %5984 = vpow2.f32 %v706_v43  ;;  %v5791_v43 = vunpack.i.l.bf16 %v8268_v41 }
 0x346   :  { %v708_v47 = vmul.f32 1.442695, %v682_v56  ;;  %v710_v14 = vmul.f32 1.442695, %v683_v28 }
 0x347   :  { %v662_v4 = vpop.xlane.xlu1 %661  ;;  %v665_v40 = vpop.xlane.xlu0 %664 }
 0x348   :  { %5986 = vpow2.f32 %v708_v47  ;;  %v684_v29 = vsub.f32 %v7865_v39, %v662_v4  ;;  %v685_v15 = vsub.f32 %v7874_v8, %v665_v40 }
 0x349   :  { %5988 = vpow2.f32 %v710_v14 }
 0x34a   :  { %v712_v16 = vmul.f32 1.442695, %v684_v29  ;;  %v714_v48 = vmul.f32 1.442695, %v685_v15  ;;  %v9317_v15 = vld [vmem:[#allocation10_spill] sm:$0xff] }
 0x34b   :  { %v668_v31 = vpop.xlane.xlu1 %667  ;;  %v671_v23 = vpop.xlane.xlu0 %670 }
 0x34c   :  { %v686_v62 = vsub.f32 %v7883_v10, %v668_v31  ;;  %v687_v25 = vsub.f32 %v7889_v35, %v671_v23  ;;  %5990 = vpow2.f32 %v712_v16  ;;  %v9318_v16 = vld [vmem:[#allocation14_spill] sm:$0xff] }
 0x34d   :  { %v9319_v31 = vcombine.low %v9317_v15, %v9318_v16 }
 0x34e   :  { %v716_v18 = vmul.f32 1.442695, %v686_v62  ;;  %v718_v17 = vmul.f32 1.442695, %v687_v25  ;;  %v8278_v19 = vpop.eup %5982 }
 0x34f   :  { %v626_v50 = vpop.xlane.xlu1 %625  ;;  %v629_v5 = vpop.xlane.xlu0 %628 }
 0x350   :  { %5992 = vpow2.f32 %v716_v18  ;;  %v672_v39 = vsub.f32 %v7903_v1, %v626_v50  ;;  %v8281_v11 = vpop.eup %5984  ;;  %v673_v10 = vsub.f32 %v7905_v44, %v629_v5  ;;  %v9321_v18 = vld [vmem:[#allocation11_spill] sm:$0xff] }
 0x351   :  { %9311 = vst [vmem:[#allocation8_spill] sm:$0xff] %v8281_v11  ;;  %5994 = vpow2.f32 %v718_v17 }
 0x352   :  { %v8283_v8 = vpop.eup %5986  ;;  %5996 = vpow2.f32 %v714_v48  ;;  %v688_v38 = vmul.f32 1.442695, %v672_v39  ;;  %v690_v44 = vmul.f32 1.442695, %v673_v10  ;;  %v9320_v48 = vld [vmem:[#allocation13_spill] sm:$0xff] }
 0x353   :  { %v8286_v35 = vpop.eup %5988  ;;  %v632_v59 = vpop.xlane.xlu1 %631  ;;  %v4150_v37 = vcombine.low %v8278_v19, %v8283_v8  ;;  %v4151_v63 = vcombine.high %v8278_v19, %v8283_v8  ;;  %v9322_v17 = vcombine.low %v9320_v48, %v9321_v18 }
 0x354   :  { %9312 = vst [vmem:[#allocation12_spill] sm:$0xff] %v8286_v35  ;;  %v641_v12 = vpop.xlane.xlu0 %640  ;;  %v674_v1 = vsub.f32 %v7917_v13, %v632_v59  ;;  %v4166_v54 = vcombine.low %v8281_v11, %v8286_v35  ;;  %v4167_v52 = vcombine.high %v8281_v11, %v8286_v35  ;;  %5998 = vpow2.f32 %v688_v38 }
 0x355   :  { %v677_v22 = vsub.f32 %v7919_v55, %v641_v12  ;;  %v4158_v2 = vrot.slane %v4150_v37, %v9255_v3  ;;  %v8301_v42 = vrot.slane %v4151_v63, %v9255_v3  ;;  %v5792_v55 = vunpack.i.h.bf16 %v8268_v41 }
 0x356   :  { %v692_v61 = vmul.f32 1.442695, %v674_v1  ;;  %v4174_v0 = vrot.slane %v4166_v54, %v9255_v3  ;;  %v4181_v6 = vrot.slane %v4167_v52, %v9255_v3  ;;  %v8306_v7 = vpop.eup %5990  ;;  %v3906_v50 = vsel %vm3897_vm3, %v9322_v17, %v5791_v43 }
 0x357   :  { %v635_v34 = vpop.xlane.xlu1 %634  ;;  %9313 = vst [vmem:[#allocation7_spill] sm:$0xff] %v8306_v7  ;;  %v698_v9 = vmul.f32 1.442695, %v677_v22  ;;  %v3907_v23 = vsel %vm3897_vm3, %v9319_v31, %v5792_v55 }
 0x358   :  { %v647_v53 = vpop.xlane.xlu0 %646  ;;  %6000 = vpow2.f32 %v692_v61  ;;  %v675_v13 = vsub.f32 %v7926_v21, %v635_v34  ;;  %v4215_v14 = vcombine.high %v4158_v2, %v4174_v0  ;;  %v4214_v29 = vcombine.low %v4158_v2, %v4174_v0 }
 0x359   :  { %v679_v30 = vsub.f32 %v7928_v49, %v647_v53  ;;  %6002 = vpow2.f32 %v690_v44  ;;  %v4230_v41 = vcombine.low %v8301_v42, %v4181_v6  ;;  %v4231_v37 = vcombine.high %v8301_v42, %v4181_v6  ;;  %v9324_v6 = vld [vmem:[#allocation51_spill] sm:$0xff] }
 0x35a   :  { %v8309_v26 = vpop.eup %5992  ;;  %v694_v36 = vmul.f32 1.442695, %v675_v13  ;;  %v8337_v1 = vrot.slane %v4215_v14, %v9257_v32  ;;  %v8340_v54 = vrot.slane %v4214_v29, %v9257_v32 }
 0x35b   :  { %9314 = vst [vmem:[#allocation64_spill] sm:$0xff] %v8309_v26  ;;  %v702_v56 = vmul.f32 1.442695, %v679_v30  ;;  %v8312_v28 = vpop.eup %5994  ;;  %v638_v47 = vpop.xlane.xlu1 %637  ;;  %v4182_v49 = vcombine.low %v8306_v7, %v8309_v26  ;;  %v4183_v5 = vcombine.high %v8306_v7, %v8309_v26  ;;  %v8343_v52 = vrot.slane %v4230_v41, %v9257_v32 }
 0x35c   :  { %9315 = vst [vmem:[#allocation5_spill] sm:$0xff] %v8312_v28  ;;  %v5795_v21 = vpop.permute.xlu0 %5794  ;;  %v8316_v4 = vpop.eup %5996  ;;  %6004 = vpow2.f32 %v694_v36  ;;  %v676_v40 = vsub.f32 %v7935_v27, %v638_v47  ;;  %v8373_v15 = vrot.slane %v4231_v37, %v9257_v32 }
 0x35d   :  { %9316 = vst [vmem:[#allocation39_spill] sm:$0xff] %v8316_v4  ;;  %6006 = vpow2.f32 %v702_v56  ;;  %v4190_v62 = vrot.slane %v4182_v49, %v9255_v3  ;;  %v4198_v25 = vcombine.low %v8316_v4, %v8312_v28  ;;  %v5797_v27 = vunpack.i.h.bf16 %v5795_v21 }
 0x35e   :  { %6008 = vpow2.f32 %v698_v9  ;;  %v696_v39 = vmul.f32 1.442695, %v676_v40  ;;  %v5796_v10 = vunpack.i.l.bf16 %v5795_v21  ;;  %v8345_v44 = vpop.eup %5998  ;;  %v4199_v53 = vcombine.high %v8316_v4, %v8312_v28 }
 0x35f   :  { %v644_v38 = vpop.xlane.xlu1 %643  ;;  %v4206_v12 = vrot.slane %v4198_v25, %v9255_v3  ;;  %v8354_v30 = vrot.slane %v4183_v5, %v9255_v3 }
 0x360   :  { %v5805_v59 = vpop.permute.xlu0 %5804  ;;  %v678_v63 = vsub.f32 %v7939_v45, %v644_v38  ;;  %v9323_v45 = vld [vmem:[#allocation52_spill] sm:$0xff]  ;;  %6010 = vpow2.f32 %v696_v39  ;;  %v3970_v55 = vsel %vm3963_vm6, %v9324_v6, %v5796_v10  ;;  %v8370_v41 = vrot.slane %v4199_v53, %v9255_v3 }
 0x361   :  { %v5807_v61 = vunpack.i.h.bf16 %v5805_v59  ;;  %v4247_v22 = vcombine.high %v4190_v62, %v4206_v12  ;;  %v4246_v34 = vcombine.low %v4190_v62, %v4206_v12  ;;  %v3971_v0 = vsel %vm3963_vm6, %v9323_v45, %v5797_v27 }
 0x362   :  { %v8349_v2 = vpop.eup %6000  ;;  %v700_v42 = vmul.f32 1.442695, %v678_v63  ;;  %v5806_v13 = vunpack.i.l.bf16 %v5805_v59 }
 0x363   :  { %v5800_v43 = vpop.permute.xlu1 %5799  ;;  %v4014_v36 = vcombine.low %v8345_v44, %v8349_v2  ;;  %v8361_v56 = vrot.slane %v4247_v22, %v9257_v32  ;;  %v8364_v49 = vrot.slane %v4246_v34, %v9257_v32  ;;  %v8366_v14 = vpop.eup %6002  ;;  %v3988_v40 = vsel %vm3980_vm7, %v3971_v0, %v5807_v61 }
 0x364   :  { %v5815_v9 = vpop.permute.xlu0 %5814  ;;  %6012 = vpow2.f32 %v700_v42  ;;  %v5802_v47 = vunpack.i.h.bf16 %v5800_v43  ;;  %v3987_v31 = vsel %vm3980_vm7, %v3970_v55, %v5806_v13  ;;  %v5801_v62 = vunpack.i.l.bf16 %v5800_v43 }
 0x365   :  { %v5817_v21 = vunpack.i.h.bf16 %v5815_v9  ;;  %v5816_v29 = vunpack.i.l.bf16 %v5815_v9  ;;  %v4015_v48 = vcombine.high %v8345_v44, %v8349_v2  ;;  %v4022_v39 = vrot.slane %v4014_v36, %v9255_v3 }
 0x366   :  { %v8375_v16 = vpop.eup %6004  ;;  %v3923_v12 = vsel %vm623_vm4, %v3907_v23, %v5802_v47  ;;  %v3922_v0 = vsel %vm623_vm4, %v3906_v50, %v5801_v62 }
 0x367   :  { %v4005_v25 = vsel %vm3997_vm8, %v3988_v40, %v5817_v21  ;;  %v8381_v18 = vpop.eup %6006  ;;  %v5810_v17 = vpop.permute.xlu1 %5809  ;;  %v4004_v5 = vsel %vm3997_vm8, %v3987_v31, %v5816_v29  ;;  %v4030_v10 = vcombine.low %v8366_v14, %v8375_v16  ;;  %v4031_v38 = vcombine.high %v8366_v14, %v8375_v16 }
 0x368   :  { %v5825_v27 = vpop.permute.xlu0 %5824  ;;  %v8389_v59 = vpop.eup %6008  ;;  %v5811_v37 = vunpack.i.l.bf16 %v5810_v17  ;;  %v5812_v22 = vunpack.i.h.bf16 %v5810_v17  ;;  %v5583_v53 = vpack.c.bf16 %v4005_v25, %v4004_v5  ;;  %v4029_v36 = vrot.slane %v4015_v48, %v9255_v3  ;;  %v9325_v25 = vld [vmem:[#allocation21_spill] sm:$0xff]  ;;  %v9326_v17 = vld [vmem:[#allocation22_spill] sm:$0xff] }
 0x369   :  { %v5827_v34 = vunpack.i.h.bf16 %v5825_v27  ;;  %v4038_v45 = vrot.slane %v4030_v10, %v9255_v3  ;;  %v5826_v42 = vunpack.i.l.bf16 %v5825_v27  ;;  %v4062_v13 = vcombine.low %v8389_v59, %v8381_v18 }
 0x36a   :  { %v8401_v23 = vrot.slane %v4031_v38, %v9255_v3  ;;  %5584 = vmatprep.subr.bf16.mxu0 %v5583_v53  ;;  %v4063_v47 = vcombine.high %v8389_v59, %v8381_v18  ;;  %v3939_v21 = vsel %vm3930_vm5, %v3922_v0, %v5811_v37  ;;  %v4262_v29 = vcombine.low %v8354_v30, %v8370_v41  ;;  %v8409_v31 = vpop.eup %6010  ;;  %v9328_v38 = vld [vmem:[#allocation63_spill] sm:$0xff]  ;;  %v9329_v37 = vld [vmem:[#allocation61_spill] sm:$0xff] }
 0x36b   :  { %v5820_v6 = vpop.permute.xlu1 %5819  ;;  %v4079_v43 = vcombine.high %v4022_v39, %v4038_v45  ;;  %v4078_v9 = vcombine.low %v4022_v39, %v4038_v45  ;;  %5586 = vmatpush3.bf16.msra.mxu0 %v5583_v53  ;;  %v3940_v62 = vsel %vm3930_vm5, %v3923_v12, %v5812_v22  ;;  %v9327_v27 = vcombine.low %v9325_v25, %v9326_v17 }
 0x36c   :  { %v5835_v55 = vpop.permute.xlu0 %5834  ;;  %v5822_v50 = vunpack.i.h.bf16 %v5820_v6  ;;  %v5821_v40 = vunpack.i.l.bf16 %v5820_v6  ;;  %v9330_v53 = vcombine.low %v9328_v38, %v9329_v37  ;;  %v4070_v0 = vrot.slane %v4062_v13, %v9255_v3 }
 0x36d   :  { %v3909_v48 = vsel %vm3897_vm3, %v9327_v27, %v5827_v34  ;;  %v5837_v5 = vunpack.i.h.bf16 %v5835_v55  ;;  %v5836_v39 = vunpack.i.l.bf16 %v5835_v55  ;;  %v8424_v6 = vrot.slane %v4079_v43, %v9257_v32 }
 0x36e   :  { %v8416_v10 = vpop.eup %6012  ;;  %v3908_v45 = vsel %vm3897_vm3, %v9330_v53, %v5826_v42  ;;  %v4094_v12 = vcombine.low %v4029_v36, %v8401_v23  ;;  %v8430_v55 = vrot.slane %v4078_v9, %v9257_v32  ;;  %v8435_v42 = vrot.slane %v4063_v47, %v9255_v3 }
 0x36f   :  { %v5830_v22 = vpop.permute.xlu1 %5829  ;;  %v4046_v34 = vcombine.low %v8409_v31, %v8416_v10  ;;  %v4047_v17 = vcombine.high %v8409_v31, %v8416_v10  ;;  %v3955_v13 = vsel %vm47_vm0, %v3939_v21, %v5821_v40  ;;  %v3956_v43 = vsel %vm47_vm0, %v3940_v62, %v5822_v50 }
 0x370   :  { %v5845_v25 = vpop.permute.xlu0 %5844  ;;  %v5831_v27 = vunpack.i.l.bf16 %v5830_v22  ;;  %v8440_v38 = vrot.slane %v4262_v29, %v9257_v32  ;;  %v3924_v37 = vsel %vm623_vm4, %v3908_v45, %v5836_v39  ;;  %v3925_v53 = vsel %vm623_vm4, %v3909_v48, %v5837_v5 }
 0x371   :  { %v4054_v9 = vrot.slane %v4046_v34, %v9255_v3  ;;  %v4061_v61 = vrot.slane %v4047_v17, %v9255_v3  ;;  %v5832_v63 = vunpack.i.h.bf16 %v5830_v22  ;;  %v5847_v28 = vunpack.i.h.bf16 %v5845_v25 }
 0x372   :  { %v5846_v47 = vunpack.i.l.bf16 %v5845_v25  ;;  %v8447_v4 = vrot.slane %v4094_v12, %v9257_v32  ;;  %v4095_v39 = vcombine.high %v4029_v36, %v8401_v23  ;;  %v3972_v48 = vsel %vm3963_vm6, %v3955_v13, %v5831_v27 }
 0x373   :  { %v5840_v21 = vpop.permute.xlu1 %5839  ;;  %v4111_v40 = vcombine.high %v4054_v9, %v4070_v0  ;;  %v4110_v62 = vcombine.low %v4054_v9, %v4070_v0  ;;  %v4126_v29 = vcombine.low %v4061_v61, %v8435_v42  ;;  %v4283_v45 = vcombine.high %v8343_v52, %v8440_v38 }
 0x374   :  { %v5855_v50 = vpop.permute.xlu0 %5854  ;;  %v5842_v5 = vunpack.i.h.bf16 %v5840_v21  ;;  %v4280_v22 = vcombine.low %v8337_v1, %v8361_v56  ;;  %v5841_v25 = vunpack.i.l.bf16 %v5840_v21  ;;  %v3973_v17 = vsel %vm3963_vm6, %v3956_v43, %v5832_v63 }
 0x375   :  { %v4125_v12 = vrot.slane %v4111_v40, %v9257_v32  ;;  %v8458_v34 = vrot.slane %v4110_v62, %v9257_v32  ;;  %v4134_v0 = vrot.slane %v4126_v29, %v9257_v32  ;;  %v3941_v23 = vsel %vm3930_vm5, %v3924_v37, %v5846_v47 }
 0x376   :  { %v3942_v36 = vsel %vm3930_vm5, %v3925_v53, %v5847_v28  ;;  %v5856_v13 = vunpack.i.l.bf16 %v5855_v50  ;;  %v5857_v27 = vunpack.i.h.bf16 %v5855_v50  ;;  %v4109_v40 = vrot.slane %v4095_v39, %v9257_v32 }
 0x377   :  { %v5850_v9 = vpop.permute.xlu1 %5849  ;;  %v4145_v35 = vcombine.high %v8424_v6, %v4125_v12  ;;  %v4143_v21 = vcombine.high %v8430_v55, %v8458_v34  ;;  %v4147_v29 = vcombine.high %v8447_v4, %v4134_v0  ;;  %v4144_v63 = vcombine.low %v8424_v6, %v4125_v12 }
 0x378   :  { %v5865_v3 = vpop.permute.xlu0 %5864  ;;  %v5852_v62 = vunpack.i.h.bf16 %v5850_v9  ;;  %v5851_v26 = vunpack.i.l.bf16 %v5850_v9  ;;  %v3989_v43 = vsel %vm3980_vm7, %v3972_v48, %v5841_v25  ;;  %v3990_v28 = vsel %vm3980_vm7, %v3973_v17, %v5842_v5 }
 0x379   :  { %v9331_v37 = vcombine.high %v8337_v1, %v8361_v56  ;;  %v9332_v47 = vcombine.high %v8340_v54, %v8364_v49  ;;  %v3957_v39 = vsel %vm47_vm0, %v3941_v23, %v5856_v13  ;;  %v5866_v11 = vunpack.i.l.bf16 %v5865_v3 }
 0x37a   :  { %v4006_v9 = vsel %vm3997_vm8, %v3989_v43, %v5851_v26  ;;  %v4007_v7 = vsel %vm3997_vm8, %v3990_v28, %v5852_v62  ;;  %v4263_v56 = vcombine.high %v8354_v30, %v8370_v41  ;;  %v5867_v5 = vunpack.i.h.bf16 %v5865_v3 }
 0x37b   :  { %v5953_v53 = vpack.i.bf16 %v9331_v37, %v4145_v35  ;;  %v5943_v50 = vpack.i.bf16 %v9332_v47, %v4143_v21  ;;  %v8481_v6 = vpop.permute.xlu1 %5859  ;;  %v5587_v1 = vpack.c.bf16 %v4007_v7, %v4006_v9  ;;  %v4127_v35 = vcombine.high %v4061_v61, %v8435_v42 }
 0x37c   :  { %v5875_v48 = vpop.permute.xlu0 %5874  ;;  %v5963_v12 = vpack.i.bf16 %v4283_v45, %v4147_v29  ;;  %v5948_v17 = vpack.i.bf16 %v4280_v22, %v4144_v63  ;;  %v4277_v13 = vrot.slane %v4263_v56, %v9257_v32  ;;  %v4146_v21 = vcombine.low %v8447_v4, %v4134_v0 }
 0x37d   :  { %5954 = vrot.lane.b32.xlu0 %v5953_v53, %s6099_s15  ;;  %5944 = vrot.lane.b32.xlu1 %v5943_v50, %s6094_s30  ;;  %v5876_v25 = vunpack.i.l.bf16 %v5875_v48  ;;  %v5877_v26 = vunpack.i.h.bf16 %v5875_v48  ;;  %v4141_v23 = vrot.slane %v4127_v35, %v9257_v32  ;;  %v3958_v62 = vsel %vm47_vm0, %v3942_v36, %v5857_v27 }
 0x37e   :  { %5588 = vmatprep.subr.bf16.mxu0 %v5587_v1  ;;  %v3974_v7 = vsel %vm3963_vm6, %v3957_v39, %v5866_v11  ;;  %v4285_v41 = vcombine.high %v8373_v15, %v4277_v13  ;;  %v4282_v42 = vcombine.low %v8343_v52, %v8440_v38  ;;  %v3975_v45 = vsel %vm3963_vm6, %v3958_v62, %v5867_v5 }
 0x37f   :  { %5590 = vmatpush3.bf16.msra.mxu0 %v5587_v1  ;;  %v5870_v61 = vpop.permute.xlu1 %5869  ;;  %v4149_v30 = vcombine.high %v4109_v40, %v4141_v23  ;;  %v3991_v4 = vsel %vm3980_vm7, %v3974_v7, %v5876_v25  ;;  %v3992_v11 = vsel %vm3980_vm7, %v3975_v45, %v5877_v26  ;;  %v4148_v29 = vcombine.low %v4109_v40, %v4141_v23 }
 0x380   :  { %v5885_v3 = vpop.permute.xlu0 %5884  ;;  %v5958_v27 = vpack.i.bf16 %v4282_v42, %v4146_v21  ;;  %v4284_v37 = vcombine.low %v8373_v15, %v4277_v13  ;;  %v4278_v47 = vcombine.low %v8340_v54, %v8364_v49  ;;  %v4142_v40 = vcombine.low %v8430_v55, %v8458_v34 }
 0x381   :  { %5964 = vrot.lane.b32.xlu0 %v5963_v12, %s6090_s28  ;;  %5949 = vrot.lane.b32.xlu1 %v5948_v17, %s6096_s13  ;;  %v5887_v22 = vunpack.i.h.bf16 %v5885_v3  ;;  %v5886_v0 = vunpack.i.l.bf16 %v5885_v3  ;;  %v5973_v36 = vpack.i.bf16 %v4285_v41, %v4149_v30  ;;  %v5862_v9 = vunpack.i.h.bf16 %v8481_v6 }
 0x382   :  { %v5968_v53 = vpack.i.bf16 %v4284_v37, %v4148_v29  ;;  %v5861_v48 = vunpack.i.l.bf16 %v8481_v6  ;;  %v5872_v15 = vunpack.i.h.bf16 %v5870_v61  ;;  %v5871_v56 = vunpack.i.l.bf16 %v5870_v61 }
 0x383   :  { %v4008_v63 = vsel %vm3997_vm8, %v3991_v4, %v5886_v0  ;;  %v4009_v43 = vsel %vm3997_vm8, %v3992_v11, %v5887_v22  ;;  %v5880_v28 = vpop.permute.xlu1 %5879  ;;  %v3033_v5 = vcombine.low %v8097_v57, %v8100_v58  ;;  %v9333_v17 = vcombine.low %v9281_v33, %v9280_v51 }
 0x384   :  { %v5895_v52 = vpop.permute.xlu0 %5894  ;;  %v5591_v38 = vpack.c.bf16 %v4009_v43, %v4008_v63  ;;  %v5882_v25 = vunpack.i.h.bf16 %v5880_v28  ;;  %v5881_v12 = vunpack.i.l.bf16 %v5880_v28 }
 0x385   :  { %5974 = vrot.lane.b32.xlu0 %v5973_v36, %s6087_s25  ;;  %5959 = vrot.lane.b32.xlu1 %v5958_v27, %s6102_s21  ;;  %v3911_v26 = vsel %vm3897_vm3, %v9333_v17, %v5862_v9  ;;  %v3910_v23 = vsel %vm3897_vm3, %v3033_v5, %v5861_v48  ;;  %v5897_v57 = vunpack.i.h.bf16 %v5895_v52  ;;  %v5896_v58 = vunpack.i.l.bf16 %v5895_v52 }
 0x386   :  { %5592 = vmatprep.subr.bf16.mxu0 %v5591_v38  ;;  %v3926_v7 = vsel %vm623_vm4, %v3910_v23, %v5871_v56  ;;  %v3927_v61 = vsel %vm623_vm4, %v3911_v26, %v5872_v15  ;;  %v9335_v48 = vcombine.low %v9308_v46, %v9307_v24 }
 0x387   :  { %5594 = vmatpush3.bf16.msra.mxu0 %v5591_v38  ;;  %v5890_v50 = vpop.permute.xlu1 %5889  ;;  %v3943_v51 = vsel %vm3930_vm5, %v3926_v7, %v5881_v12  ;;  %v3944_v33 = vsel %vm3930_vm5, %v3927_v61, %v5882_v25 }
 0x388   :  { %v5905_v39 = vpop.permute.xlu0 %5904  ;;  %v5892_v13 = vunpack.i.h.bf16 %v5890_v50  ;;  %v5891_v21 = vunpack.i.l.bf16 %v5890_v50 }
 0x389   :  { %5969 = vrot.lane.b32.xlu1 %v5968_v53, %s6089_s27  ;;  %v5907_v45 = vunpack.i.h.bf16 %v5905_v39  ;;  %v5906_v4 = vunpack.i.l.bf16 %v5905_v39  ;;  %v9334_v39 = vcombine.low %v9310_v20, %v9309_v60 }
 0x38a   :  { %v3959_v22 = vsel %vm47_vm0, %v3943_v51, %v5891_v21  ;;  %v3960_v0 = vsel %vm47_vm0, %v3944_v33, %v5892_v13  ;;  %v726_v51 = vsel %vm623_vm4, %v8349_v2, 0.0  ;;  %v732_v33 = vsel %vm623_vm4, %v8409_v31, 0.0 }
 0x38b   :  { %v5900_v1 = vpop.permute.xlu1 %5899  ;;  %v3913_v9 = vsel %vm3897_vm3, %v9334_v39, %v5897_v57  ;;  %v744_v2 = vsel %vm623_vm4, %v8278_v19, 0.0  ;;  %v735_v31 = vsel %vm623_vm4, %v8389_v59, 0.0 }
 0x38c   :  { %v5915_v35 = vpop.permute.xlu0 %5914  ;;  %v5902_v3 = vunpack.i.h.bf16 %v5900_v1  ;;  %v5901_v30 = vunpack.i.l.bf16 %v5900_v1  ;;  %v3912_v1 = vsel %vm3897_vm3, %v9335_v48, %v5896_v58  ;;  %v3929_v5 = vsel %vm623_vm4, %v3913_v9, %v5907_v45 }
 0x38d   :  { %v5917_v11 = vunpack.i.h.bf16 %v5915_v35  ;;  %v5916_v36 = vunpack.i.l.bf16 %v5915_v35  ;;  %v3928_v56 = vsel %vm623_vm4, %v3912_v1, %v5906_v4  ;;  %v720_v45 = vsel %vm623_vm4, %v8345_v44, 0.0 }
 0x38e   :  { %v3976_v63 = vsel %vm3963_vm6, %v3959_v22, %v5901_v30  ;;  %v3977_v43 = vsel %vm3963_vm6, %v3960_v0, %v5902_v3  ;;  %v738_v4 = vsel %vm623_vm4, %v8416_v10, 0.0  ;;  %v750_v44 = vsel %vm623_vm4, %v8283_v8, 0.0  ;;  %v9336_v22 = vld [vmem:[#allocation7_spill] sm:$0xff]  ;;  %v9337_v0 = vld [vmem:[#allocation8_spill] sm:$0xff] }
 0x38f   :  { %v5910_v62 = vpop.permute.xlu1 %5909  ;;  %v3945_v60 = vsel %vm3930_vm5, %v3928_v56, %v5916_v36  ;;  %v3946_v20 = vsel %vm3930_vm5, %v3929_v5, %v5917_v11  ;;  %v741_v10 = vsel %vm623_vm4, %v8381_v18, 0.0  ;;  %v747_v19 = vsel %vm623_vm4, %v9337_v0, 0.0  ;;  %v9338_v11 = vld [vmem:[#allocation64_spill] sm:$0xff] }
 0x390   :  { %v5925_v6 = vpop.permute.xlu0 %5924  ;;  %v5912_v41 = vunpack.i.h.bf16 %v5910_v62  ;;  %v5911_v42 = vunpack.i.l.bf16 %v5910_v62  ;;  %v762_v59 = vsel %vm623_vm4, %v9338_v11, 0.0  ;;  %v9339_v36 = vld [vmem:[#allocation12_spill] sm:$0xff] }
 0x391   :  { %v5927_v53 = vunpack.i.h.bf16 %v5925_v6  ;;  %v5926_v50 = vunpack.i.l.bf16 %v5925_v6  ;;  %v753_v8 = vsel %vm623_vm4, %v9339_v36, 0.0 }
 0x392   :  { %v3993_v38 = vsel %vm3980_vm7, %v3976_v63, %v5911_v42  ;;  %v3994_v37 = vsel %vm3980_vm7, %v3977_v43, %v5912_v41  ;;  %v723_v42 = vsel %vm623_vm4, %v8366_v14, 0.0  ;;  %v729_v14 = vsel %vm623_vm4, %v8375_v16, 0.0 }
 0x393   :  { %v5920_v27 = vpop.permute.xlu1 %5919  ;;  %v3961_v24 = vsel %vm47_vm0, %v3945_v60, %v5926_v50  ;;  %v3962_v46 = vsel %vm47_vm0, %v3946_v20, %v5927_v53  ;;  %v756_v16 = vsel %vm623_vm4, %v9336_v22, 0.0 }
 0x394   :  { %v5935_v29 = vpop.permute.xlu0 %5934  ;;  %v5922_v28 = vunpack.i.h.bf16 %v5920_v27  ;;  %v5921_v52 = vunpack.i.l.bf16 %v5920_v27  ;;  %v9340_v27 = vld [vmem:[#allocation39_spill] sm:$0xff] }
 0x395   :  { %v5937_v13 = vunpack.i.h.bf16 %v5935_v29  ;;  %v5936_v21 = vunpack.i.l.bf16 %v5935_v29  ;;  %v759_v18 = vsel %vm623_vm4, %v9340_v27, 0.0  ;;  %v9341_v29 = vld [vmem:[#allocation5_spill] sm:$0xff] }
 0x396   :  { %v4010_v35 = vsel %vm3997_vm8, %v3993_v38, %v5921_v52  ;;  %v4011_v15 = vsel %vm3997_vm8, %v3994_v37, %v5922_v28  ;;  %v765_v63 = vsel %vm623_vm4, %v9341_v29, 0.0 }
 0x397   :  { %v5930_v25 = vpop.permute.xlu1 %5929  ;;  %v5595_v17 = vpack.c.bf16 %v4011_v15, %v4010_v35 }
 0x398   :  { %v5940_v12 = vpop.permute.xlu0 %5939  ;;  %v5932_v26 = vunpack.i.h.bf16 %v5930_v25  ;;  %v5931_v23 = vunpack.i.l.bf16 %v5930_v25 }
 0x399   :  { %5596 = vmatprep.subr.bf16.mxu0 %v5595_v17  ;;  %v5942_v7 = vunpack.i.h.bf16 %v5940_v12  ;;  %v5941_v61 = vunpack.i.l.bf16 %v5940_v12 }
 0x39a   :  { %v3978_v62 = vsel %vm3963_vm6, %v3961_v24, %v5931_v23  ;;  %v3979_v6 = vsel %vm3963_vm6, %v3962_v46, %v5932_v26  ;;  %5598 = vmatpush3.bf16.msra.mxu0 %v5595_v17 }
 0x39b   :  { %v3995_v3 = vsel %vm3980_vm7, %v3978_v62, %v5936_v21  ;;  %v3996_v30 = vsel %vm3980_vm7, %v3979_v6, %v5937_v13 }
 0x39c   :  { %v4012_v57 = vsel %vm3997_vm8, %v3995_v3, %v5941_v61  ;;  %v4013_v58 = vsel %vm3997_vm8, %v3996_v30, %v5942_v7 }
 0x39d   :  { %v5599_v41 = vpack.c.bf16 %v4013_v58, %v4012_v57 }
 0x39f   :  { %5600 = vmatprep.subr.bf16.mxu0 %v5599_v41 }
 0x3a0   :  { %5602 = vmatpush3.bf16.msra.mxu0 %v5599_v41 }
 0x3a4   :  { %724 = vadd.xlane.f32.xlu0 %v723_v42 }
 0x3a8   :  { %727 = vadd.xlane.f32.xlu0 %v726_v51 }
 0x3ac   :  { %733 = vadd.xlane.f32.xlu0 %v732_v33 }
 0x3ad   :  { %721 = vadd.xlane.f32.xlu1 %v720_v45 }
 0x3b0   :  { %739 = vadd.xlane.f32.xlu0 %v738_v4 }
 0x3b1   :  { %730 = vadd.xlane.f32.xlu1 %v729_v14 }
 0x3b4   :  { %745 = vadd.xlane.f32.xlu0 %v744_v2 }
 0x3b5   :  { %736 = vadd.xlane.f32.xlu1 %v735_v31 }
 0x3b8   :  { %751 = vadd.xlane.f32.xlu0 %v750_v44 }
 0x3b9   :  { %742 = vadd.xlane.f32.xlu1 %v741_v10 }
 0x3bc   :  { %757 = vadd.xlane.f32.xlu0 %v756_v16 }
 0x3bd   :  { %748 = vadd.xlane.f32.xlu1 %v747_v19 }
 0x3c0   :  { %763 = vadd.xlane.f32.xlu0 %v762_v59 }
 0x3c1   :  { %754 = vadd.xlane.f32.xlu1 %v753_v8 }
 0x3c5   :  { %760 = vadd.xlane.f32.xlu1 %v759_v18 }
 0x3c9   :  { %766 = vadd.xlane.f32.xlu1 %v765_v63 }
 0x3ef   :  { %v5945_v43 = vpop.permute.xlu1 %5944  ;;  %v5955_v28 = vpop.permute.xlu0 %5954 }
 0x3f0   :  { %v5947_v52 = vunpack.i.h.bf16 %v5945_v43  ;;  %v5946_v38 = vunpack.i.l.bf16 %v5945_v43  ;;  %v5957_v15 = vunpack.i.h.bf16 %v5955_v28  ;;  %v5956_v56 = vunpack.i.l.bf16 %v5955_v28 }
 0x3f2   :  { %v4343_v9 = vsel %vm623_vm4, %v4278_v47, %v5947_v52  ;;  %v4342_v48 = vsel %vm623_vm4, %v4142_v40, %v5946_v38 }
 0x3f3   :  { %v5950_v37 = vpop.permute.xlu1 %5949  ;;  %v5965_v39 = vpop.permute.xlu0 %5964 }
 0x3f4   :  { %v5952_v53 = vunpack.i.h.bf16 %v5950_v37  ;;  %v5951_v50 = vunpack.i.l.bf16 %v5950_v37  ;;  %v5967_v34 = vunpack.i.h.bf16 %v5965_v39  ;;  %v5966_v40 = vunpack.i.l.bf16 %v5965_v39 }
 0x3f6   :  { %v4344_v1 = vsel %vm47_vm0, %v4342_v48, %v5951_v50  ;;  %v4345_v35 = vsel %vm47_vm0, %v4343_v9, %v5952_v53  ;;  %v9342_v9 = vld [vmem:[#allocation19_spill] sm:$0xff] }
 0x3f7   :  { %v5960_v5 = vpop.permute.xlu1 %5959  ;;  %v4346_v17 = vsel %vm3980_vm7, %v4344_v1, %v5956_v56  ;;  %v4347_v54 = vsel %vm3980_vm7, %v4345_v35, %v5957_v15  ;;  %v5975_v55 = vpop.permute.xlu0 %5974 }
 0x3f8   :  { %v5962_v25 = vunpack.i.h.bf16 %v5960_v5  ;;  %v5961_v12 = vunpack.i.l.bf16 %v5960_v5  ;;  %v5977_v23 = vunpack.i.h.bf16 %v5975_v55  ;;  %v5976_v24 = vunpack.i.l.bf16 %v5975_v55 }
 0x3fa   :  { %v4348_v49 = vsel %vm137_vm2, %v4346_v17, %v5961_v12  ;;  %v4349_v47 = vsel %vm137_vm2, %v4347_v54, %v5962_v25 }
 0x3fb   :  { %v5970_v60 = vpop.permute.xlu1 %5969  ;;  %v4351_v46 = vsel %vm4350_vm9, %v4348_v49, %v5966_v40  ;;  %v4352_v13 = vsel %vm4350_vm9, %v4349_v47, %v5967_v34 }
 0x3fc   :  { %v5972_v20 = vunpack.i.h.bf16 %v5970_v60  ;;  %v5971_v26 = vunpack.i.l.bf16 %v5970_v60 }
 0x3fe   :  { %v4354_v21 = vsel %vm4353_vm10, %v4351_v46, %v5971_v26  ;;  %v4355_v62 = vsel %vm4353_vm10, %v4352_v13, %v5972_v20 }
 0x3ff   :  { %v4357_v6 = vsel %vm4356_vm11, %v4354_v21, %v5976_v24  ;;  %v4358_v7 = vsel %vm4356_vm11, %v4355_v62, %v5977_v23 }
 0x400   :  { %5489 = vmatprep.mubr.f32.mxu0 %v4357_v6 }
 0x401   :  { %5490 = vmatmul.mubr.f32.vlgmr.msra.gmra.mrb[2].mxu0 %v4358_v7 }
 0x431   :  { %v725_v61 = vpop.xlane.xlu0 %724 }
 0x432   :  { %6014 = vrcp.f32 %v725_v61 }
 0x435   :  { %v728_v3 = vpop.xlane.xlu0 %727 }
 0x436   :  { %6016 = vrcp.f32 %v728_v3 }
 0x439   :  { %v734_v30 = vpop.xlane.xlu0 %733 }
 0x43a   :  { %v722_v57 = vpop.xlane.xlu1 %721  ;;  %6018 = vrcp.f32 %v734_v30 }
 0x43b   :  { %6020 = vrcp.f32 %v722_v57 }
 0x43c   :  { %v8597_v44 = vpop.eup %6014 }
 0x43d   :  { %v740_v58 = vpop.xlane.xlu0 %739 }
 0x43e   :  { %v731_v41 = vpop.xlane.xlu1 %730  ;;  %6022 = vrcp.f32 %v740_v58 }
 0x43f   :  { %6024 = vrcp.f32 %v731_v41 }
 0x440   :  { %v8599_v10 = vpop.eup %6016 }
 0x441   :  { %v746_v42 = vpop.xlane.xlu0 %745 }
 0x442   :  { %v737_v51 = vpop.xlane.xlu1 %736 }
 0x443   :  { %6026 = vrcp.f32 %v737_v51 }
 0x444   :  { %v8601_v16 = vpop.eup %6018 }
 0x445   :  { %v752_v33 = vpop.xlane.xlu0 %751  ;;  %v8603_v0 = vpop.eup %6020 }
 0x446   :  { %v743_v45 = vpop.xlane.xlu1 %742  ;;  %v4466_v53 = vcombine.low %v8603_v0, %v8599_v10 }
 0x447   :  { %6028 = vrcp.f32 %v743_v45  ;;  %v4467_v45 = vcombine.high %v8603_v0, %v8599_v10 }
 0x448   :  { %v8605_v19 = vpop.eup %6022  ;;  %v4474_v49 = vrot.slane %v4466_v53, %v9342_v9 }
 0x449   :  { %v758_v4 = vpop.xlane.xlu0 %757  ;;  %v6025_v11 = vpop.eup %6024  ;;  %v4498_v38 = vcombine.low %v8601_v16, %v8605_v19  ;;  %v4499_v47 = vcombine.high %v8601_v16, %v8605_v19 }
 0x44a   :  { %v749_v14 = vpop.xlane.xlu1 %748  ;;  %v4482_v37 = vcombine.low %v8597_v44, %v6025_v11  ;;  %v4483_v24 = vcombine.high %v8597_v44, %v6025_v11 }
 0x44b   :  { %v4506_v25 = vrot.slane %v4498_v38, %v9342_v9  ;;  %v4513_v11 = vrot.slane %v4499_v47, %v9342_v9  ;;  %v4831_v47 = vld [vmem:[%s8797_s5] sm:$0xff] }
 0x44c   :  { %v4490_v5 = vrot.slane %v4482_v37, %v9342_v9  ;;  %v4497_v19 = vrot.slane %v4483_v24, %v9342_v9  ;;  %v4836_v24 = vld [vmem:[%s8797_s5 + $0x28] sm:$0xff] }
 0x44d   :  { %v764_v31 = vpop.xlane.xlu0 %763  ;;  %v6027_v36 = vpop.eup %6026 }
 0x44e   :  { %v755_v2 = vpop.xlane.xlu1 %754  ;;  %v4530_v21 = vcombine.low %v4474_v49, %v4490_v5  ;;  %v4531_v3 = vcombine.high %v4474_v49, %v4490_v5 }
 0x44f   :  { %6030 = vrcp.f32 %v755_v2 }
 0x450   :  { %6032 = vrcp.f32 %v752_v33  ;;  %v8642_v2 = vrot.slane %v4530_v21, %v9257_v32  ;;  %v4545_v0 = vrot.slane %v4531_v3, %v9257_v32  ;;  %v4838_v21 = vld [vmem:[%s8797_s5 + $0x38] sm:$0xff] }
 0x451   :  { %6034 = vrcp.f32 %v749_v14  ;;  %v6029_v8 = vpop.eup %6028 }
 0x452   :  { %6036 = vrcp.f32 %v746_v42  ;;  %v761_v22 = vpop.xlane.xlu1 %760  ;;  %v4514_v63 = vcombine.low %v6027_v36, %v6029_v8  ;;  %v4515_v13 = vcombine.high %v6027_v36, %v6029_v8  ;;  %v4481_v8 = vrot.slane %v4467_v45, %v9342_v9 }
 0x453   :  { %6038 = vrcp.f32 %v764_v31 }
 0x454   :  { %6040 = vrcp.f32 %v758_v4  ;;  %v4522_v48 = vrot.slane %v4514_v63, %v9342_v9  ;;  %v4529_v14 = vrot.slane %v4515_v13, %v9342_v9  ;;  %v4837_v13 = vld [vmem:[%s8797_s5 + $0x30] sm:$0xff] }
 0x455   :  { %6042 = vrcp.f32 %v761_v22 }
 0x456   :  { %v767_v59 = vpop.xlane.xlu1 %766  ;;  %v4562_v40 = vcombine.low %v4506_v25, %v4522_v48  ;;  %v4563_v7 = vcombine.high %v4506_v25, %v4522_v48  ;;  %v4578_v63 = vcombine.low %v4513_v11, %v4529_v14  ;;  %v4579_v48 = vcombine.high %v4513_v11, %v4529_v14 }
 0x457   :  { %6044 = vrcp.f32 %v767_v59 }
 0x458   :  { %v8627_v58 = vrot.slane %v4562_v40, %v9257_v32  ;;  %v4577_v22 = vrot.slane %v4563_v7, %v9257_v32  ;;  %v4586_v37 = vrot.slane %v4578_v63, %v9257_v32  ;;  %v4593_v25 = vrot.slane %v4579_v48, %v9257_v32  ;;  %v4921_v7 = vld [vmem:[%s8798_s6 + $0x8] sm:$0xff] }
 0x459   :  { %v6031_v27 = vpop.eup %6030 }
 0x45a   :  { %v6033_v18 = vpop.eup %6032  ;;  %v4594_v36 = vcombine.low %v8642_v2, %v8627_v58  ;;  %v4597_v38 = vcombine.high %v4545_v0, %v4577_v22 }
 0x45b   :  { %v6035_v29 = vpop.eup %6034 }
 0x45c   :  { %v6037_v43 = vpop.eup %6036  ;;  %v4618_v28 = vcombine.low %v6035_v29, %v6031_v27  ;;  %v4619_v34 = vcombine.high %v6035_v29, %v6031_v27 }
 0x45d   :  { %v6039_v52 = vpop.eup %6038  ;;  %v4602_v50 = vcombine.low %v6037_v43, %v6033_v18  ;;  %v4603_v46 = vcombine.high %v6037_v43, %v6033_v18  ;;  %v4596_v18 = vcombine.low %v4545_v0, %v4577_v22 }
 0x45e   :  { %v6041_v39 = vpop.eup %6040  ;;  %v4626_v15 = vrot.slane %v4618_v28, %v9342_v9  ;;  %v4633_v30 = vrot.slane %v4619_v34, %v9342_v9  ;;  %v4546_v28 = vcombine.low %v4481_v8, %v4497_v19  ;;  %v4833_v34 = vld [vmem:[%s8797_s5 + $0x10] sm:$0xff] }
 0x45f   :  { %v6043_v1 = vpop.eup %6042  ;;  %v4634_v35 = vcombine.low %v6041_v39, %v6039_v52  ;;  %v4610_v54 = vrot.slane %v4602_v50, %v9342_v9  ;;  %v4635_v55 = vcombine.high %v6041_v39, %v6039_v52  ;;  %v4617_v4 = vrot.slane %v4603_v46, %v9342_v9 }
 0x460   :  { %v4554_v53 = vrot.slane %v4546_v28, %v9257_v32  ;;  %v5352_v28 = vld [vmem:[%s8796_s4] ss:$0 sm:$0xff] }
 0x461   :  { %v6045_v56 = vpop.eup %6044  ;;  %v4642_v60 = vrot.slane %v4634_v35, %v9342_v9  ;;  %v4667_v26 = vcombine.high %v4610_v54, %v4626_v15  ;;  %v4666_v23 = vcombine.low %v4610_v54, %v4626_v15  ;;  %v4649_v57 = vrot.slane %v4635_v55, %v9342_v9  ;;  %v4832_v55 = vld [vmem:[%s8797_s5 + $0x8] sm:$0xff] }
 0x462   :  { %v4650_v12 = vcombine.low %v6043_v1, %v6045_v56  ;;  %v4651_v17 = vcombine.high %v6043_v1, %v6045_v56  ;;  %v4682_v59 = vcombine.low %v4617_v4, %v4633_v30  ;;  %v4598_v39 = vcombine.low %v4554_v53, %v4586_v37 }
 0x463   :  { %v4681_v41 = vrot.slane %v4667_v26, %v9257_v32  ;;  %v8632_v51 = vrot.slane %v4666_v23, %v9257_v32  ;;  %v4683_v1 = vcombine.high %v4617_v4, %v4633_v30  ;;  %v4547_v35 = vcombine.high %v4481_v8, %v4497_v19  ;;  %v4835_v23 = vld [vmem:[%s8797_s5 + $0x20] sm:$0xff] }
 0x464   :  { %v4658_v20 = vrot.slane %v4650_v12, %v9342_v9  ;;  %v4665_v61 = vrot.slane %v4651_v17, %v9342_v9  ;;  %v4690_v43 = vrot.slane %v4682_v59, %v9257_v32  ;;  %v4595_v15 = vcombine.high %v8642_v2, %v8627_v58 }
 0x465   :  { %v4599_v56 = vcombine.high %v4554_v53, %v4586_v37  ;;  %v4697_v12 = vrot.slane %v4683_v1, %v9257_v32  ;;  %v4561_v17 = vrot.slane %v4547_v35, %v9257_v32  ;;  %v5611_v46 = vpack.c.bf16 %v4836_v24, %v4835_v23  ;;  %v9343_v24 = vld [vmem:[#allocation6_spill] sm:$0xff] }
 0x466   :  { %v4699_v62 = vcombine.high %v4642_v60, %v4658_v20  ;;  %v4698_v6 = vcombine.low %v4642_v60, %v4658_v20  ;;  %v4714_v16 = vcombine.low %v4649_v57, %v4665_v61  ;;  %v4715_v9 = vcombine.high %v4649_v57, %v4665_v61  ;;  %v4834_v20 = vld [vmem:[%s8797_s5 + $0x18] sm:$0xff] }
 0x467   :  { %v4600_v49 = vcombine.low %v4561_v17, %v4593_v25  ;;  %v5603_v60 = vpack.c.bf16 %v4832_v55, %v4831_v47  ;;  %v5607_v26 = vpack.c.bf16 %v4834_v20, %v4833_v34  ;;  %v6103_v55 = vmov 1  }
 0x468   :  { %v4713_v42 = vrot.slane %v4699_v62, %v9257_v32  ;;  %v8635_v33 = vrot.slane %v4698_v6, %v9257_v32  ;;  %v4722_v29 = vrot.slane %v4714_v16, %v9257_v32  ;;  %v4729_v5 = vrot.slane %v4715_v9, %v9257_v32  ;;  %v4920_v6 = vld [vmem:[%s8798_s6] sm:$0xff]  ;;  %5978 = vset.pattern.permute.xlu0 %v6103_v55 }
 0x469   :  { %v4601_v32 = vcombine.high %v4561_v17, %v4593_v25  ;;  %5604 = vmatprep.subr.bf16.mxu1 %v5603_v60  ;;  %v5615_v62 = vpack.c.bf16 %v4838_v21, %v4837_v13  ;;  %v5619_v61 = vpack.c.bf16 %v4921_v7, %v4920_v6  ;;  %v4922_v25 = vld [vmem:[%s8798_s6 + $0x10] sm:$0xff]  ;;  %5979 = vset.pattern.permute.xlu1 %v6103_v55 }
 0x46a   :  { %v4732_v31 = vcombine.low %v4681_v41, %v4713_v42  ;;  %v4731_v44 = vcombine.high %v8632_v51, %v8635_v33  ;;  %v4730_v10 = vcombine.low %v8632_v51, %v8635_v33  ;;  %v4733_v27 = vcombine.high %v4681_v41, %v4713_v42  ;;  %5606 = vmatpush3.bf16.msra.mxu1 %v5603_v60 }
 0x46b   :  { %v4734_v52 = vcombine.low %v4690_v43, %v4722_v29  ;;  %v4735_v50 = vcombine.high %v4690_v43, %v4722_v29  ;;  %v4736_v54 = vcombine.low %v4697_v12, %v4729_v5  ;;  %v4737_v40 = vcombine.high %v4697_v12, %v4729_v5  ;;  %5608 = vmatprep.subr.bf16.mxu1 %v5607_v26  ;;  %v4923_v12 = vld [vmem:[%s8798_s6 + $0x18] sm:$0xff] }
 0x46c   :  { %4750 = vrot.lane.b32.xlu0 %v4732_v31, %s6094_s30  ;;  %4742 = vrot.lane.b32.xlu1 %v4731_v44, %s6095_s12  ;;  %v5623_v47 = vpack.c.bf16 %v4923_v12, %v4922_v25 }
 0x46e   :  { %5610 = vmatpush3.bf16.msra.mxu1 %v5607_v26 }
 0x46f   :  { %5612 = vmatprep.subr.bf16.mxu1 %v5611_v46 }
 0x470   :  { %4758 = vrot.lane.b32.xlu0 %v4733_v27, %s6097_s2  ;;  %4748 = vrot.lane.b32.xlu1 %v4596_v18, %s6094_s30 }
 0x472   :  { %5614 = vmatpush3.bf16.msra.mxu1 %v5611_v46 }
 0x473   :  { %5616 = vmatprep.subr.bf16.mxu1 %v5615_v62 }
 0x474   :  { %4766 = vrot.lane.b32.xlu0 %v4734_v52, %s6096_s13  ;;  %4756 = vrot.lane.b32.xlu1 %v4597_v38, %s6097_s2 }
 0x476   :  { %5618 = vmatpush3.bf16.msra.mxu1 %v5615_v62 }
 0x477   :  { %5620 = vmatprep.subr.bf16.mxu1 %v5619_v61 }
 0x478   :  { %4774 = vrot.lane.b32.xlu0 %v4735_v50, %s6098_s14  ;;  %4764 = vrot.lane.b32.xlu1 %v4598_v39, %s6096_s13 }
 0x47c   :  { %4740 = vrot.lane.b32.xlu0 %v4595_v15, %s6095_s12  ;;  %4772 = vrot.lane.b32.xlu1 %v4599_v56, %s6098_s14 }
 0x480   :  { %4782 = vrot.lane.b32.xlu0 %v4736_v54, %s6099_s15  ;;  %4780 = vrot.lane.b32.xlu1 %v4600_v49, %s6099_s15 }
 0x484   :  { %4790 = vrot.lane.b32.xlu0 %v4737_v40, %s6100_s16  ;;  %4788 = vrot.lane.b32.xlu1 %v4601_v32, %s6100_s16  ;;  %s6106_s16 = smov [#allocation2]  }
 0x485   :  { %s5339_s17 = sshll.u32 %s6106_s16, 4  ;;  %s5340_s17 = int_to_ptr.vmem [resolvable:$true] %s5339_s17 }
 0x486   :  { %s6060_s18 = scalar_lea.vmem %s5340_s17, 32  ;;  %p6065_p1 = scmp.lt.s32.totalorder %s5340_s17, %s5340_s17 }
 0x487   :  { %p6061_p0 = scmp.ne.s32.totalorder %s5340_s17, %s6060_s18  ;;  %p6066_p2 = scmp.lt.s32.totalorder %s6060_s18, %s6060_s18 }
 0x489   :  { %p6067_p3 = por %p6066_p2, %p6065_p1 }
 0x48b   :  { %p6068_p4 = pnand %p6067_p3, %p6061_p0 }
 0x4d4   :  { %v5491_v3 = vpop.f32.mrb[2].mxu0 }
 0x4d5   :  { %v4425_v30 = vpop.f32.mrb[3].mxu0 }
 0x4de   :  { %v4751_v57 = vpop.permute.xlu0 %4750  ;;  %v4743_v41 = vpop.permute.xlu1 %4742 }
 0x4df   :  { %v4795_v19 = vsel %vm3897_vm3, %v4730_v10, %v4743_v41 }
 0x4e0   :  { %v4797_v8 = vsel %vm623_vm4, %v4795_v19, %v4751_v57 }
 0x4e2   :  { %v4759_v42 = vpop.permute.xlu0 %4758  ;;  %v4749_v45 = vpop.permute.xlu1 %4748 }
 0x4e3   :  { %v4799_v63 = vsel %vm3930_vm5, %v4797_v8, %v4759_v42  ;;  %v6059_v42 = vld [vmem:[%s8792_s0 + $0x8] sm:$0xff] }
 0x4e6   :  { %v4767_v4 = vpop.permute.xlu0 %4766  ;;  %v4757_v14 = vpop.permute.xlu1 %4756 }
 0x4e7   :  { %v4801_v33 = vsel %vm47_vm0, %v4799_v63, %v4767_v4  ;;  %v5248_v63 = vld [vmem:[%s8801_s9 + $0x8] sm:$0xff] }
 0x4ea   :  { %v4775_v31 = vpop.permute.xlu0 %4774  ;;  %v4765_v44 = vpop.permute.xlu1 %4764 }
 0x4eb   :  { %v4803_v58 = vsel %vm3963_vm6, %v4801_v33, %v4775_v31 }
 0x4ee   :  { %v4741_v22 = vpop.permute.xlu0 %4740  ;;  %v4773_v16 = vpop.permute.xlu1 %4772 }
 0x4ef   :  { %v4794_v11 = vsel %vm3897_vm3, %v4594_v36, %v4741_v22 }
 0x4f0   :  { %v4796_v0 = vsel %vm623_vm4, %v4794_v11, %v4749_v45 }
 0x4f1   :  { %v4798_v59 = vsel %vm3930_vm5, %v4796_v0, %v4757_v14 }
 0x4f2   :  { %v4800_v27 = vsel %vm47_vm0, %v4798_v59, %v4765_v44  ;;  %v4783_v18 = vpop.permute.xlu0 %4782  ;;  %v4781_v29 = vpop.permute.xlu1 %4780 }
 0x4f3   :  { %v4802_v51 = vsel %vm3963_vm6, %v4800_v27, %v4773_v16  ;;  %v4805_v2 = vsel %vm3980_vm7, %v4803_v58, %v4783_v18  ;;  %v6104_v27 = vmov 0.0|0.0   ;;  %v9344_v18 = vmov 0.0   ;;  %v5250_v58 = vld [vmem:[%s8801_s9 + $0x18] sm:$0xff] }
 0x4f4   :  { %v4804_v10 = vsel %vm3980_vm7, %v4802_v51, %v4781_v29  ;;  %5634 = vmatprep.subr.bf16.mxu0 %v6104_v27  ;;  %5544 = vmatprep.mubr.msk.f32.mxu0 %vm6105_vm14, %v9344_v18  ;;  %v5247_v29 = vld [vmem:[%s8801_s9] sm:$0xff]  ;;  %v5249_v51 = vld [vmem:[%s8801_s9 + $0x10] sm:$0xff] }
 0x4f5   :  { %v5635_v33 = vpack.c.bf16 %v5248_v63, %v5247_v29 }
 0x4f6   :  { %v4791_v36 = vpop.permute.xlu0 %4790  ;;  %v4789_v43 = vpop.permute.xlu1 %4788 }
 0x4f7   :  { %v4807_v52 = vsel %vm3997_vm8, %v4805_v2, %v4791_v36  ;;  %v4806_v38 = vsel %vm3997_vm8, %v4804_v10, %v4789_v43  ;;  %5636 = vmatpush3.bf16.msra.mxu0 %v5635_v33  ;;  %v5638_v2 = vpack.c.bf16 %v5250_v58, %v5249_v51 }
 0x4f8   :  { %v4809_v37 = vmul.f32 %v5491_v3, %v4807_v52  ;;  %v4808_v53 = vmul.f32 %v4806_v38, %v4425_v30  ;;  %v6058_v30 = vld [vmem:[%s8792_s0] sm:$0xff]  ;;  %5637 = vmatprep.subr.bf16.mxu0 %v6104_v27 }
 0x4f9   :  { %v5361_v52 = vld [vmem:[%s8799_s7] ss:$0 sm:$0xff] }
 0x4fa   :  { %v4818_v50 = vadd.f32 %v5352_v28, %v4809_v37  ;;  %v4817_v39 = vadd.f32 %v5352_v28, %v4808_v53 }
 0x4fb   :  { %5639 = vmatpush3.bf16.msra.mxu0 %v5638_v2 }
 0x4fc   :  { %v4822_v9 = vmin.f32 %v4818_v50, 0.0  ;;  %v4821_v48 = vmin.f32 %v4817_v39, 0.0  ;;  %vm4820_vm12 = vcmp.gt.f32.partialorder %v4818_v50, 0.0  ;;  %vm4819_vm13 = vcmp.gt.f32.partialorder %v4817_v39, 0.0 }
 0x4fe   :  { %v4825_v1 = vmul.f32 1.442695, %v4822_v9  ;;  %v4823_v35 = vmul.f32 1.442695, %v4821_v48 }
 0x500   :  { %6046 = vpow2.f32 %v4825_v1  ;;  %v5173_v1 = vld [vmem:[%s8800_s8] sm:$0x3] }
 0x501   :  { %6048 = vpow2.f32 %v4823_v35 }
 0x50a   :  { %v6047_v15 = vpop.eup %6046 }
 0x50b   :  { %v6049_v56 = vpop.eup %6048  ;;  %v5354_v5 = vadd.f32 -1.0, %v6047_v15 }
 0x50c   :  { %v5353_v17 = vadd.f32 -1.0, %v6049_v56  ;;  %v5363_v56 = vld [vmem:[%s8802_s10] ss:$0 sm:$0xff] }
 0x50d   :  { %v4830_v54 = vsel %vm4820_vm12, %v4818_v50, %v5354_v5 }
 0x50e   :  { %v4829_v49 = vsel %vm4819_vm13, %v4817_v39, %v5353_v17 }
 0x50f   :  { %5508 = vmatprep.mubr.msk.f32.mxu1 %vm137_vm2, %v4829_v49 }
 0x510   :  { %5509 = vmatmul.mubr.msk.f32.vlgmr.msra.gmra.mrb[2].mxu1 %vm137_vm2, %v4830_v54 }
 0x511   :  { %5622 = vmatpush3.bf16.msra.mxu1 %v5619_v61 }
 0x512   :  { %5624 = vmatprep.subr.bf16.mxu1 %v5623_v47 }
 0x515   :  { %5626 = vmatpush3.bf16.msra.mxu1 %v5623_v47 }
 0x5e3   :  { %v5510_v34 = vpop.f32.mrb[2].mxu1 }
 0x5e4   :  { %v4911_v40 = vpop.f32.mrb[3].mxu1 }
 0x5e5   :  { %v5627_v32 = vpack.c.bf16 %v5510_v34, %v4911_v40  ;;  %5519 = vmatprep.mubr.msk.f32.mxu1 %vm47_vm0, %v4911_v40 }
 0x5e6   :  { %5520 = vmatmul.mubr.msk.f32.vlgmr.msra.gmra.mrb[4].mxu1 %vm47_vm0, %v5510_v34 }
 0x5e7   :  { %5628 = vmatprep.subr.bf16.mxu1 %v5627_v32 }
 0x5e8   :  { %5630 = vmatpush3.bf16.msra.mxu1 %v5627_v32 }
 0x5e9   :  { %5631 = vmatprep.subr.bf16.mxu1 %v6104_v27 }
 0x6b9   :  { %v5521_v60 = vpop.f32.mrb[4].mxu1 }
 0x6ba   :  { %5044 = vperm.xlu0 %5978, %v5521_v60   ;;  %v4996_v20 = vpop.f32.mrb[5].mxu1 }
 0x6bb   :  { %5039 = vperm.xlu1 %5979, %v4996_v20  }
 0x6e4   :  { %5005 = vxpose.xlu1.b32.start [1/2] (short) (narrow) %v4996_v20, 8 }
 0x6e8   :  { %5006 = vxpose.xlu1.b32.end [2/2] (short) (narrow) %v5521_v60, 8 }
 0x739   :  { %v5045_v13 = vpop.permute.xlu0 %5044 }
 0x73a   :  { %v5040_v26 = vpop.permute.xlu1 %5039 }
 0x764   :  { %v5021_v23 = vpop.trf.xlu1 }
 0x765   :  { %v5050_v46 = vrot.slane %v5021_v23, %v9343_v24 }
 0x767   :  { %v5051_v21 = vadd.f32 %v5050_v46, %v5040_v26  ;;  %v5052_v62 = vadd.f32 %v5050_v46, %v5045_v13 }
 0x769   :  { %v5053_v6 = vmul.f32 0.2, %v5051_v21  ;;  %v5054_v7 = vmul.f32 0.2, %v5052_v62 }
 0x76b   :  { %v5055_v61 = vmax.f32 %v5051_v21, %v5053_v6  ;;  %v5056_v3 = vmax.f32 %v5052_v62, %v5054_v7 }
 0x76d   :  { %v5057_v57 = vadd.f32 %v6058_v30, %v5055_v61  ;;  %v5058_v45 = vadd.f32 %v6059_v42, %v5056_v3 }
 0x76f   :  { %v5059_v41 = vsel %vm623_vm4, %v5057_v57, -inf  ;;  %v5062_v4 = vsel %vm623_vm4, %v5058_v45, -inf }
 0x770   :  { %5060 = vmax.xlane.f32.xlu0 %v5059_v41 }
 0x774   :  { %5063 = vmax.xlane.f32.xlu0 %v5062_v4 }
 0x7fd   :  { %v5061_v14 = vpop.xlane.xlu0 %5060 }
 0x7fe   :  { %v5065_v31 = vsub.f32 %v5057_v57, %v5061_v14 }
 0x800   :  { %v5067_v44 = vmul.f32 1.442695, %v5065_v31 }
 0x801   :  { %v5064_v22 = vpop.xlane.xlu0 %5063 }
 0x802   :  { %6050 = vpow2.f32 %v5067_v44  ;;  %v5066_v16 = vsub.f32 %v5058_v45, %v5064_v22 }
 0x804   :  { %v5069_v19 = vmul.f32 1.442695, %v5066_v16 }
 0x806   :  { %6052 = vpow2.f32 %v5069_v19 }
 0x80c   :  { %v6051_v11 = vpop.eup %6050 }
 0x80d   :  { %5526 = vmatprep.mubr.msk.f32.mxu1 %vm623_vm4, %v6051_v11  ;;  %v5071_v0 = vsel %vm623_vm4, %v6051_v11, 0.0 }
 0x80e   :  { %5072 = vadd.xlane.f32.xlu0 %v5071_v0 }
 0x810   :  { %v6053_v59 = vpop.eup %6052 }
 0x811   :  { %5527 = vmatmul.mubr.msk.f32.vlgmr.msra.gmra.mrb[6].mxu1 %vm623_vm4, %v6053_v59  ;;  %v5074_v8 = vsel %vm623_vm4, %v6053_v59, 0.0 }
 0x812   :  { %5075 = vadd.xlane.f32.xlu1 %v5074_v8  ;;  %5533 = vmatprep.mubr.msk.f32.mxu1 %vm6105_vm14, %v9344_v18 }
 0x89b   :  { %v5073_v36 = vpop.xlane.xlu0 %5072 }
 0x89f   :  { %v5076_v10 = vpop.xlane.xlu1 %5075 }
 0x8a0   :  { %6054 = vrcp.f32 %v5076_v10 }
 0x8a1   :  { %6056 = vrcp.f32 %v5073_v36 }
 0x8aa   :  { %v6055_v43 = vpop.eup %6054 }
 0x8ab   :  { %v6057_v38 = vpop.eup %6056 }
 0x8e4   :  { %v5528_v28 = vpop.f32.mrb[6].mxu1 }
 0x8e5   :  { %v5163_v37 = vmul.f32 %v6055_v43, %v5528_v28  ;;  %v5149_v53 = vpop.f32.mrb[7].mxu1 }
 0x8e6   :  { %v5162_v50 = vmul.f32 %v6057_v38, %v5149_v53 }
 0x8e7   :  { %v5172_v39 = vadd.f32 %v5361_v52, %v5163_v37 }
 0x8e8   :  { %v5171_v9 = vadd.f32 %v5361_v52, %v5162_v50 }
 0x8ea   :  { %v5632_v48 = vpack.c.bf16 %v5172_v39, %v5171_v9 }
 0x8ec   :  { %5633 = vmatpush3.bf16.msra.mxu1 %v5632_v48 }
 0x8ef   :  { %5534 = vmatmul.mubr.msk.f32.vlgmr.msra.gmra.mrb[8].mxu1 %vm623_vm4, %v5173_v1 }
 0x9c2   :  { %v5243_v35 = vpop.f32.mrb[8].mxu1 }
 0x9c3   :  { %v5535_v15 = vpop.f32.mrb[9].mxu1  ;;  %5545 = vmatmul.mubr.msk.f32.vlgmr.msra.gmra.mrb[4].mxu0 %vm47_vm0, %v5243_v35 }
 0xa96   :  { %v5327_v5 = vpop.f32.mrb[4].mxu0 }
 0xa97   :  { %v5328_v25 = vadd.f32 %v5363_v56, %v5327_v5  ;;  %v5546_v12 = vpop.f32.mrb[5].mxu0 }
 0xa99   :  { %5332 = vst.msk [vmem:[#allocation2] sm:$0x3] %vm5331_vm15, %v5328_v25 }
 0xa9a   :  { %6071 = shalt.err (!%p6068_p4)
}
 0xa9b   :  { %s6072_s5 = scalar_lea.hbm %s8803_s11, 32 }
 0xa9c   :  { %p6073_p5 = scmp.ne.s32.totalorder %s8803_s11, %s6072_s5  ;;  %p6076_p6 = scmp.lt.u32.totalorder %s6072_s5, %s8803_s11 }
 0xa9e   :  { %p6078_p7 = pnand %p6076_p6, %p6073_p5 }
 0xaa0   :  { %6081 = shalt.err (!%p6078_p7)
}
 0xaa1   :  { %5342 = dma.vmem_to_hbm [thread:$0]  %s5340_s17, 32, %s8803_s11, [#allocation3]  }
 0xaa2   :  { %6082 = dma.done.wait [#allocation3], 32  }
 0xaa3   :  { %6083 = vsyncadd [#allocation3], 4294967264 }
 0xaa4   :  { %5346 = vsyncpa [#allocation3], 1 }

</bundles_post_ra>
